<compile_context>
chip_gen: v5e
topology: v5e:2x2
jax: 0.10.0
libtpu: 0.0.40
codegen_flags: <defaults>
</compile_context>

<pallas_src>
import jax
import jax.numpy as jnp
from jax.experimental import pallas as pl
from jax.experimental.pallas import tpu as pltpu

BN_EPS = 1e-5        # PyTorch BatchNorm2d default eps
TM_MAX = 512         # cap on the M tile; K and N are always single blocks
LANE = 128
SUB = 8


def _round_up(x, m):
    return (x + m - 1) // m * m


def _pick_tm(m):
    tm = min(TM_MAX, _round_up(m, SUB))
    return tm, _round_up(m, tm)


def _pad3(x, shape):
    return jnp.pad(x, [(0, s - d) for s, d in zip(shape, x.shape)])


# --------------------------- Pallas kernels ---------------------------------

def _gemm_stats_kernel(a_ref, b_ref, o_ref, s_ref, q_ref):
    """Per (group, M-tile): O = A @ B (bf16 in, f32 out) + fused BN column stats."""
    @pl.when(pl.program_id(1) == 0)
    def _():
        s_ref[...] = jnp.zeros_like(s_ref)
        q_ref[...] = jnp.zeros_like(q_ref)

    o = jnp.dot(a_ref[0], b_ref[0], preferred_element_type=jnp.float32)
    s_ref[0] += jnp.sum(o, axis=0, keepdims=True)
    q_ref[0] += jnp.sum(o * o, axis=0, keepdims=True)
    o_ref[0] = o


def _gemm_tanh_kernel(a_ref, b_ref, o_ref):
    """Final layer: O = tanh(A @ B), bf16 inputs, f32 math."""
    o = jnp.dot(a_ref[0], b_ref[0], preferred_element_type=jnp.float32)
    o_ref[0] = jnp.tanh(o)


def _bn_relu_kernel(o_ref, scale_ref, shift_ref, y_ref):
    """y = relu(o * scale + shift), per-channel scale/shift broadcast over rows."""
    y = o_ref[0] * scale_ref[...] + shift_ref[...]
    y_ref[0] = jnp.maximum(y, 0.0)


# --------------------------- pallas_call wrappers ----------------------------

def grouped_gemm(a, w, *, with_stats):
    """Grouped single-K-block GEMM.

    a: (G, M, K), w: (G, K, N) — cast to bf16 internally, f32 accumulate.
    with_stats=True  -> (O_padded (G, Mp, Np) f32, col_sums (G, Np), col_sqsums (G, Np))
    with_stats=False -> tanh(O)_padded (G, Mp, Np) f32
    """
    G, M, K = a.shape
    _, _, N = w.shape
    TM, Mp = _pick_tm(M)
    Kp = _round_up(K, LANE)
    Np = _round_up(N, LANE)
    a_p = _pad3(a, (G, Mp, Kp)).astype(jnp.bfloat16)
    w_p = _pad3(w, (G, Kp, Np)).astype(jnp.bfloat16)
    mblocks = Mp // TM

    in_specs = [pl.BlockSpec((1, TM, Kp), lambda g, i: (g, i, 0)),
                pl.BlockSpec((1, Kp, Np), lambda g, i: (g, 0, 0))]

    if with_stats:
        o, s, q = pl.pallas_call(
            _gemm_stats_kernel,
            out_shape=(jax.ShapeDtypeStruct((G, Mp, Np), jnp.float32),
                       jax.ShapeDtypeStruct((G, 1, Np), jnp.float32),
                       jax.ShapeDtypeStruct((G, 1, Np), jnp.float32)),
            grid_spec=pltpu.PrefetchScalarGridSpec(
                num_scalar_prefetch=0,
                grid=(G, mblocks),
                in_specs=in_specs,
                out_specs=(pl.BlockSpec((1, TM, Np), lambda g, i: (g, i, 0)),
                           pl.BlockSpec((1, 1, Np), lambda g, i: (g, 0, 0)),
                           pl.BlockSpec((1, 1, Np), lambda g, i: (g, 0, 0)))),
            compiler_params=pltpu.CompilerParams(
                dimension_semantics=("parallel", "arbitrary")),
        )(a_p, w_p)
        return o, s[:, 0, :], q[:, 0, :]

    o = pl.pallas_call(
        _gemm_tanh_kernel,
        out_shape=jax.ShapeDtypeStruct((G, Mp, Np), jnp.float32),
        grid_spec=pltpu.PrefetchScalarGridSpec(
            num_scalar_prefetch=0,
            grid=(G, mblocks),
            in_specs=in_specs,
            out_specs=pl.BlockSpec((1, TM, Np), lambda g, i: (g, i, 0))),
        compiler_params=pltpu.CompilerParams(
            dimension_semantics=("parallel", "parallel")),
    )(a_p, w_p)
    return o


def pallas_bn_relu(o_pad, scale, shift):
    """BN affine + ReLU over the padded GEMM output (G, Mp, Np).

    Pad lanes get scale=shift=0 so they stay zero; result is sliced once by the caller.
    """
    G, Mp, Np = o_pad.shape
    TM = min(TM_MAX, Mp)          # Mp is a multiple of the GEMM tile, so TM | Mp
    N = scale.shape[0]
    scale_p = jnp.zeros((1, Np), jnp.float32).at[0, :N].set(scale)
    shift_p = jnp.zeros((1, Np), jnp.float32).at[0, :N].set(shift)
    return pl.pallas_call(
        _bn_relu_kernel,
        out_shape=jax.ShapeDtypeStruct((G, Mp, Np), jnp.float32),
        grid_spec=pltpu.PrefetchScalarGridSpec(
            num_scalar_prefetch=0,
            grid=(G, Mp // TM),
            in_specs=[pl.BlockSpec((1, TM, Np), lambda g, i: (g, i, 0)),
                      pl.BlockSpec((1, Np), lambda g, i: (0, 0)),
                      pl.BlockSpec((1, Np), lambda g, i: (0, 0))],
            out_specs=pl.BlockSpec((1, TM, Np), lambda g, i: (g, i, 0))),
        compiler_params=pltpu.CompilerParams(
            dimension_semantics=("parallel", "parallel")),
    )(o_pad, scale_p, shift_p)


# --------------------------- JAX glue (patch extraction / layout) ------------

def _subpixel_groups(x, w):
    """Stride-2 / padding-1 / 4x4 ConvTranspose -> 4-group sub-pixel GEMM operands.

    x: (B, H, W, Cin) NHWC; w: (Cin, Cout, 4, 4) PyTorch ConvTranspose2d layout.
    Group g = ey*2 + ex handles output pixels (2*qy+ey, 2*qx+ex); each output pixel
    touches exactly 2x2 input taps, so K = 4*Cin (vs 16*Cin for zero-dilated im2col).
    """
    B, H, Wsp, Cin = x.shape
    _, Cout, K, _ = w.shape
    assert K == 4
    xp = jnp.pad(x, ((0, 0), (1, 1), (1, 1), (0, 0)))
    a_groups, w_groups = [], []
    for ey in range(2):
        for ex in range(2):
            taps, wtaps = [], []
            for ty in range(2):
                for tx in range(2):
                    taps.append(xp[:, ey + ty:ey + ty + H, ex + tx:ex + tx + Wsp, :])
                    wtaps.append(w[:, :, 3 - ey - 2 * ty, 3 - ex - 2 * tx])
            a_groups.append(jnp.stack(taps, axis=3).reshape(B * H * Wsp, 4 * Cin))
            w_groups.append(jnp.stack(wtaps, axis=0).reshape(4 * Cin, Cout))
    return jnp.stack(a_groups), jnp.stack(w_groups), (B, H, Wsp, Cout)


def _bn_params_from_stats(s, q, count, Cout, gamma, beta):
    mean = jnp.sum(s[:, :Cout], axis=0) / count
    var = jnp.maximum(jnp.sum(q[:, :Cout], axis=0) / count - mean * mean, 0.0)
    scale = gamma * jax.lax.rsqrt(var + BN_EPS)
    shift = beta - mean * scale
    return scale, shift


def gen_block_first(noise, w, gamma, beta):
    """make_gen_block(z_dim, C, 4, 1, 0): ConvT on a 1x1 input + BN + ReLU."""
    B, Cin = noise.shape
    _, Cout, K, _ = w.shape                              # K == 4
    a = jnp.broadcast_to(noise[None], (K * K, B, Cin))   # same LHS for all 16 pixels
    wm = jnp.transpose(w, (2, 3, 0, 1)).reshape(K * K, Cin, Cout)
    o, s, q = grouped_gemm(a, wm, with_stats=True)       # (16, Bp, Np)
    scale, shift = _bn_params_from_stats(s, q, float(K * K * B), Cout, gamma, beta)
    y = pallas_bn_relu(o, scale, shift)[:, :B, :Cout]    # (16, B, Cout)
    y = y.reshape(K, K, B, Cout)
    return jnp.transpose(y, (2, 0, 1, 3))                # (B, 4, 4, Cout) NHWC


def gen_block_stride2(x, w, gamma, beta, final=False):
    """make_gen_block(Cin, Cout, 4, 2, 1): ConvT + (BN + ReLU | Tanh)."""
    a, wm, (B, H, Wsp, Cout) = _subpixel_groups(x, w)
    M = B * H * Wsp
    if final:
        y = grouped_gemm(a, wm, with_stats=False)[:, :M, :Cout]      # tanh fused
    else:
        o, s, q = grouped_gemm(a, wm, with_stats=True)
        scale, shift = _bn_params_from_stats(s, q, 4.0 * M, Cout, gamma, beta)
        y = pallas_bn_relu(o, scale, shift)[:, :M, :Cout]
    # interleave the 4 sub-pixel groups back into (B, 2H, 2W, Cout)
    y = y.reshape(2, 2, B, H, Wsp, Cout)
    return jnp.transpose(y, (2, 3, 0, 4, 1, 5)).reshape(B, 2 * H, 2 * Wsp, Cout)


# --------------------------- model --------------------------------------------

def init_generator_params(key, z_dim=100, im_chan=3, hidden_dim=16):
    dims = [(z_dim, hidden_dim * 8),
            (hidden_dim * 8, hidden_dim * 4),
            (hidden_dim * 4, hidden_dim * 2),
            (hidden_dim * 2, hidden_dim),
            (hidden_dim, im_chan)]
    params = []
    for idx, (cin, cout) in enumerate(dims):
        key, wk = jax.random.split(key)
        w = 0.05 * jax.random.normal(wk, (cin, cout, 4, 4), jnp.float32)
        if idx < len(dims) - 1:
            gamma = jnp.ones((cout,), jnp.float32)       # BN init: weight=1
            beta = jnp.zeros((cout,), jnp.float32)       # BN init: bias=0
        else:
            gamma = beta = None
        params.append((w, gamma, beta))
    return params


def generator_forward(noise, params):
    """noise: (B, z_dim) -> image (B, im_chan, 64, 64) NCHW."""
    w0, g0, b0 = params[0]
    x = gen_block_first(noise, w0, g0, b0)               # stride 1, pad 0
    n = len(params)
    for i in range(1, n):
        w, g, b = params[i]
        x = gen_block_stride2(x, w, g, b, final=(i == n - 1))   # stride 2, pad 1
    return jnp.transpose(x, (0, 3, 1, 2))                # NHWC -> NCHW


# --------------------------- pure-JAX reference (f32) -------------------------

def _conv_transpose_ref(x_nchw, w, stride, padding):
    K = w.shape[-1]
    w_conv = jnp.transpose(jnp.flip(w, (2, 3)), (1, 0, 2, 3))   # (Cout, Cin, K, K)
    pad = K - 1 - padding
    return jax.lax.conv_general_dilated(
        x_nchw, w_conv, window_strides=(1, 1),
        padding=[(pad, pad), (pad, pad)],
        lhs_dilation=(stride, stride),
        dimension_numbers=("NCHW", "OIHW", "NCHW"))


def generator_reference(noise, params):
    x = noise.reshape(noise.shape[0], noise.shape[1], 1, 1)
    strides = [1, 2, 2, 2, 2]
    paddings = [0, 1, 1, 1, 1]
    n = len(params)
    for i, (w, gamma, beta) in enumerate(params):
        x = _conv_transpose_ref(x, w, strides[i], paddings[i])
        if i < n - 1:
            mean = jnp.mean(x, axis=(0, 2, 3), keepdims=True)
            var = jnp.mean((x - mean) ** 2, axis=(0, 2, 3), keepdims=True)
            x = (x - mean) * jax.lax.rsqrt(var + BN_EPS)
            x = x * gamma.reshape(1, -1, 1, 1) + beta.reshape(1, -1, 1, 1)
            x = jnp.maximum(x, 0.0)
        else:
            x = jnp.tanh(x)
    return x


if __name__ == "__main__":
    key = jax.random.PRNGKey(0)
    pkey, nkey = jax.random.split(key)
    z_dim, im_chan, hidden_dim, batch = 100, 3, 16, 2    # small hidden_dim for speed
    params = init_generator_params(pkey, z_dim, im_chan, hidden_dim)
    noise = jax.random.normal(nkey, (batch, z_dim), jnp.float32)

    img = jax.jit(generator_forward)(noise, params)
    img = jax.block_until_ready(img)

    assert img.shape == (batch, im_chan, 64, 64), img.shape
    assert bool(jnp.all(jnp.isfinite(img)))
    assert bool(jnp.all(jnp.abs(img) <= 1.0 + 1e-6))     # tanh output range

    # Loose tolerance: Pallas path uses bf16 GEMM inputs, reference is f32 throughout.
    ref = generator_reference(noise, params)
    max_err = float(jnp.max(jnp.abs(img - ref)))
    assert max_err < 0.2, f"max abs err vs f32 reference: {max_err}"
    print("KERNEL_OK")
</pallas_src>

<mosaic_0001>
module attributes {stable_mosaic.version = 11 : i64} {
  func.func @_gemm_stats_kernel(%arg0: i32, %arg1: i32, %arg2: memref<1x8x128xbf16, #tpu.memory_space<vmem>>, %arg3: memref<1x128x128xbf16, #tpu.memory_space<vmem>>, %arg4: memref<1x8x128xf32, #tpu.memory_space<vmem>>, %arg5: memref<1x1x128xf32, #tpu.memory_space<vmem>>, %arg6: memref<1x1x128xf32, #tpu.memory_space<vmem>>) attributes {dimension_semantics = [#tpu.dimension_semantics<parallel>, #tpu.dimension_semantics<arbitrary>], iteration_bounds = array<i64: 16, 1>, scalar_prefetch = 0 : i64, scratch_operands = 0 : i64, tpu.core_type = #tpu.core_type<tc>, window_params = [{transform_indices = @transform_0, window_bounds = array<i64: 1, 8, 128>}, {transform_indices = @transform_1, window_bounds = array<i64: 1, 128, 128>}, {transform_indices = @transform_2, window_bounds = array<i64: 1, 8, 128>}, {transform_indices = @transform_3, window_bounds = array<i64: 1, 1, 128>}, {transform_indices = @transform_4, window_bounds = array<i64: 1, 1, 128>}]} {
    %c0_i32 = arith.constant 0 : i32
    %0 = arith.cmpi eq, %arg1, %c0_i32 : i32
    %1 = arith.extui %0 : i1 to i32
    %c0_i32_0 = arith.constant 0 : i32
    %2 = arith.cmpi ne, %1, %c0_i32_0 : i32
    scf.if %2 {
      %cst_23 = arith.constant 0.000000e+00 : f32
      %28 = vector.broadcast %cst_23 : f32 to vector<1x1x128xf32>
      %c0_24 = arith.constant 0 : index
      %c0_25 = arith.constant 0 : index
      %c0_26 = arith.constant 0 : index
      %29 = vector.load %arg5[%c0_24, %c0_25, %c0_26] : memref<1x1x128xf32, #tpu.memory_space<vmem>>, vector<1x1x128xf32>
      tpu.vector_store %arg5[%c0_24, %c0_25, %c0_26], %28 {strides = array<i32>} : memref<1x1x128xf32, #tpu.memory_space<vmem>>, vector<1x1x128xf32>,
      %cst_27 = arith.constant 0.000000e+00 : f32
      %30 = vector.broadcast %cst_27 : f32 to vector<1x1x128xf32>
      %c0_28 = arith.constant 0 : index
      %c0_29 = arith.constant 0 : index
      %c0_30 = arith.constant 0 : index
      %31 = vector.load %arg6[%c0_28, %c0_29, %c0_30] : memref<1x1x128xf32, #tpu.memory_space<vmem>>, vector<1x1x128xf32>
      tpu.vector_store %arg6[%c0_28, %c0_29, %c0_30], %30 {strides = array<i32>} : memref<1x1x128xf32, #tpu.memory_space<vmem>>, vector<1x1x128xf32>,
    } else {
    }
    %c0 = arith.constant 0 : index
    %c0_1 = arith.constant 0 : index
    %c0_2 = arith.constant 0 : index
    %3 = vector.load %arg2[%c0, %c0_1, %c0_2] : memref<1x8x128xbf16, #tpu.memory_space<vmem>>, vector<1x8x128xbf16>
    %4 = vector.shape_cast %3 : vector<1x8x128xbf16> to vector<8x128xbf16>
    %c0_3 = arith.constant 0 : index
    %c0_4 = arith.constant 0 : index
    %c0_5 = arith.constant 0 : index
    %5 = vector.load %arg3[%c0_3, %c0_4, %c0_5] : memref<1x128x128xbf16, #tpu.memory_space<vmem>>, vector<1x128x128xbf16>
    %6 = vector.shape_cast %5 : vector<1x128x128xbf16> to vector<128x128xbf16>
    %cst = arith.constant dense<0.000000e+00> : vector<8x128xf32>
    %7 = tpu.matmul %4, %6, %cst {dimension_numbers = #tpu.dot_dimension_numbers<[1], [0], [0], [1], [0, 0, 1, 1], [], []>} : vector<8x128xbf16>, vector<128x128xbf16>, vector<8x128xf32> -> vector<8x128xf32>
    %c0_6 = arith.constant 0 : index
    %c0_7 = arith.constant 0 : index
    %c0_8 = arith.constant 0 : index
    %8 = vector.load %arg5[%c0_6, %c0_7, %c0_8] : memref<1x1x128xf32, #tpu.memory_space<vmem>>, vector<1x1x128xf32>
    %9 = vector.shape_cast %8 : vector<1x1x128xf32> to vector<1x128xf32>
    %cst_9 = arith.constant dense<0.000000e+00> : vector<128xf32>
    %10 = vector.multi_reduction <add>, %7, %cst_9 [0] : vector<8x128xf32> to vector<128xf32>
    %11 = vector.shape_cast %10 : vector<128xf32> to vector<1x128xf32>
    %12 = arith.addf %9, %11 : vector<1x128xf32>
    %c0_10 = arith.constant 0 : index
    %c0_11 = arith.constant 0 : index
    %c0_12 = arith.constant 0 : index
    %13 = vector.load %arg5[%c0_10, %c0_11, %c0_12] : memref<1x1x128xf32, #tpu.memory_space<vmem>>, vector<1x1x128xf32>
    %14 = vector.shape_cast %13 : vector<1x1x128xf32> to vector<1x128xf32>
    %15 = vector.shape_cast %12 : vector<1x128xf32> to vector<1x1x128xf32>
    tpu.vector_store %arg5[%c0_10, %c0_11, %c0_12], %15 {strides = array<i32>} : memref<1x1x128xf32, #tpu.memory_space<vmem>>, vector<1x1x128xf32>,
    %c0_13 = arith.constant 0 : index
    %c0_14 = arith.constant 0 : index
    %c0_15 = arith.constant 0 : index
    %16 = vector.load %arg6[%c0_13, %c0_14, %c0_15] : memref<1x1x128xf32, #tpu.memory_space<vmem>>, vector<1x1x128xf32>
    %17 = vector.shape_cast %16 : vector<1x1x128xf32> to vector<1x128xf32>
    %18 = arith.mulf %7, %7 : vector<8x128xf32>
    %cst_16 = arith.constant dense<0.000000e+00> : vector<128xf32>
    %19 = vector.multi_reduction <add>, %18, %cst_16 [0] : vector<8x128xf32> to vector<128xf32>
    %20 = vector.shape_cast %19 : vector<128xf32> to vector<1x128xf32>
    %21 = arith.addf %17, %20 : vector<1x128xf32>
    %c0_17 = arith.constant 0 : index
    %c0_18 = arith.constant 0 : index
    %c0_19 = arith.constant 0 : index
    %22 = vector.load %arg6[%c0_17, %c0_18, %c0_19] : memref<1x1x128xf32, #tpu.memory_space<vmem>>, vector<1x1x128xf32>
    %23 = vector.shape_cast %22 : vector<1x1x128xf32> to vector<1x128xf32>
    %24 = vector.shape_cast %21 : vector<1x128xf32> to vector<1x1x128xf32>
    tpu.vector_store %arg6[%c0_17, %c0_18, %c0_19], %24 {strides = array<i32>} : memref<1x1x128xf32, #tpu.memory_space<vmem>>, vector<1x1x128xf32>,
    %c0_20 = arith.constant 0 : index
    %c0_21 = arith.constant 0 : index
    %c0_22 = arith.constant 0 : index
    %25 = vector.load %arg4[%c0_20, %c0_21, %c0_22] : memref<1x8x128xf32, #tpu.memory_space<vmem>>, vector<1x8x128xf32>
    %26 = vector.shape_cast %25 : vector<1x8x128xf32> to vector<8x128xf32>
    %27 = vector.shape_cast %7 : vector<8x128xf32> to vector<1x8x128xf32>
    tpu.vector_store %arg4[%c0_20, %c0_21, %c0_22], %27 {strides = array<i32>} : memref<1x8x128xf32, #tpu.memory_space<vmem>>, vector<1x8x128xf32>,
    return
  }
  func.func @transform_0(%arg0: i32, %arg1: i32) -> (i32, i32, i32) {
    %c0_i32 = arith.constant 0 : i32
    %c0_i32_0 = arith.constant 0 : i32
    return %arg0, %arg1, %c0_i32 : i32, i32, i32
  }
  func.func @transform_1(%arg0: i32, %arg1: i32) -> (i32, i32, i32) {
    %c0_i32 = arith.constant 0 : i32
    %c0_i32_0 = arith.constant 0 : i32
    %c0_i32_1 = arith.constant 0 : i32
    return %arg0, %c0_i32, %c0_i32_0 : i32, i32, i32
  }
  func.func @transform_2(%arg0: i32, %arg1: i32) -> (i32, i32, i32) {
    %c0_i32 = arith.constant 0 : i32
    %c0_i32_0 = arith.constant 0 : i32
    return %arg0, %arg1, %c0_i32 : i32, i32, i32
  }
  func.func @transform_3(%arg0: i32, %arg1: i32) -> (i32, i32, i32) {
    %c0_i32 = arith.constant 0 : i32
    %c0_i32_0 = arith.constant 0 : i32
    %c0_i32_1 = arith.constant 0 : i32
    return %arg0, %c0_i32, %c0_i32_0 : i32, i32, i32
  }
  func.func @transform_4(%arg0: i32, %arg1: i32) -> (i32, i32, i32) {
    %c0_i32 = arith.constant 0 : i32
    %c0_i32_0 = arith.constant 0 : i32
    %c0_i32_1 = arith.constant 0 : i32
    return %arg0, %c0_i32, %c0_i32_0 : i32, i32, i32
  }
}

module attributes {stable_mosaic.version = 11 : i64} {
  func.func @_bn_relu_kernel(%arg0: i32, %arg1: i32, %arg2: memref<1x8x128xf32, #tpu.memory_space<vmem>>, %arg3: memref<1x128xf32, #tpu.memory_space<vmem>>, %arg4: memref<1x128xf32, #tpu.memory_space<vmem>>, %arg5: memref<1x8x128xf32, #tpu.memory_space<vmem>>) attributes {dimension_semantics = [#tpu.dimension_semantics<parallel>, #tpu.dimension_semantics<parallel>], iteration_bounds = array<i64: 16, 1>, scalar_prefetch = 0 : i64, scratch_operands = 0 : i64, tpu.core_type = #tpu.core_type<tc>, window_params = [{transform_indices = @transform_0, window_bounds = array<i64: 1, 8, 128>}, {pipeline_mode = #tpu.pipeline_mode<synchronous>, transform_indices = @transform_1, window_bounds = array<i64: 1, 128>}, {pipeline_mode = #tpu.pipeline_mode<synchronous>, transform_indices = @transform_2, window_bounds = array<i64: 1, 128>}, {transform_indices = @transform_3, window_bounds = array<i64: 1, 8, 128>}]} {
    %c0 = arith.constant 0 : index
    %c0_0 = arith.constant 0 : index
    %c0_1 = arith.constant 0 : index
    %0 = vector.load %arg2[%c0, %c0_0, %c0_1] : memref<1x8x128xf32, #tpu.memory_space<vmem>>, vector<1x8x128xf32>
    %1 = vector.shape_cast %0 : vector<1x8x128xf32> to vector<8x128xf32>
    %c0_2 = arith.constant 0 : index
    %c0_3 = arith.constant 0 : index
    %2 = vector.load %arg3[%c0_2, %c0_3] : memref<1x128xf32, #tpu.memory_space<vmem>>, vector<1x128xf32>
    %3 = vector.broadcast %2 : vector<1x128xf32> to vector<8x128xf32>
    %4 = arith.mulf %1, %3 : vector<8x128xf32>
    %c0_4 = arith.constant 0 : index
    %c0_5 = arith.constant 0 : index
    %5 = vector.load %arg4[%c0_4, %c0_5] : memref<1x128xf32, #tpu.memory_space<vmem>>, vector<1x128xf32>
    %6 = vector.broadcast %5 : vector<1x128xf32> to vector<8x128xf32>
    %7 = arith.addf %4, %6 : vector<8x128xf32>
    %cst = arith.constant 0.000000e+00 : f32
    %8 = vector.broadcast %cst : f32 to vector<8x128xf32>
    %9 = arith.maximumf %7, %8 : vector<8x128xf32>
    %c0_6 = arith.constant 0 : index
    %c0_7 = arith.constant 0 : index
    %c0_8 = arith.constant 0 : index
    %10 = vector.load %arg5[%c0_6, %c0_7, %c0_8] : memref<1x8x128xf32, #tpu.memory_space<vmem>>, vector<1x8x128xf32>
    %11 = vector.shape_cast %10 : vector<1x8x128xf32> to vector<8x128xf32>
    %12 = vector.shape_cast %9 : vector<8x128xf32> to vector<1x8x128xf32>
    tpu.vector_store %arg5[%c0_6, %c0_7, %c0_8], %12 {strides = array<i32>} : memref<1x8x128xf32, #tpu.memory_space<vmem>>, vector<1x8x128xf32>,
    return
  }
  func.func @transform_0(%arg0: i32, %arg1: i32) -> (i32, i32, i32) {
    %c0_i32 = arith.constant 0 : i32
    %c0_i32_0 = arith.constant 0 : i32
    return %arg0, %arg1, %c0_i32 : i32, i32, i32
  }
  func.func @transform_1(%arg0: i32, %arg1: i32) -> (i32, i32) {
    %c0_i32 = arith.constant 0 : i32
    %c0_i32_0 = arith.constant 0 : i32
    %c0_i32_1 = arith.constant 0 : i32
    return %c0_i32, %c0_i32_0 : i32, i32
  }
  func.func @transform_2(%arg0: i32, %arg1: i32) -> (i32, i32) {
    %c0_i32 = arith.constant 0 : i32
    %c0_i32_0 = arith.constant 0 : i32
    %c0_i32_1 = arith.constant 0 : i32
    return %c0_i32, %c0_i32_0 : i32, i32
  }
  func.func @transform_3(%arg0: i32, %arg1: i32) -> (i32, i32, i32) {
    %c0_i32 = arith.constant 0 : i32
    %c0_i32_0 = arith.constant 0 : i32
    return %arg0, %arg1, %c0_i32 : i32, i32, i32
  }
}

module attributes {stable_mosaic.version = 11 : i64} {
  func.func @_gemm_stats_kernel(%arg0: i32, %arg1: i32, %arg2: memref<1x32x512xbf16, #tpu.memory_space<vmem>>, %arg3: memref<1x512x128xbf16, #tpu.memory_space<vmem>>, %arg4: memref<1x32x128xf32, #tpu.memory_space<vmem>>, %arg5: memref<1x1x128xf32, #tpu.memory_space<vmem>>, %arg6: memref<1x1x128xf32, #tpu.memory_space<vmem>>) attributes {dimension_semantics = [#tpu.dimension_semantics<parallel>, #tpu.dimension_semantics<arbitrary>], iteration_bounds = array<i64: 4, 1>, scalar_prefetch = 0 : i64, scratch_operands = 0 : i64, tpu.core_type = #tpu.core_type<tc>, window_params = [{transform_indices = @transform_0, window_bounds = array<i64: 1, 32, 512>}, {transform_indices = @transform_1, window_bounds = array<i64: 1, 512, 128>}, {transform_indices = @transform_2, window_bounds = array<i64: 1, 32, 128>}, {transform_indices = @transform_3, window_bounds = array<i64: 1, 1, 128>}, {transform_indices = @transform_4, window_bounds = array<i64: 1, 1, 128>}]} {
    %c0_i32 = arith.constant 0 : i32
    %0 = arith.cmpi eq, %arg1, %c0_i32 : i32
    %1 = arith.extui %0 : i1 to i32
    %c0_i32_0 = arith.constant 0 : i32
    %2 = arith.cmpi ne, %1, %c0_i32_0 : i32
    scf.if %2 {
      %cst_23 = arith.constant 0.000000e+00 : f32
      %28 = vector.broadcast %cst_23 : f32 to vector<1x1x128xf32>
      %c0_24 = arith.constant 0 : index
      %c0_25 = arith.constant 0 : index
      %c0_26 = arith.constant 0 : index
      %29 = vector.load %arg5[%c0_24, %c0_25, %c0_26] : memref<1x1x128xf32, #tpu.memory_space<vmem>>, vector<1x1x128xf32>
      tpu.vector_store %arg5[%c0_24, %c0_25, %c0_26], %28 {strides = array<i32>} : memref<1x1x128xf32, #tpu.memory_space<vmem>>, vector<1x1x128xf32>,
      %cst_27 = arith.constant 0.000000e+00 : f32
      %30 = vector.broadcast %cst_27 : f32 to vector<1x1x128xf32>
      %c0_28 = arith.constant 0 : index
      %c0_29 = arith.constant 0 : index
      %c0_30 = arith.constant 0 : index
      %31 = vector.load %arg6[%c0_28, %c0_29, %c0_30] : memref<1x1x128xf32, #tpu.memory_space<vmem>>, vector<1x1x128xf32>
      tpu.vector_store %arg6[%c0_28, %c0_29, %c0_30], %30 {strides = array<i32>} : memref<1x1x128xf32, #tpu.memory_space<vmem>>, vector<1x1x128xf32>,
    } else {
    }
    %c0 = arith.constant 0 : index
    %c0_1 = arith.constant 0 : index
    %c0_2 = arith.constant 0 : index
    %3 = vector.load %arg2[%c0, %c0_1, %c0_2] : memref<1x32x512xbf16, #tpu.memory_space<vmem>>, vector<1x32x512xbf16>
    %4 = vector.shape_cast %3 : vector<1x32x512xbf16> to vector<32x512xbf16>
    %c0_3 = arith.constant 0 : index
    %c0_4 = arith.constant 0 : index
    %c0_5 = arith.constant 0 : index
    %5 = vector.load %arg3[%c0_3, %c0_4, %c0_5] : memref<1x512x128xbf16, #tpu.memory_space<vmem>>, vector<1x512x128xbf16>
    %6 = vector.shape_cast %5 : vector<1x512x128xbf16> to vector<512x128xbf16>
    %cst = arith.constant dense<0.000000e+00> : vector<32x128xf32>
    %7 = tpu.matmul %4, %6, %cst {dimension_numbers = #tpu.dot_dimension_numbers<[1], [0], [0], [1], [0, 0, 1, 1], [], []>} : vector<32x512xbf16>, vector<512x128xbf16>, vector<32x128xf32> -> vector<32x128xf32>
    %c0_6 = arith.constant 0 : index
    %c0_7 = arith.constant 0 : index
    %c0_8 = arith.constant 0 : index
    %8 = vector.load %arg5[%c0_6, %c0_7, %c0_8] : memref<1x1x128xf32, #tpu.memory_space<vmem>>, vector<1x1x128xf32>
    %9 = vector.shape_cast %8 : vector<1x1x128xf32> to vector<1x128xf32>
    %cst_9 = arith.constant dense<0.000000e+00> : vector<128xf32>
    %10 = vector.multi_reduction <add>, %7, %cst_9 [0] : vector<32x128xf32> to vector<128xf32>
    %11 = vector.shape_cast %10 : vector<128xf32> to vector<1x128xf32>
    %12 = arith.addf %9, %11 : vector<1x128xf32>
    %c0_10 = arith.constant 0 : index
    %c0_11 = arith.constant 0 : index
    %c0_12 = arith.constant 0 : index
    %13 = vector.load %arg5[%c0_10, %c0_11, %c0_12] : memref<1x1x128xf32, #tpu.memory_space<vmem>>, vector<1x1x128xf32>
    %14 = vector.shape_cast %13 : vector<1x1x128xf32> to vector<1x128xf32>
    %15 = vector.shape_cast %12 : vector<1x128xf32> to vector<1x1x128xf32>
    tpu.vector_store %arg5[%c0_10, %c0_11, %c0_12], %15 {strides = array<i32>} : memref<1x1x128xf32, #tpu.memory_space<vmem>>, vector<1x1x128xf32>,
    %c0_13 = arith.constant 0 : index
    %c0_14 = arith.constant 0 : index
    %c0_15 = arith.constant 0 : index
    %16 = vector.load %arg6[%c0_13, %c0_14, %c0_15] : memref<1x1x128xf32, #tpu.memory_space<vmem>>, vector<1x1x128xf32>
    %17 = vector.shape_cast %16 : vector<1x1x128xf32> to vector<1x128xf32>
    %18 = arith.mulf %7, %7 : vector<32x128xf32>
    %cst_16 = arith.constant dense<0.000000e+00> : vector<128xf32>
    %19 = vector.multi_reduction <add>, %18, %cst_16 [0] : vector<32x128xf32> to vector<128xf32>
    %20 = vector.shape_cast %19 : vector<128xf32> to vector<1x128xf32>
    %21 = arith.addf %17, %20 : vector<1x128xf32>
    %c0_17 = arith.constant 0 : index
    %c0_18 = arith.constant 0 : index
    %c0_19 = arith.constant 0 : index
    %22 = vector.load %arg6[%c0_17, %c0_18, %c0_19] : memref<1x1x128xf32, #tpu.memory_space<vmem>>, vector<1x1x128xf32>
    %23 = vector.shape_cast %22 : vector<1x1x128xf32> to vector<1x128xf32>
    %24 = vector.shape_cast %21 : vector<1x128xf32> to vector<1x1x128xf32>
    tpu.vector_store %arg6[%c0_17, %c0_18, %c0_19], %24 {strides = array<i32>} : memref<1x1x128xf32, #tpu.memory_space<vmem>>, vector<1x1x128xf32>,
    %c0_20 = arith.constant 0 : index
    %c0_21 = arith.constant 0 : index
    %c0_22 = arith.constant 0 : index
    %25 = vector.load %arg4[%c0_20, %c0_21, %c0_22] : memref<1x32x128xf32, #tpu.memory_space<vmem>>, vector<1x32x128xf32>
    %26 = vector.shape_cast %25 : vector<1x32x128xf32> to vector<32x128xf32>
    %27 = vector.shape_cast %7 : vector<32x128xf32> to vector<1x32x128xf32>
    tpu.vector_store %arg4[%c0_20, %c0_21, %c0_22], %27 {strides = array<i32>} : memref<1x32x128xf32, #tpu.memory_space<vmem>>, vector<1x32x128xf32>,
    return
  }
  func.func @transform_0(%arg0: i32, %arg1: i32) -> (i32, i32, i32) {
    %c0_i32 = arith.constant 0 : i32
    %c0_i32_0 = arith.constant 0 : i32
    return %arg0, %arg1, %c0_i32 : i32, i32, i32
  }
  func.func @transform_1(%arg0: i32, %arg1: i32) -> (i32, i32, i32) {
    %c0_i32 = arith.constant 0 : i32
    %c0_i32_0 = arith.constant 0 : i32
    %c0_i32_1 = arith.constant 0 : i32
    return %arg0, %c0_i32, %c0_i32_0 : i32, i32, i32
  }
  func.func @transform_2(%arg0: i32, %arg1: i32) -> (i32, i32, i32) {
    %c0_i32 = arith.constant 0 : i32
    %c0_i32_0 = arith.constant 0 : i32
    return %arg0, %arg1, %c0_i32 : i32, i32, i32
  }
  func.func @transform_3(%arg0: i32, %arg1: i32) -> (i32, i32, i32) {
    %c0_i32 = arith.constant 0 : i32
    %c0_i32_0 = arith.constant 0 : i32
    %c0_i32_1 = arith.constant 0 : i32
    return %arg0, %c0_i32, %c0_i32_0 : i32, i32, i32
  }
  func.func @transform_4(%arg0: i32, %arg1: i32) -> (i32, i32, i32) {
    %c0_i32 = arith.constant 0 : i32
    %c0_i32_0 = arith.constant 0 : i32
    %c0_i32_1 = arith.constant 0 : i32
    return %arg0, %c0_i32, %c0_i32_0 : i32, i32, i32
  }
}

module attributes {stable_mosaic.version = 11 : i64} {
  func.func @_bn_relu_kernel(%arg0: i32, %arg1: i32, %arg2: memref<1x32x128xf32, #tpu.memory_space<vmem>>, %arg3: memref<1x128xf32, #tpu.memory_space<vmem>>, %arg4: memref<1x128xf32, #tpu.memory_space<vmem>>, %arg5: memref<1x32x128xf32, #tpu.memory_space<vmem>>) attributes {dimension_semantics = [#tpu.dimension_semantics<parallel>, #tpu.dimension_semantics<parallel>], iteration_bounds = array<i64: 4, 1>, scalar_prefetch = 0 : i64, scratch_operands = 0 : i64, tpu.core_type = #tpu.core_type<tc>, window_params = [{transform_indices = @transform_0, window_bounds = array<i64: 1, 32, 128>}, {pipeline_mode = #tpu.pipeline_mode<synchronous>, transform_indices = @transform_1, window_bounds = array<i64: 1, 128>}, {pipeline_mode = #tpu.pipeline_mode<synchronous>, transform_indices = @transform_2, window_bounds = array<i64: 1, 128>}, {transform_indices = @transform_3, window_bounds = array<i64: 1, 32, 128>}]} {
    %c0 = arith.constant 0 : index
    %c0_0 = arith.constant 0 : index
    %c0_1 = arith.constant 0 : index
    %0 = vector.load %arg2[%c0, %c0_0, %c0_1] : memref<1x32x128xf32, #tpu.memory_space<vmem>>, vector<1x32x128xf32>
    %1 = vector.shape_cast %0 : vector<1x32x128xf32> to vector<32x128xf32>
    %c0_2 = arith.constant 0 : index
    %c0_3 = arith.constant 0 : index
    %2 = vector.load %arg3[%c0_2, %c0_3] : memref<1x128xf32, #tpu.memory_space<vmem>>, vector<1x128xf32>
    %3 = vector.broadcast %2 : vector<1x128xf32> to vector<32x128xf32>
    %4 = arith.mulf %1, %3 : vector<32x128xf32>
    %c0_4 = arith.constant 0 : index
    %c0_5 = arith.constant 0 : index
    %5 = vector.load %arg4[%c0_4, %c0_5] : memref<1x128xf32, #tpu.memory_space<vmem>>, vector<1x128xf32>
    %6 = vector.broadcast %5 : vector<1x128xf32> to vector<32x128xf32>
    %7 = arith.addf %4, %6 : vector<32x128xf32>
    %cst = arith.constant 0.000000e+00 : f32
    %8 = vector.broadcast %cst : f32 to vector<32x128xf32>
    %9 = arith.maximumf %7, %8 : vector<32x128xf32>
    %c0_6 = arith.constant 0 : index
    %c0_7 = arith.constant 0 : index
    %c0_8 = arith.constant 0 : index
    %10 = vector.load %arg5[%c0_6, %c0_7, %c0_8] : memref<1x32x128xf32, #tpu.memory_space<vmem>>, vector<1x32x128xf32>
    %11 = vector.shape_cast %10 : vector<1x32x128xf32> to vector<32x128xf32>
    %12 = vector.shape_cast %9 : vector<32x128xf32> to vector<1x32x128xf32>
    tpu.vector_store %arg5[%c0_6, %c0_7, %c0_8], %12 {strides = array<i32>} : memref<1x32x128xf32, #tpu.memory_space<vmem>>, vector<1x32x128xf32>,
    return
  }
  func.func @transform_0(%arg0: i32, %arg1: i32) -> (i32, i32, i32) {
    %c0_i32 = arith.constant 0 : i32
    %c0_i32_0 = arith.constant 0 : i32
    return %arg0, %arg1, %c0_i32 : i32, i32, i32
  }
  func.func @transform_1(%arg0: i32, %arg1: i32) -> (i32, i32) {
    %c0_i32 = arith.constant 0 : i32
    %c0_i32_0 = arith.constant 0 : i32
    %c0_i32_1 = arith.constant 0 : i32
    return %c0_i32, %c0_i32_0 : i32, i32
  }
  func.func @transform_2(%arg0: i32, %arg1: i32) -> (i32, i32) {
    %c0_i32 = arith.constant 0 : i32
    %c0_i32_0 = arith.constant 0 : i32
    %c0_i32_1 = arith.constant 0 : i32
    return %c0_i32, %c0_i32_0 : i32, i32
  }
  func.func @transform_3(%arg0: i32, %arg1: i32) -> (i32, i32, i32) {
    %c0_i32 = arith.constant 0 : i32
    %c0_i32_0 = arith.constant 0 : i32
    return %arg0, %arg1, %c0_i32 : i32, i32, i32
  }
}

module attributes {stable_mosaic.version = 11 : i64} {
  func.func @_gemm_stats_kernel(%arg0: i32, %arg1: i32, %arg2: memref<1x128x256xbf16, #tpu.memory_space<vmem>>, %arg3: memref<1x256x128xbf16, #tpu.memory_space<vmem>>, %arg4: memref<1x128x128xf32, #tpu.memory_space<vmem>>, %arg5: memref<1x1x128xf32, #tpu.memory_space<vmem>>, %arg6: memref<1x1x128xf32, #tpu.memory_space<vmem>>) attributes {dimension_semantics = [#tpu.dimension_semantics<parallel>, #tpu.dimension_semantics<arbitrary>], iteration_bounds = array<i64: 4, 1>, scalar_prefetch = 0 : i64, scratch_operands = 0 : i64, tpu.core_type = #tpu.core_type<tc>, window_params = [{transform_indices = @transform_0, window_bounds = array<i64: 1, 128, 256>}, {transform_indices = @transform_1, window_bounds = array<i64: 1, 256, 128>}, {transform_indices = @transform_2, window_bounds = array<i64: 1, 128, 128>}, {transform_indices = @transform_3, window_bounds = array<i64: 1, 1, 128>}, {transform_indices = @transform_4, window_bounds = array<i64: 1, 1, 128>}]} {
    %c0_i32 = arith.constant 0 : i32
    %0 = arith.cmpi eq, %arg1, %c0_i32 : i32
    %1 = arith.extui %0 : i1 to i32
    %c0_i32_0 = arith.constant 0 : i32
    %2 = arith.cmpi ne, %1, %c0_i32_0 : i32
    scf.if %2 {
      %cst_23 = arith.constant 0.000000e+00 : f32
      %28 = vector.broadcast %cst_23 : f32 to vector<1x1x128xf32>
      %c0_24 = arith.constant 0 : index
      %c0_25 = arith.constant 0 : index
      %c0_26 = arith.constant 0 : index
      %29 = vector.load %arg5[%c0_24, %c0_25, %c0_26] : memref<1x1x128xf32, #tpu.memory_space<vmem>>, vector<1x1x128xf32>
      tpu.vector_store %arg5[%c0_24, %c0_25, %c0_26], %28 {strides = array<i32>} : memref<1x1x128xf32, #tpu.memory_space<vmem>>, vector<1x1x128xf32>,
      %cst_27 = arith.constant 0.000000e+00 : f32
      %30 = vector.broadcast %cst_27 : f32 to vector<1x1x128xf32>
      %c0_28 = arith.constant 0 : index
      %c0_29 = arith.constant 0 : index
      %c0_30 = arith.constant 0 : index
      %31 = vector.load %arg6[%c0_28, %c0_29, %c0_30] : memref<1x1x128xf32, #tpu.memory_space<vmem>>, vector<1x1x128xf32>
      tpu.vector_store %arg6[%c0_28, %c0_29, %c0_30], %30 {strides = array<i32>} : memref<1x1x128xf32, #tpu.memory_space<vmem>>, vector<1x1x128xf32>,
    } else {
    }
    %c0 = arith.constant 0 : index
    %c0_1 = arith.constant 0 : index
    %c0_2 = arith.constant 0 : index
    %3 = vector.load %arg2[%c0, %c0_1, %c0_2] : memref<1x128x256xbf16, #tpu.memory_space<vmem>>, vector<1x128x256xbf16>
    %4 = vector.shape_cast %3 : vector<1x128x256xbf16> to vector<128x256xbf16>
    %c0_3 = arith.constant 0 : index
    %c0_4 = arith.constant 0 : index
    %c0_5 = arith.constant 0 : index
    %5 = vector.load %arg3[%c0_3, %c0_4, %c0_5] : memref<1x256x128xbf16, #tpu.memory_space<vmem>>, vector<1x256x128xbf16>
    %6 = vector.shape_cast %5 : vector<1x256x128xbf16> to vector<256x128xbf16>
    %cst = arith.constant dense<0.000000e+00> : vector<128x128xf32>
    %7 = tpu.matmul %4, %6, %cst {dimension_numbers = #tpu.dot_dimension_numbers<[1], [0], [0], [1], [0, 0, 1, 1], [], []>} : vector<128x256xbf16>, vector<256x128xbf16>, vector<128x128xf32> -> vector<128x128xf32>
    %c0_6 = arith.constant 0 : index
    %c0_7 = arith.constant 0 : index
    %c0_8 = arith.constant 0 : index
    %8 = vector.load %arg5[%c0_6, %c0_7, %c0_8] : memref<1x1x128xf32, #tpu.memory_space<vmem>>, vector<1x1x128xf32>
    %9 = vector.shape_cast %8 : vector<1x1x128xf32> to vector<1x128xf32>
    %cst_9 = arith.constant dense<0.000000e+00> : vector<128xf32>
    %10 = vector.multi_reduction <add>, %7, %cst_9 [0] : vector<128x128xf32> to vector<128xf32>
    %11 = vector.shape_cast %10 : vector<128xf32> to vector<1x128xf32>
    %12 = arith.addf %9, %11 : vector<1x128xf32>
    %c0_10 = arith.constant 0 : index
    %c0_11 = arith.constant 0 : index
    %c0_12 = arith.constant 0 : index
    %13 = vector.load %arg5[%c0_10, %c0_11, %c0_12] : memref<1x1x128xf32, #tpu.memory_space<vmem>>, vector<1x1x128xf32>
    %14 = vector.shape_cast %13 : vector<1x1x128xf32> to vector<1x128xf32>
    %15 = vector.shape_cast %12 : vector<1x128xf32> to vector<1x1x128xf32>
    tpu.vector_store %arg5[%c0_10, %c0_11, %c0_12], %15 {strides = array<i32>} : memref<1x1x128xf32, #tpu.memory_space<vmem>>, vector<1x1x128xf32>,
    %c0_13 = arith.constant 0 : index
    %c0_14 = arith.constant 0 : index
    %c0_15 = arith.constant 0 : index
    %16 = vector.load %arg6[%c0_13, %c0_14, %c0_15] : memref<1x1x128xf32, #tpu.memory_space<vmem>>, vector<1x1x128xf32>
    %17 = vector.shape_cast %16 : vector<1x1x128xf32> to vector<1x128xf32>
    %18 = arith.mulf %7, %7 : vector<128x128xf32>
    %cst_16 = arith.constant dense<0.000000e+00> : vector<128xf32>
    %19 = vector.multi_reduction <add>, %18, %cst_16 [0] : vector<128x128xf32> to vector<128xf32>
    %20 = vector.shape_cast %19 : vector<128xf32> to vector<1x128xf32>
    %21 = arith.addf %17, %20 : vector<1x128xf32>
    %c0_17 = arith.constant 0 : index
    %c0_18 = arith.constant 0 : index
    %c0_19 = arith.constant 0 : index
    %22 = vector.load %arg6[%c0_17, %c0_18, %c0_19] : memref<1x1x128xf32, #tpu.memory_space<vmem>>, vector<1x1x128xf32>
    %23 = vector.shape_cast %22 : vector<1x1x128xf32> to vector<1x128xf32>
    %24 = vector.shape_cast %21 : vector<1x128xf32> to vector<1x1x128xf32>
    tpu.vector_store %arg6[%c0_17, %c0_18, %c0_19], %24 {strides = array<i32>} : memref<1x1x128xf32, #tpu.memory_space<vmem>>, vector<1x1x128xf32>,
    %c0_20 = arith.constant 0 : index
    %c0_21 = arith.constant 0 : index
    %c0_22 = arith.constant 0 : index
    %25 = vector.load %arg4[%c0_20, %c0_21, %c0_22] : memref<1x128x128xf32, #tpu.memory_space<vmem>>, vector<1x128x128xf32>
    %26 = vector.shape_cast %25 : vector<1x128x128xf32> to vector<128x128xf32>
    %27 = vector.shape_cast %7 : vector<128x128xf32> to vector<1x128x128xf32>
    tpu.vector_store %arg4[%c0_20, %c0_21, %c0_22], %27 {strides = array<i32>} : memref<1x128x128xf32, #tpu.memory_space<vmem>>, vector<1x128x128xf32>,
    return
  }
  func.func @transform_0(%arg0: i32, %arg1: i32) -> (i32, i32, i32) {
    %c0_i32 = arith.constant 0 : i32
    %c0_i32_0 = arith.constant 0 : i32
    return %arg0, %arg1, %c0_i32 : i32, i32, i32
  }
  func.func @transform_1(%arg0: i32, %arg1: i32) -> (i32, i32, i32) {
    %c0_i32 = arith.constant 0 : i32
    %c0_i32_0 = arith.constant 0 : i32
    %c0_i32_1 = arith.constant 0 : i32
    return %arg0, %c0_i32, %c0_i32_0 : i32, i32, i32
  }
  func.func @transform_2(%arg0: i32, %arg1: i32) -> (i32, i32, i32) {
    %c0_i32 = arith.constant 0 : i32
    %c0_i32_0 = arith.constant 0 : i32
    return %arg0, %arg1, %c0_i32 : i32, i32, i32
  }
  func.func @transform_3(%arg0: i32, %arg1: i32) -> (i32, i32, i32) {
    %c0_i32 = arith.constant 0 : i32
    %c0_i32_0 = arith.constant 0 : i32
    %c0_i32_1 = arith.constant 0 : i32
    return %arg0, %c0_i32, %c0_i32_0 : i32, i32, i32
  }
  func.func @transform_4(%arg0: i32, %arg1: i32) -> (i32, i32, i32) {
    %c0_i32 = arith.constant 0 : i32
    %c0_i32_0 = arith.constant 0 : i32
    %c0_i32_1 = arith.constant 0 : i32
    return %arg0, %c0_i32, %c0_i32_0 : i32, i32, i32
  }
}

module attributes {stable_mosaic.version = 11 : i64} {
  func.func @_bn_relu_kernel(%arg0: i32, %arg1: i32, %arg2: memref<1x128x128xf32, #tpu.memory_space<vmem>>, %arg3: memref<1x128xf32, #tpu.memory_space<vmem>>, %arg4: memref<1x128xf32, #tpu.memory_space<vmem>>, %arg5: memref<1x128x128xf32, #tpu.memory_space<vmem>>) attributes {dimension_semantics = [#tpu.dimension_semantics<parallel>, #tpu.dimension_semantics<parallel>], iteration_bounds = array<i64: 4, 1>, scalar_prefetch = 0 : i64, scratch_operands = 0 : i64, tpu.core_type = #tpu.core_type<tc>, window_params = [{transform_indices = @transform_0, window_bounds = array<i64: 1, 128, 128>}, {pipeline_mode = #tpu.pipeline_mode<synchronous>, transform_indices = @transform_1, window_bounds = array<i64: 1, 128>}, {pipeline_mode = #tpu.pipeline_mode<synchronous>, transform_indices = @transform_2, window_bounds = array<i64: 1, 128>}, {transform_indices = @transform_3, window_bounds = array<i64: 1, 128, 128>}]} {
    %c0 = arith.constant 0 : index
    %c0_0 = arith.constant 0 : index
    %c0_1 = arith.constant 0 : index
    %0 = vector.load %arg2[%c0, %c0_0, %c0_1] : memref<1x128x128xf32, #tpu.memory_space<vmem>>, vector<1x128x128xf32>
    %1 = vector.shape_cast %0 : vector<1x128x128xf32> to vector<128x128xf32>
    %c0_2 = arith.constant 0 : index
    %c0_3 = arith.constant 0 : index
    %2 = vector.load %arg3[%c0_2, %c0_3] : memref<1x128xf32, #tpu.memory_space<vmem>>, vector<1x128xf32>
    %3 = vector.broadcast %2 : vector<1x128xf32> to vector<128x128xf32>
    %4 = arith.mulf %1, %3 : vector<128x128xf32>
    %c0_4 = arith.constant 0 : index
    %c0_5 = arith.constant 0 : index
    %5 = vector.load %arg4[%c0_4, %c0_5] : memref<1x128xf32, #tpu.memory_space<vmem>>, vector<1x128xf32>
    %6 = vector.broadcast %5 : vector<1x128xf32> to vector<128x128xf32>
    %7 = arith.addf %4, %6 : vector<128x128xf32>
    %cst = arith.constant 0.000000e+00 : f32
    %8 = vector.broadcast %cst : f32 to vector<128x128xf32>
    %9 = arith.maximumf %7, %8 : vector<128x128xf32>
    %c0_6 = arith.constant 0 : index
    %c0_7 = arith.constant 0 : index
    %c0_8 = arith.constant 0 : index
    %10 = vector.load %arg5[%c0_6, %c0_7, %c0_8] : memref<1x128x128xf32, #tpu.memory_space<vmem>>, vector<1x128x128xf32>
    %11 = vector.shape_cast %10 : vector<1x128x128xf32> to vector<128x128xf32>
    %12 = vector.shape_cast %9 : vector<128x128xf32> to vector<1x128x128xf32>
    tpu.vector_store %arg5[%c0_6, %c0_7, %c0_8], %12 {strides = array<i32>} : memref<1x128x128xf32, #tpu.memory_space<vmem>>, vector<1x128x128xf32>,
    return
  }
  func.func @transform_0(%arg0: i32, %arg1: i32) -> (i32, i32, i32) {
    %c0_i32 = arith.constant 0 : i32
    %c0_i32_0 = arith.constant 0 : i32
    return %arg0, %arg1, %c0_i32 : i32, i32, i32
  }
  func.func @transform_1(%arg0: i32, %arg1: i32) -> (i32, i32) {
    %c0_i32 = arith.constant 0 : i32
    %c0_i32_0 = arith.constant 0 : i32
    %c0_i32_1 = arith.constant 0 : i32
    return %c0_i32, %c0_i32_0 : i32, i32
  }
  func.func @transform_2(%arg0: i32, %arg1: i32) -> (i32, i32) {
    %c0_i32 = arith.constant 0 : i32
    %c0_i32_0 = arith.constant 0 : i32
    %c0_i32_1 = arith.constant 0 : i32
    return %c0_i32, %c0_i32_0 : i32, i32
  }
  func.func @transform_3(%arg0: i32, %arg1: i32) -> (i32, i32, i32) {
    %c0_i32 = arith.constant 0 : i32
    %c0_i32_0 = arith.constant 0 : i32
    return %arg0, %arg1, %c0_i32 : i32, i32, i32
  }
}

module attributes {stable_mosaic.version = 11 : i64} {
  func.func @_gemm_stats_kernel(%arg0: i32, %arg1: i32, %arg2: memref<1x512x128xbf16, #tpu.memory_space<vmem>>, %arg3: memref<1x128x128xbf16, #tpu.memory_space<vmem>>, %arg4: memref<1x512x128xf32, #tpu.memory_space<vmem>>, %arg5: memref<1x1x128xf32, #tpu.memory_space<vmem>>, %arg6: memref<1x1x128xf32, #tpu.memory_space<vmem>>) attributes {dimension_semantics = [#tpu.dimension_semantics<parallel>, #tpu.dimension_semantics<arbitrary>], iteration_bounds = array<i64: 4, 1>, scalar_prefetch = 0 : i64, scratch_operands = 0 : i64, tpu.core_type = #tpu.core_type<tc>, window_params = [{transform_indices = @transform_0, window_bounds = array<i64: 1, 512, 128>}, {transform_indices = @transform_1, window_bounds = array<i64: 1, 128, 128>}, {transform_indices = @transform_2, window_bounds = array<i64: 1, 512, 128>}, {transform_indices = @transform_3, window_bounds = array<i64: 1, 1, 128>}, {transform_indices = @transform_4, window_bounds = array<i64: 1, 1, 128>}]} {
    %c0_i32 = arith.constant 0 : i32
    %0 = arith.cmpi eq, %arg1, %c0_i32 : i32
    %1 = arith.extui %0 : i1 to i32
    %c0_i32_0 = arith.constant 0 : i32
    %2 = arith.cmpi ne, %1, %c0_i32_0 : i32
    scf.if %2 {
      %cst_23 = arith.constant 0.000000e+00 : f32
      %28 = vector.broadcast %cst_23 : f32 to vector<1x1x128xf32>
      %c0_24 = arith.constant 0 : index
      %c0_25 = arith.constant 0 : index
      %c0_26 = arith.constant 0 : index
      %29 = vector.load %arg5[%c0_24, %c0_25, %c0_26] : memref<1x1x128xf32, #tpu.memory_space<vmem>>, vector<1x1x128xf32>
      tpu.vector_store %arg5[%c0_24, %c0_25, %c0_26], %28 {strides = array<i32>} : memref<1x1x128xf32, #tpu.memory_space<vmem>>, vector<1x1x128xf32>,
      %cst_27 = arith.constant 0.000000e+00 : f32
      %30 = vector.broadcast %cst_27 : f32 to vector<1x1x128xf32>
      %c0_28 = arith.constant 0 : index
      %c0_29 = arith.constant 0 : index
      %c0_30 = arith.constant 0 : index
      %31 = vector.load %arg6[%c0_28, %c0_29, %c0_30] : memref<1x1x128xf32, #tpu.memory_space<vmem>>, vector<1x1x128xf32>
      tpu.vector_store %arg6[%c0_28, %c0_29, %c0_30], %30 {strides = array<i32>} : memref<1x1x128xf32, #tpu.memory_space<vmem>>, vector<1x1x128xf32>,
    } else {
    }
    %c0 = arith.constant 0 : index
    %c0_1 = arith.constant 0 : index
    %c0_2 = arith.constant 0 : index
    %3 = vector.load %arg2[%c0, %c0_1, %c0_2] : memref<1x512x128xbf16, #tpu.memory_space<vmem>>, vector<1x512x128xbf16>
    %4 = vector.shape_cast %3 : vector<1x512x128xbf16> to vector<512x128xbf16>
    %c0_3 = arith.constant 0 : index
    %c0_4 = arith.constant 0 : index
    %c0_5 = arith.constant 0 : index
    %5 = vector.load %arg3[%c0_3, %c0_4, %c0_5] : memref<1x128x128xbf16, #tpu.memory_space<vmem>>, vector<1x128x128xbf16>
    %6 = vector.shape_cast %5 : vector<1x128x128xbf16> to vector<128x128xbf16>
    %cst = arith.constant dense<0.000000e+00> : vector<512x128xf32>
    %7 = tpu.matmul %4, %6, %cst {dimension_numbers = #tpu.dot_dimension_numbers<[1], [0], [0], [1], [0, 0, 1, 1], [], []>} : vector<512x128xbf16>, vector<128x128xbf16>, vector<512x128xf32> -> vector<512x128xf32>
    %c0_6 = arith.constant 0 : index
    %c0_7 = arith.constant 0 : index
    %c0_8 = arith.constant 0 : index
    %8 = vector.load %arg5[%c0_6, %c0_7, %c0_8] : memref<1x1x128xf32, #tpu.memory_space<vmem>>, vector<1x1x128xf32>
    %9 = vector.shape_cast %8 : vector<1x1x128xf32> to vector<1x128xf32>
    %cst_9 = arith.constant dense<0.000000e+00> : vector<128xf32>
    %10 = vector.multi_reduction <add>, %7, %cst_9 [0] : vector<512x128xf32> to vector<128xf32>
    %11 = vector.shape_cast %10 : vector<128xf32> to vector<1x128xf32>
    %12 = arith.addf %9, %11 : vector<1x128xf32>
    %c0_10 = arith.constant 0 : index
    %c0_11 = arith.constant 0 : index
    %c0_12 = arith.constant 0 : index
    %13 = vector.load %arg5[%c0_10, %c0_11, %c0_12] : memref<1x1x128xf32, #tpu.memory_space<vmem>>, vector<1x1x128xf32>
    %14 = vector.shape_cast %13 : vector<1x1x128xf32> to vector<1x128xf32>
    %15 = vector.shape_cast %12 : vector<1x128xf32> to vector<1x1x128xf32>
    tpu.vector_store %arg5[%c0_10, %c0_11, %c0_12], %15 {strides = array<i32>} : memref<1x1x128xf32, #tpu.memory_space<vmem>>, vector<1x1x128xf32>,
    %c0_13 = arith.constant 0 : index
    %c0_14 = arith.constant 0 : index
    %c0_15 = arith.constant 0 : index
    %16 = vector.load %arg6[%c0_13, %c0_14, %c0_15] : memref<1x1x128xf32, #tpu.memory_space<vmem>>, vector<1x1x128xf32>
    %17 = vector.shape_cast %16 : vector<1x1x128xf32> to vector<1x128xf32>
    %18 = arith.mulf %7, %7 : vector<512x128xf32>
    %cst_16 = arith.constant dense<0.000000e+00> : vector<128xf32>
    %19 = vector.multi_reduction <add>, %18, %cst_16 [0] : vector<512x128xf32> to vector<128xf32>
    %20 = vector.shape_cast %19 : vector<128xf32> to vector<1x128xf32>
    %21 = arith.addf %17, %20 : vector<1x128xf32>
    %c0_17 = arith.constant 0 : index
    %c0_18 = arith.constant 0 : index
    %c0_19 = arith.constant 0 : index
    %22 = vector.load %arg6[%c0_17, %c0_18, %c0_19] : memref<1x1x128xf32, #tpu.memory_space<vmem>>, vector<1x1x128xf32>
    %23 = vector.shape_cast %22 : vector<1x1x128xf32> to vector<1x128xf32>
    %24 = vector.shape_cast %21 : vector<1x128xf32> to vector<1x1x128xf32>
    tpu.vector_store %arg6[%c0_17, %c0_18, %c0_19], %24 {strides = array<i32>} : memref<1x1x128xf32, #tpu.memory_space<vmem>>, vector<1x1x128xf32>,
    %c0_20 = arith.constant 0 : index
    %c0_21 = arith.constant 0 : index
    %c0_22 = arith.constant 0 : index
    %25 = vector.load %arg4[%c0_20, %c0_21, %c0_22] : memref<1x512x128xf32, #tpu.memory_space<vmem>>, vector<1x512x128xf32>
    %26 = vector.shape_cast %25 : vector<1x512x128xf32> to vector<512x128xf32>
    %27 = vector.shape_cast %7 : vector<512x128xf32> to vector<1x512x128xf32>
    tpu.vector_store %arg4[%c0_20, %c0_21, %c0_22], %27 {strides = array<i32>} : memref<1x512x128xf32, #tpu.memory_space<vmem>>, vector<1x512x128xf32>,
    return
  }
  func.func @transform_0(%arg0: i32, %arg1: i32) -> (i32, i32, i32) {
    %c0_i32 = arith.constant 0 : i32
    %c0_i32_0 = arith.constant 0 : i32
    return %arg0, %arg1, %c0_i32 : i32, i32, i32
  }
  func.func @transform_1(%arg0: i32, %arg1: i32) -> (i32, i32, i32) {
    %c0_i32 = arith.constant 0 : i32
    %c0_i32_0 = arith.constant 0 : i32
    %c0_i32_1 = arith.constant 0 : i32
    return %arg0, %c0_i32, %c0_i32_0 : i32, i32, i32
  }
  func.func @transform_2(%arg0: i32, %arg1: i32) -> (i32, i32, i32) {
    %c0_i32 = arith.constant 0 : i32
    %c0_i32_0 = arith.constant 0 : i32
    return %arg0, %arg1, %c0_i32 : i32, i32, i32
  }
  func.func @transform_3(%arg0: i32, %arg1: i32) -> (i32, i32, i32) {
    %c0_i32 = arith.constant 0 : i32
    %c0_i32_0 = arith.constant 0 : i32
    %c0_i32_1 = arith.constant 0 : i32
    return %arg0, %c0_i32, %c0_i32_0 : i32, i32, i32
  }
  func.func @transform_4(%arg0: i32, %arg1: i32) -> (i32, i32, i32) {
    %c0_i32 = arith.constant 0 : i32
    %c0_i32_0 = arith.constant 0 : i32
    %c0_i32_1 = arith.constant 0 : i32
    return %arg0, %c0_i32, %c0_i32_0 : i32, i32, i32
  }
}

module attributes {stable_mosaic.version = 11 : i64} {
  func.func @_bn_relu_kernel(%arg0: i32, %arg1: i32, %arg2: memref<1x512x128xf32, #tpu.memory_space<vmem>>, %arg3: memref<1x128xf32, #tpu.memory_space<vmem>>, %arg4: memref<1x128xf32, #tpu.memory_space<vmem>>, %arg5: memref<1x512x128xf32, #tpu.memory_space<vmem>>) attributes {dimension_semantics = [#tpu.dimension_semantics<parallel>, #tpu.dimension_semantics<parallel>], iteration_bounds = array<i64: 4, 1>, scalar_prefetch = 0 : i64, scratch_operands = 0 : i64, tpu.core_type = #tpu.core_type<tc>, window_params = [{transform_indices = @transform_0, window_bounds = array<i64: 1, 512, 128>}, {pipeline_mode = #tpu.pipeline_mode<synchronous>, transform_indices = @transform_1, window_bounds = array<i64: 1, 128>}, {pipeline_mode = #tpu.pipeline_mode<synchronous>, transform_indices = @transform_2, window_bounds = array<i64: 1, 128>}, {transform_indices = @transform_3, window_bounds = array<i64: 1, 512, 128>}]} {
    %c0 = arith.constant 0 : index
    %c0_0 = arith.constant 0 : index
    %c0_1 = arith.constant 0 : index
    %0 = vector.load %arg2[%c0, %c0_0, %c0_1] : memref<1x512x128xf32, #tpu.memory_space<vmem>>, vector<1x512x128xf32>
    %1 = vector.shape_cast %0 : vector<1x512x128xf32> to vector<512x128xf32>
    %c0_2 = arith.constant 0 : index
    %c0_3 = arith.constant 0 : index
    %2 = vector.load %arg3[%c0_2, %c0_3] : memref<1x128xf32, #tpu.memory_space<vmem>>, vector<1x128xf32>
    %3 = vector.broadcast %2 : vector<1x128xf32> to vector<512x128xf32>
    %4 = arith.mulf %1, %3 : vector<512x128xf32>
    %c0_4 = arith.constant 0 : index
    %c0_5 = arith.constant 0 : index
    %5 = vector.load %arg4[%c0_4, %c0_5] : memref<1x128xf32, #tpu.memory_space<vmem>>, vector<1x128xf32>
    %6 = vector.broadcast %5 : vector<1x128xf32> to vector<512x128xf32>
    %7 = arith.addf %4, %6 : vector<512x128xf32>
    %cst = arith.constant 0.000000e+00 : f32
    %8 = vector.broadcast %cst : f32 to vector<512x128xf32>
    %9 = arith.maximumf %7, %8 : vector<512x128xf32>
    %c0_6 = arith.constant 0 : index
    %c0_7 = arith.constant 0 : index
    %c0_8 = arith.constant 0 : index
    %10 = vector.load %arg5[%c0_6, %c0_7, %c0_8] : memref<1x512x128xf32, #tpu.memory_space<vmem>>, vector<1x512x128xf32>
    %11 = vector.shape_cast %10 : vector<1x512x128xf32> to vector<512x128xf32>
    %12 = vector.shape_cast %9 : vector<512x128xf32> to vector<1x512x128xf32>
    tpu.vector_store %arg5[%c0_6, %c0_7, %c0_8], %12 {strides = array<i32>} : memref<1x512x128xf32, #tpu.memory_space<vmem>>, vector<1x512x128xf32>,
    return
  }
  func.func @transform_0(%arg0: i32, %arg1: i32) -> (i32, i32, i32) {
    %c0_i32 = arith.constant 0 : i32
    %c0_i32_0 = arith.constant 0 : i32
    return %arg0, %arg1, %c0_i32 : i32, i32, i32
  }
  func.func @transform_1(%arg0: i32, %arg1: i32) -> (i32, i32) {
    %c0_i32 = arith.constant 0 : i32
    %c0_i32_0 = arith.constant 0 : i32
    %c0_i32_1 = arith.constant 0 : i32
    return %c0_i32, %c0_i32_0 : i32, i32
  }
  func.func @transform_2(%arg0: i32, %arg1: i32) -> (i32, i32) {
    %c0_i32 = arith.constant 0 : i32
    %c0_i32_0 = arith.constant 0 : i32
    %c0_i32_1 = arith.constant 0 : i32
    return %c0_i32, %c0_i32_0 : i32, i32
  }
  func.func @transform_3(%arg0: i32, %arg1: i32) -> (i32, i32, i32) {
    %c0_i32 = arith.constant 0 : i32
    %c0_i32_0 = arith.constant 0 : i32
    return %arg0, %arg1, %c0_i32 : i32, i32, i32
  }
}

module attributes {stable_mosaic.version = 11 : i64} {
  func.func @_gemm_tanh_kernel(%arg0: i32, %arg1: i32, %arg2: memref<1x512x128xbf16, #tpu.memory_space<vmem>>, %arg3: memref<1x128x128xbf16, #tpu.memory_space<vmem>>, %arg4: memref<1x512x128xf32, #tpu.memory_space<vmem>>) attributes {dimension_semantics = [#tpu.dimension_semantics<parallel>, #tpu.dimension_semantics<parallel>], iteration_bounds = array<i64: 4, 4>, scalar_prefetch = 0 : i64, scratch_operands = 0 : i64, tpu.core_type = #tpu.core_type<tc>, window_params = [{transform_indices = @transform_0, window_bounds = array<i64: 1, 512, 128>}, {transform_indices = @transform_1, window_bounds = array<i64: 1, 128, 128>}, {transform_indices = @transform_2, window_bounds = array<i64: 1, 512, 128>}]} {
    %c0 = arith.constant 0 : index
    %c0_0 = arith.constant 0 : index
    %c0_1 = arith.constant 0 : index
    %0 = vector.load %arg2[%c0, %c0_0, %c0_1] : memref<1x512x128xbf16, #tpu.memory_space<vmem>>, vector<1x512x128xbf16>
    %1 = vector.shape_cast %0 : vector<1x512x128xbf16> to vector<512x128xbf16>
    %c0_2 = arith.constant 0 : index
    %c0_3 = arith.constant 0 : index
    %c0_4 = arith.constant 0 : index
    %2 = vector.load %arg3[%c0_2, %c0_3, %c0_4] : memref<1x128x128xbf16, #tpu.memory_space<vmem>>, vector<1x128x128xbf16>
    %3 = vector.shape_cast %2 : vector<1x128x128xbf16> to vector<128x128xbf16>
    %cst = arith.constant dense<0.000000e+00> : vector<512x128xf32>
    %4 = tpu.matmul %1, %3, %cst {dimension_numbers = #tpu.dot_dimension_numbers<[1], [0], [0], [1], [0, 0, 1, 1], [], []>} : vector<512x128xbf16>, vector<128x128xbf16>, vector<512x128xf32> -> vector<512x128xf32>
    %5 = math.tanh %4 : vector<512x128xf32>
    %c0_5 = arith.constant 0 : index
    %c0_6 = arith.constant 0 : index
    %c0_7 = arith.constant 0 : index
    %6 = vector.load %arg4[%c0_5, %c0_6, %c0_7] : memref<1x512x128xf32, #tpu.memory_space<vmem>>, vector<1x512x128xf32>
    %7 = vector.shape_cast %6 : vector<1x512x128xf32> to vector<512x128xf32>
    %8 = vector.shape_cast %5 : vector<512x128xf32> to vector<1x512x128xf32>
    tpu.vector_store %arg4[%c0_5, %c0_6, %c0_7], %8 {strides = array<i32>} : memref<1x512x128xf32, #tpu.memory_space<vmem>>, vector<1x512x128xf32>,
    return
  }
  func.func @transform_0(%arg0: i32, %arg1: i32) -> (i32, i32, i32) {
    %c0_i32 = arith.constant 0 : i32
    %c0_i32_0 = arith.constant 0 : i32
    return %arg0, %arg1, %c0_i32 : i32, i32, i32
  }
  func.func @transform_1(%arg0: i32, %arg1: i32) -> (i32, i32, i32) {
    %c0_i32 = arith.constant 0 : i32
    %c0_i32_0 = arith.constant 0 : i32
    %c0_i32_1 = arith.constant 0 : i32
    return %arg0, %c0_i32, %c0_i32_0 : i32, i32, i32
  }
  func.func @transform_2(%arg0: i32, %arg1: i32) -> (i32, i32, i32) {
    %c0_i32 = arith.constant 0 : i32
    %c0_i32_0 = arith.constant 0 : i32
    return %arg0, %arg1, %c0_i32 : i32, i32, i32
  }
}

</mosaic_0001>

<bundles_post_ra>
// kernel: generator_forward.9
= control target key start
LH: loop header
LB: loop body
LE: loop exit
PB: predicated region body
PF: predicated region fallthrough
CT: control target
= control target key end

     0   :  { %s628_s15 = smov 0   ;;  %s630_s16 = smov 0   ;;  %s687_s0 = inlined_call_operand.vmem [shape: bf16[16,8,128], index: 0, kind: input, shape index: {}]   ;;  %s688_s1 = inlined_call_operand.vmem [shape: bf16[16,128,128], index: 1, kind: input, shape index: {}]   ;;  %s689_s2 = inlined_call_operand.vmem [shape: f32[16,8,128], index: 2, kind: output, shape index: {0}]   ;;  %s690_s3 = inlined_call_operand.vmem [shape: f32[16,1,128], index: 3, kind: output, shape index: {1}]   ;;  %s691_s4 = inlined_call_operand.vmem [shape: f32[16,1,128], index: 4, kind: output, shape index: {2}]  }
   0x1   :  { %s632_s17 = smov 0  }
   0x2 LB: > { %s27_s18 = sadd.s32 1, %s596_s16  ;;  %p505_p0 = scmp.ge.s32.totalorder %s600_s17, 1  ;;  %s600_s17 = sphi %s632_s17, %s15_s17   ;;  %s596_s16 = sphi %s630_s16, %s693_s16   ;;  %s592_s15 = sphi %s628_s15, %s692_s15  }
   0x3   : > { %p29_p1 = scmp.ge.s32.totalorder %s27_s18, 16  ;;  %p195_p2 = scmp.lt.s32.totalorder %s600_s17, 17 }
   0x5   : > { %s695_s18 = smov (%p29_p1, %s27_s18), 0  ;;  %p196_p3 = pnand %p505_p0, %p195_p2 }
   0x6   : > { %p236_p4 = scmp.lt.s32.totalorder (!%p196_p3), %s592_s15, 15 }
   0x7   : > { %199 = sbr.rel (%p196_p3) target bundleno = 190 (0xbe), region = 28 }
   0xc   : > { %s697_s15 = smov (!%p236_p4, %s592_s15), 15  ;;  %v602_v2 = vmov 0.0  }
   0xd   : > { %s544_s19 = sshll.u32 %s697_s15, 6  ;;  %s656_s25 = scalar_lea.vmem %s690_s3, %s697_s15 }
   0xe   : > { %s247_s22 = scalar_lea.vmem %s688_s1, %s544_s19  ;;  %s662_s28 = scalar_lea.vmem %s691_s4, %s697_s15  ;;  %265 = vst [vmem:[%s656_s25] sm:$0x1] %v602_v2 }
   0xf   : > { %v552_v0 = vld [vmem:[%s247_s22 + $0x38] sm:$0xff]  ;;  %v551_v1 = vld [vmem:[%s247_s22 + $0x30] sm:$0xff]  ;;  %266 = vst [vmem:[%s662_s28] sm:$0x1] %v602_v2  ;;  %v550_v3 = vld [vmem:[%s247_s22 + $0x28] sm:$0xff]  ;;  %s506_s29 = sshll.u32 %s697_s15, 2  ;;  %s509_s7 = sshll.u32 %s697_s15, 3 }
  0x10   : > { %332 = vmatpush.bf16.msra.mxu0 %v552_v0  ;;  %v549_v4 = vld [vmem:[%s247_s22 + $0x20] sm:$0xff]  ;;  %v548_v5 = vld [vmem:[%s247_s22 + $0x18] sm:$0xff]  ;;  %v547_v6 = vld [vmem:[%s247_s22 + $0x10] sm:$0xff]  ;;  %s242_s6 = scalar_lea.vmem %s687_s0, %s506_s29  ;;  %s254_s10 = scalar_lea.vmem %s689_s2, %s509_s7 }
  0x11   : > { %v546_v7 = vld [vmem:[%s247_s22 + $0x8] sm:$0xff]  ;;  %v545_v8 = vld [vmem:[%s247_s22] sm:$0xff] }
  0x12   : > { %v267_v9 = vld [vmem:[%s242_s6] sm:$0xf] }
  0x14   : > { %333 = vmatpush.bf16.msra.mxu0 %v551_v1 }
  0x15   : > { %v345_v22 = vld [vmem:[%s656_s25] sm:$0x1] }
  0x16   : > { %v354_v25 = vld [vmem:[%s662_s28] sm:$0x1] }
  0x18   : > { %334 = vmatpush.bf16.msra.mxu0 %v550_v3 }
  0x1c   : > { %335 = vmatpush.bf16.msra.mxu0 %v549_v4 }
  0x20   : > { %336 = vmatpush.bf16.msra.mxu0 %v548_v5 }
  0x24   : > { %337 = vmatpush.bf16.msra.mxu0 %v547_v6 }
  0x28   : > { %338 = vmatpush.bf16.msra.mxu0 %v546_v7 }
  0x2c   : > { %339 = vmatpush.bf16.msra.mxu0 %v545_v8 }
  0x2f   : > { %340 = vmatmul.bf16.vlgmr.msra.gmra.mxu0 %v267_v9 }
  0xac   : > { %v341_v10 = vpop.f32.mrf.mxu0 }
  0xad   : > { %v346_v11 = vrot.slane %v341_v10, 4  ;;  %v355_v12 = vmul.f32 %v341_v10, %v341_v10  ;;  %364 = vst [vmem:[%s254_s10] sm:$0xff] %v341_v10 }
  0xaf   : > { %v347_v13 = vadd.f32 %v346_v11, %v341_v10  ;;  %v356_v14 = vrot.slane %v355_v12, 4 }
  0xb1   : > { %v348_v15 = vrot.slane %v347_v13, 2  ;;  %v357_v16 = vadd.f32 %v356_v14, %v355_v12 }
  0xb3   : > { %v349_v17 = vadd.f32 %v348_v15, %v347_v13  ;;  %v358_v18 = vrot.slane %v357_v16, 2 }
  0xb4   : > { %v343_v19 = vpop.f32.mrf.mxu0 }
  0xb5   : > { %v350_v20 = vrot.slane %v349_v17, 1  ;;  %v359_v21 = vadd.f32 %v358_v18, %v357_v16 }
  0xb7   : > { %v351_v23 = vadd.f32 %v350_v20, %v349_v17  ;;  %v360_v24 = vrot.slane %v359_v21, 1 }
  0xb9   : > { %v352_v26 = vadd.f32 %v351_v23, %v345_v22  ;;  %v361_v27 = vadd.f32 %v360_v24, %v359_v21 }
  0xbb   : > { %353 = vst [vmem:[%s656_s25] sm:$0x1] %v352_v26  ;;  %v362_v28 = vadd.f32 %v361_v27, %v354_v25 }
  0xbd   : > { %363 = vst [vmem:[%s662_s28] sm:$0x1] %v362_v28 }
  0xbe PF: > { %s15_s17 = sadd.s32 1, %s600_s17   ;;  %s692_s15 = smov %s596_s16 }
  0xbf   : > { %p12_p5 = scmp.ge.s32.totalorder %s15_s17, 18   ;;  %s693_s16 = smov %s695_s18 }
  0xc1   :  { %14 = sbr.rel (!%p12_p5) target bundleno = 2 (0x2), region = 89 }

// kernel: generator_forward.10
= control target key start
LH: loop header
LB: loop body
LE: loop exit
PB: predicated region body
PF: predicated region fallthrough
CT: control target
= control target key end

     0   :  { %s363_s12 = smov 0   ;;  %s365_s13 = smov 0   ;;  %s390_s0 = inlined_call_operand.vmem [shape: f32[16,8,128], index: 0, kind: input, shape index: {}]   ;;  %s391_s1 = inlined_call_operand.vmem [shape: f32[1,128], index: 1, kind: input, shape index: {}]   ;;  %s392_s2 = inlined_call_operand.vmem [shape: f32[1,128], index: 2, kind: input, shape index: {}]   ;;  %s393_s3 = inlined_call_operand.vmem [shape: f32[16,8,128], index: 3, kind: output, shape index: {}]  }
   0x1   :  { %s367_s14 = smov 0  }
   0x2 LB: > { %s25_s15 = sadd.s32 1, %s337_s13  ;;  %p288_p0 = scmp.ge.s32.totalorder %s341_s14, 1  ;;  %s341_s14 = sphi %s367_s14, %s13_s14   ;;  %s337_s13 = sphi %s365_s13, %s395_s13   ;;  %s333_s12 = sphi %s363_s12, %s394_s12  }
   0x3   : > { %p27_p1 = scmp.ge.s32.totalorder %s25_s15, 16  ;;  %p155_p2 = scmp.lt.s32.totalorder %s341_s14, 17 }
   0x5   : > { %s397_s15 = smov (%p27_p1, %s25_s15), 0  ;;  %p156_p3 = pnand %p288_p0, %p155_p2 }
   0x6   : > { %p183_p4 = scmp.lt.s32.totalorder (!%p156_p3), %s333_s12, 15 }
   0x7   : > { %159 = sbr.rel (%p156_p3) target bundleno = 23 (0x17), region = 32 }
   0xc   : > { %s399_s12 = smov (!%p183_p4, %s333_s12), 15  ;;  %v317_v0 = vld [vmem:[%s391_s1] ss:$0 sm:$0xff] }
   0xd   : > { %s289_s18 = sshll.u32 %s399_s12, 3  ;;  %v318_v1 = vld [vmem:[%s392_s2] ss:$0 sm:$0xff] }
   0xe   : > { %s189_s21 = scalar_lea.vmem %s390_s0, %s289_s18  ;;  %s196_s26 = scalar_lea.vmem %s393_s3, %s289_s18 }
   0xf   : > { %v197_v2 = vld [vmem:[%s189_s21] sm:$0xff] }
  0x10   : > { %v202_v3 = vmul.f32 %v317_v0, %v197_v2 }
  0x12   : > { %v207_v4 = vadd.f32 %v318_v1, %v202_v3 }
  0x14   : > { %v208_v5 = vmax.f32 %v207_v4, 0.0 }
  0x16   : > { %209 = vst [vmem:[%s196_s26] sm:$0xff] %v208_v5 }
  0x17 PF: > { %s13_s14 = sadd.s32 1, %s341_s14   ;;  %s394_s12 = smov %s337_s13 }
  0x18   : > { %p10_p5 = scmp.ge.s32.totalorder %s13_s14, 18   ;;  %s395_s13 = smov %s397_s15 }
  0x1a   :  { %12 = sbr.rel (!%p10_p5) target bundleno = 2 (0x2), region = 62 }

// kernel: generator_forward.12
= control target key start
LH: loop header
LB: loop body
LE: loop exit
PB: predicated region body
PF: predicated region fallthrough
CT: control target
= control target key end

     0   :  { %s408_s12 = smov 0   ;;  %s410_s13 = smov 0   ;;  %s447_s0 = inlined_call_operand.vmem [shape: f32[4,32,128], index: 0, kind: input, shape index: {}]   ;;  %s448_s1 = inlined_call_operand.vmem [shape: f32[1,128], index: 1, kind: input, shape index: {}]   ;;  %s449_s2 = inlined_call_operand.vmem [shape: f32[1,128], index: 2, kind: input, shape index: {}]   ;;  %s450_s3 = inlined_call_operand.vmem [shape: f32[4,32,128], index: 3, kind: output, shape index: {}]  }
   0x1   :  { %s412_s14 = smov 0  }
   0x2 LB: > { %s25_s15 = sadd.s32 1, %s382_s13  ;;  %p329_p0 = scmp.ge.s32.totalorder %s386_s14, 1  ;;  %s386_s14 = sphi %s412_s14, %s13_s14   ;;  %s382_s13 = sphi %s410_s13, %s452_s13   ;;  %s378_s12 = sphi %s408_s12, %s451_s12  }
   0x3   : > { %p27_p1 = scmp.ge.s32.totalorder %s25_s15, 4  ;;  %p158_p2 = scmp.lt.s32.totalorder %s386_s14, 5 }
   0x5   : > { %s454_s15 = smov (%p27_p1, %s25_s15), 0  ;;  %p159_p3 = pnand %p329_p0, %p158_p2 }
   0x6   : > { %p191_p4 = scmp.lt.s32.totalorder (!%p159_p3), %s378_s12, 3 }
   0x7   : > { %162 = sbr.rel (%p159_p3) target bundleno = 26 (0x1a), region = 32 }
   0xc   : > { %s456_s12 = smov (!%p191_p4, %s378_s12), 3  ;;  %v362_v0 = vld [vmem:[%s448_s1] ss:$0 sm:$0xff] }
   0xd   : > { %s336_s18 = sshll.u32 %s456_s12, 5  ;;  %v363_v1 = vld [vmem:[%s449_s2] ss:$0 sm:$0xff] }
   0xe   : > { %s198_s21 = scalar_lea.vmem %s447_s0, %s336_s18  ;;  %s208_s26 = scalar_lea.vmem %s450_s3, %s336_s18 }
   0xf   : > { %v210_v2 = vld [vmem:[%s198_s21] sm:$0xff]  ;;  %v211_v3 = vld [vmem:[%s198_s21 + $0x8] sm:$0xff]  ;;  %v212_v4 = vld [vmem:[%s198_s21 + $0x10] sm:$0xff] }
  0x10   : > { %v218_v5 = vmul.f32 %v362_v0, %v210_v2  ;;  %v219_v6 = vmul.f32 %v362_v0, %v211_v3  ;;  %v220_v7 = vmul.f32 %v362_v0, %v212_v4  ;;  %v213_v8 = vld [vmem:[%s198_s21 + $0x18] sm:$0xff] }
  0x11   : > { %v221_v9 = vmul.f32 %v362_v0, %v213_v8 }
  0x12   : > { %v226_v10 = vadd.f32 %v363_v1, %v218_v5  ;;  %v227_v11 = vadd.f32 %v363_v1, %v219_v6  ;;  %v228_v12 = vadd.f32 %v363_v1, %v220_v7 }
  0x13   : > { %v229_v13 = vadd.f32 %v363_v1, %v221_v9 }
  0x14   : > { %v230_v14 = vmax.f32 %v226_v10, 0.0  ;;  %v231_v15 = vmax.f32 %v227_v11, 0.0  ;;  %v232_v16 = vmax.f32 %v228_v12, 0.0 }
  0x15   : > { %v233_v17 = vmax.f32 %v229_v13, 0.0 }
  0x16   : > { %234 = vst [vmem:[%s208_s26] sm:$0xff] %v230_v14 }
  0x17   : > { %235 = vst [vmem:[%s208_s26 + $0x8] sm:$0xff] %v231_v15 }
  0x18   : > { %236 = vst [vmem:[%s208_s26 + $0x10] sm:$0xff] %v232_v16 }
  0x19   : > { %237 = vst [vmem:[%s208_s26 + $0x18] sm:$0xff] %v233_v17 }
  0x1a PF: > { %s13_s14 = sadd.s32 1, %s386_s14   ;;  %s451_s12 = smov %s382_s13 }
  0x1b   : > { %p10_p5 = scmp.ge.s32.totalorder %s13_s14, 6   ;;  %s452_s13 = smov %s454_s15 }
  0x1d   :  { %12 = sbr.rel (!%p10_p5) target bundleno = 2 (0x2), region = 62 }

// kernel: generator_forward.11
= control target key start
LH: loop header
LB: loop body
LE: loop exit
PB: predicated region body
PF: predicated region fallthrough
CT: control target
= control target key end

     0   :  { %s1138_s15 = smov 0   ;;  %s1140_s16 = smov 0   ;;  %s1255_s0 = inlined_call_operand.vmem [shape: bf16[4,32,512], index: 0, kind: input, shape index: {}]   ;;  %s1256_s1 = inlined_call_operand.vmem [shape: bf16[4,512,128], index: 1, kind: input, shape index: {}]   ;;  %s1257_s2 = inlined_call_operand.vmem [shape: f32[4,32,128], index: 2, kind: output, shape index: {0}]   ;;  %s1258_s3 = inlined_call_operand.vmem [shape: f32[4,1,128], index: 3, kind: output, shape index: {1}]   ;;  %s1259_s4 = inlined_call_operand.vmem [shape: f32[4,1,128], index: 4, kind: output, shape index: {2}]  }
   0x1   :  { %s1142_s17 = smov 0  }
   0x2 LB: > { %s27_s18 = sadd.s32 1, %s1106_s16  ;;  %p851_p0 = scmp.ge.s32.totalorder %s1110_s17, 1  ;;  %s1110_s17 = sphi %s1142_s17, %s15_s17   ;;  %s1106_s16 = sphi %s1140_s16, %s1261_s16   ;;  %s1102_s15 = sphi %s1138_s15, %s1260_s15  }
   0x3   : > { %p29_p1 = scmp.ge.s32.totalorder %s27_s18, 4  ;;  %p199_p2 = scmp.lt.s32.totalorder %s1110_s17, 5 }
   0x5   : > { %s1263_s18 = smov (%p29_p1, %s27_s18), 0  ;;  %p200_p3 = pnand %p851_p0, %p199_p2 }
   0x6   : > { %p246_p4 = scmp.lt.s32.totalorder (!%p200_p3), %s1102_s15, 3 }
   0x7   : > { %203 = sbr.rel (%p200_p3) target bundleno = 228 (0xe4), region = 28 }
   0xc   : > { %s1265_s15 = smov (!%p246_p4, %s1102_s15), 3  ;;  %v1112_v58 = vmov 0.0  }
   0xd   : > { %s1021_s19 = sshll.u32 %s1265_s15, 8  ;;  %s1020_s23 = sshll.u32 %s1265_s15, 6 }
   0xe   : > { %s1162_s22 = scalar_lea.vmem %s1256_s1, %s1021_s19  ;;  %s1194_s26 = scalar_lea.vmem %s1255_s0, %s1020_s23 }
   0xf   : > { %v1038_v0 = vld [vmem:[%s1162_s22 + $0x38] sm:$0xff]  ;;  %v1037_v4 = vld [vmem:[%s1162_s22 + $0x30] sm:$0xff]  ;;  %v1036_v8 = vld [vmem:[%s1162_s22 + $0x28] sm:$0xff]  ;;  %s1222_s29 = scalar_lea.vmem %s1258_s3, %s1265_s15  ;;  %s1228_s6 = scalar_lea.vmem %s1259_s4, %s1265_s15 }
  0x10   : > { %v1046_v1 = vld [vmem:[%s1162_s22 + $0x78] sm:$0xff]  ;;  %587 = vmatpush.bf16.msra.mxu0 %v1038_v0  ;;  %v1045_v5 = vld [vmem:[%s1162_s22 + $0x70] sm:$0xff]  ;;  %v1044_v9 = vld [vmem:[%s1162_s22 + $0x68] sm:$0xff]  ;;  %281 = vst [vmem:[%s1222_s29] sm:$0x1] %v1112_v58  ;;  %s1022_s7 = sshll.u32 %s1265_s15, 5 }
  0x11   : > { %v1054_v2 = vld [vmem:[%s1162_s22 + $0xb8] sm:$0xff]  ;;  %606 = vmatpush.bf16.msra.mxu1 %v1046_v1  ;;  %v1053_v6 = vld [vmem:[%s1162_s22 + $0xb0] sm:$0xff]  ;;  %v1052_v10 = vld [vmem:[%s1162_s22 + $0xa8] sm:$0xff]  ;;  %282 = vst [vmem:[%s1228_s6] sm:$0x1] %v1112_v58  ;;  %s1236_s10 = scalar_lea.vmem %s1257_s2, %s1022_s7 }
  0x12   : > { %v1062_v3 = vld [vmem:[%s1162_s22 + $0xf8] sm:$0xff]  ;;  %625 = vmatpush.bf16.msra.mxu2 %v1054_v2  ;;  %v1061_v7 = vld [vmem:[%s1162_s22 + $0xf0] sm:$0xff]  ;;  %v1060_v11 = vld [vmem:[%s1162_s22 + $0xe8] sm:$0xff] }
  0x13   : > { %644 = vmatpush.bf16.msra.mxu3 %v1062_v3  ;;  %v1035_v12 = vld [vmem:[%s1162_s22 + $0x20] sm:$0xff]  ;;  %v1034_v16 = vld [vmem:[%s1162_s22 + $0x18] sm:$0xff]  ;;  %v1033_v20 = vld [vmem:[%s1162_s22 + $0x10] sm:$0xff] }
  0x14   : > { %588 = vmatpush.bf16.msra.mxu0 %v1037_v4  ;;  %v1043_v13 = vld [vmem:[%s1162_s22 + $0x60] sm:$0xff]  ;;  %v1042_v17 = vld [vmem:[%s1162_s22 + $0x58] sm:$0xff]  ;;  %v1041_v21 = vld [vmem:[%s1162_s22 + $0x50] sm:$0xff] }
  0x15   : > { %607 = vmatpush.bf16.msra.mxu1 %v1045_v5  ;;  %v1051_v14 = vld [vmem:[%s1162_s22 + $0xa0] sm:$0xff]  ;;  %v1050_v18 = vld [vmem:[%s1162_s22 + $0x98] sm:$0xff]  ;;  %v1049_v22 = vld [vmem:[%s1162_s22 + $0x90] sm:$0xff] }
  0x16   : > { %626 = vmatpush.bf16.msra.mxu2 %v1053_v6  ;;  %v1059_v15 = vld [vmem:[%s1162_s22 + $0xe0] sm:$0xff]  ;;  %v1058_v19 = vld [vmem:[%s1162_s22 + $0xd8] sm:$0xff]  ;;  %v1057_v23 = vld [vmem:[%s1162_s22 + $0xd0] sm:$0xff] }
  0x17   : > { %645 = vmatpush.bf16.msra.mxu3 %v1061_v7  ;;  %v1032_v24 = vld [vmem:[%s1162_s22 + $0x8] sm:$0xff]  ;;  %v1031_v28 = vld [vmem:[%s1162_s22] sm:$0xff]  ;;  %v1025_v33 = vld [vmem:[%s1194_s26 + $0xc] sm:$0xf0] }
  0x18   : > { %589 = vmatpush.bf16.msra.mxu0 %v1036_v8  ;;  %v1040_v25 = vld [vmem:[%s1162_s22 + $0x48] sm:$0xff]  ;;  %v1039_v29 = vld [vmem:[%s1162_s22 + $0x40] sm:$0xff]  ;;  %v862_v35 = vld [vmem:[%s1194_s26 + $0x10] sm:$0xf0] }
  0x19   : > { %608 = vmatpush.bf16.msra.mxu1 %v1044_v9  ;;  %v1048_v26 = vld [vmem:[%s1162_s22 + $0x88] sm:$0xff]  ;;  %v1047_v30 = vld [vmem:[%s1162_s22 + $0x80] sm:$0xff]  ;;  %v1026_v37 = vld [vmem:[%s1194_s26 + $0x14] sm:$0xf0] }
  0x1a   : > { %627 = vmatpush.bf16.msra.mxu2 %v1052_v10  ;;  %v1056_v27 = vld [vmem:[%s1162_s22 + $0xc8] sm:$0xff]  ;;  %v1055_v31 = vld [vmem:[%s1162_s22 + $0xc0] sm:$0xff]  ;;  %v870_v39 = vld [vmem:[%s1194_s26 + $0x18] sm:$0xf0] }
  0x1b   : > { %646 = vmatpush.bf16.msra.mxu3 %v1060_v11  ;;  %v860_v32 = vld [vmem:[%s1194_s26] sm:$0xf]  ;;  %v1023_v34 = vld [vmem:[%s1194_s26 + $0x4] sm:$0xf]  ;;  %v868_v36 = vld [vmem:[%s1194_s26 + $0x8] sm:$0xf] }
  0x1c   : > { %590 = vmatpush.bf16.msra.mxu0 %v1035_v12  ;;  %v1024_v38 = vld [vmem:[%s1194_s26 + $0xc] sm:$0xf]  ;;  %v861_v40 = vor.u32 %v1025_v33, %v860_v32  ;;  %v865_v41 = vor.u32 %v1023_v34, %v862_v35  ;;  %v869_v42 = vor.u32 %v1026_v37, %v868_v36  ;;  %v876_v44 = vld [vmem:[%s1194_s26 + $0x20] sm:$0xf]  ;;  %v1029_v45 = vld [vmem:[%s1194_s26 + $0x2c] sm:$0xf0] }
  0x1d   : > { %609 = vmatpush.bf16.msra.mxu1 %v1043_v13  ;;  %v873_v43 = vor.u32 %v1024_v38, %v870_v39  ;;  %v1027_v46 = vld [vmem:[%s1194_s26 + $0x24] sm:$0xf]  ;;  %v878_v47 = vld [vmem:[%s1194_s26 + $0x30] sm:$0xf0]  ;;  %v884_v48 = vld [vmem:[%s1194_s26 + $0x28] sm:$0xf]  ;;  %v877_v52 = vor.u32 %v1029_v45, %v876_v44 }
  0x1e   : > { %628 = vmatpush.bf16.msra.mxu2 %v1051_v14  ;;  %v1030_v49 = vld [vmem:[%s1194_s26 + $0x34] sm:$0xf0]  ;;  %v1028_v50 = vld [vmem:[%s1194_s26 + $0x2c] sm:$0xf]  ;;  %v886_v51 = vld [vmem:[%s1194_s26 + $0x38] sm:$0xf0]  ;;  %v881_v53 = vor.u32 %v1027_v46, %v878_v47 }
  0x1f   : > { %647 = vmatpush.bf16.msra.mxu3 %v1059_v15  ;;  %v885_v54 = vor.u32 %v1030_v49, %v884_v48  ;;  %v889_v55 = vor.u32 %v1028_v50, %v886_v51 }
  0x20   : > { %591 = vmatpush.bf16.msra.mxu0 %v1034_v16 }
  0x21   : > { %610 = vmatpush.bf16.msra.mxu1 %v1042_v17 }
  0x22   : > { %629 = vmatpush.bf16.msra.mxu2 %v1050_v18 }
  0x23   : > { %648 = vmatpush.bf16.msra.mxu3 %v1058_v19 }
  0x24   : > { %592 = vmatpush.bf16.msra.mxu0 %v1033_v20 }
  0x25   : > { %611 = vmatpush.bf16.msra.mxu1 %v1041_v21 }
  0x26   : > { %630 = vmatpush.bf16.msra.mxu2 %v1049_v22 }
  0x27   : > { %649 = vmatpush.bf16.msra.mxu3 %v1057_v23 }
  0x28   : > { %593 = vmatpush.bf16.msra.mxu0 %v1032_v24 }
  0x29   : > { %612 = vmatpush.bf16.msra.mxu1 %v1040_v25 }
  0x2a   : > { %631 = vmatpush.bf16.msra.mxu2 %v1048_v26 }
  0x2b   : > { %650 = vmatpush.bf16.msra.mxu3 %v1056_v27 }
  0x2c   : > { %594 = vmatpush.bf16.msra.mxu0 %v1031_v28 }
  0x2d   : > { %613 = vmatpush.bf16.msra.mxu1 %v1039_v29 }
  0x2e   : > { %632 = vmatpush.bf16.msra.mxu2 %v1047_v30 }
  0x2f   : > { %651 = vmatpush.bf16.msra.mxu3 %v1055_v31  ;;  %595 = vmatmul.bf16.vlgmr.msra.gmra.mxu0 %v861_v40  ;;  %v663_v40 = vld [vmem:[%s1222_s29] sm:$0x1] }
  0x30   : > { %614 = vmatmul.bf16.vlgmr.msra.gmra.mxu1 %v865_v41 }
  0x31   : > { %633 = vmatmul.bf16.vlgmr.msra.gmra.mxu2 %v869_v42 }
  0x32   : > { %652 = vmatmul.bf16.vlgmr.msra.gmra.mxu3 %v873_v43  ;;  %v675_v43 = vld [vmem:[%s1228_s6] sm:$0x1] }
  0x3f   : > { %600 = vmatmul.bf16.gmra.mxu0 %v877_v52 }
  0x40   : > { %619 = vmatmul.bf16.gmra.mxu1 %v881_v53 }
  0x41   : > { %638 = vmatmul.bf16.gmra.mxu2 %v885_v54 }
  0x42   : > { %657 = vmatmul.bf16.gmra.mxu3 %v889_v55 }
  0xac   : > { %v596_v56 = vpop.f32.mrf.mxu0 }
  0xad   : > { %v615_v57 = vpop.f32.mrf.mxu1 }
  0xae   : > { %v616_v59 = vadd.f32 %v615_v57, %v596_v56 }
  0xb4   : > { %v634_v60 = vpop.f32.mrf.mxu2  ;;  %v598_v63 = vpop.f32.mrf.mxu0 }
  0xb5   : > { %v653_v61 = vpop.f32.mrf.mxu3  ;;  %v635_v62 = vadd.f32 %v634_v60, %v616_v59  ;;  %v617_v0 = vpop.f32.mrf.mxu1 }
  0xb6   : > { %v618_v2 = vadd.f32 %v617_v0, %v598_v63 }
  0xb7   : > { %v654_v1 = vadd.f32 %v653_v61, %v635_v62 }
  0xb9   : > { %691 = vst [vmem:[%s1236_s10] sm:$0xff] %v654_v1  ;;  %v676_v19 = vmul.f32 %v654_v1, %v654_v1 }
  0xbc   : > { %v636_v3 = vpop.f32.mrf.mxu2  ;;  %v601_v6 = vpop.f32.mrf.mxu0 }
  0xbd   : > { %v655_v4 = vpop.f32.mrf.mxu3  ;;  %v637_v5 = vadd.f32 %v636_v3, %v618_v2  ;;  %v620_v7 = vpop.f32.mrf.mxu1 }
  0xbe   : > { %v621_v9 = vadd.f32 %v620_v7, %v601_v6 }
  0xbf   : > { %v656_v8 = vadd.f32 %v655_v4, %v637_v5 }
  0xc1   : > { %692 = vst [vmem:[%s1236_s10 + $0x8] sm:$0xff] %v656_v8  ;;  %v677_v16 = vmul.f32 %v656_v8, %v656_v8  ;;  %v664_v20 = vadd.f32 %v656_v8, %v654_v1 }
  0xc3   : > { %v680_v24 = vadd.f32 %v677_v16, %v676_v19 }
  0xc4   : > { %v639_v10 = vpop.f32.mrf.mxu2  ;;  %v603_v14 = vpop.f32.mrf.mxu0 }
  0xc5   : > { %v658_v11 = vpop.f32.mrf.mxu3  ;;  %v640_v12 = vadd.f32 %v639_v10, %v621_v9  ;;  %v622_v15 = vpop.f32.mrf.mxu1 }
  0xc6   : > { %v623_v17 = vadd.f32 %v622_v15, %v603_v14 }
  0xc7   : > { %v659_v13 = vadd.f32 %v658_v11, %v640_v12 }
  0xc9   : > { %693 = vst [vmem:[%s1236_s10 + $0x10] sm:$0xff] %v659_v13  ;;  %v678_v21 = vmul.f32 %v659_v13, %v659_v13  ;;  %v665_v25 = vadd.f32 %v664_v20, %v659_v13 }
  0xcb   : > { %v681_v27 = vadd.f32 %v680_v24, %v678_v21 }
  0xcc   : > { %v641_v18 = vpop.f32.mrf.mxu2 }
  0xcd   : > { %v642_v22 = vadd.f32 %v641_v18, %v623_v17  ;;  %v660_v23 = vpop.f32.mrf.mxu3 }
  0xcf   : > { %v661_v26 = vadd.f32 %v660_v23, %v642_v22 }
  0xd1   : > { %v666_v28 = vadd.f32 %v665_v25, %v661_v26  ;;  %v679_v29 = vmul.f32 %v661_v26, %v661_v26  ;;  %694 = vst [vmem:[%s1236_s10 + $0x18] sm:$0xff] %v661_v26 }
  0xd3   : > { %v667_v30 = vrot.slane %v666_v28, 4  ;;  %v682_v31 = vadd.f32 %v681_v27, %v679_v29 }
  0xd5   : > { %v668_v32 = vadd.f32 %v667_v30, %v666_v28  ;;  %v683_v33 = vrot.slane %v682_v31, 4 }
  0xd7   : > { %v669_v34 = vrot.slane %v668_v32, 2  ;;  %v684_v35 = vadd.f32 %v683_v33, %v682_v31 }
  0xd9   : > { %v670_v36 = vadd.f32 %v669_v34, %v668_v32  ;;  %v685_v37 = vrot.slane %v684_v35, 2 }
  0xdb   : > { %v671_v38 = vrot.slane %v670_v36, 1  ;;  %v686_v39 = vadd.f32 %v685_v37, %v684_v35 }
  0xdd   : > { %v672_v41 = vadd.f32 %v671_v38, %v670_v36  ;;  %v687_v42 = vrot.slane %v686_v39, 1 }
  0xdf   : > { %v673_v44 = vadd.f32 %v672_v41, %v663_v40  ;;  %v688_v45 = vadd.f32 %v687_v42, %v686_v39 }
  0xe1   : > { %674 = vst [vmem:[%s1222_s29] sm:$0x1] %v673_v44  ;;  %v689_v46 = vadd.f32 %v688_v45, %v675_v43 }
  0xe3   : > { %690 = vst [vmem:[%s1228_s6] sm:$0x1] %v689_v46 }
  0xe4 PF: > { %s15_s17 = sadd.s32 1, %s1110_s17   ;;  %s1260_s15 = smov %s1106_s16 }
  0xe5   : > { %p12_p5 = scmp.ge.s32.totalorder %s15_s17, 6   ;;  %s1261_s16 = smov %s1263_s18 }
  0xe7   :  { %14 = sbr.rel (!%p12_p5) target bundleno = 2 (0x2), region = 89 }

// kernel: generator_forward.13
= control target key start
LH: loop header
LB: loop body
LE: loop exit
PB: predicated region body
PF: predicated region fallthrough
CT: control target
= control target key end

     0   :  { %s1104_s15 = smov 0   ;;  %s1106_s16 = smov 0   ;;  %s1266_s0 = inlined_call_operand.vmem [shape: bf16[4,128,256], index: 0, kind: input, shape index: {}]   ;;  %s1267_s1 = inlined_call_operand.vmem [shape: bf16[4,256,128], index: 1, kind: input, shape index: {}]   ;;  %s1268_s2 = inlined_call_operand.vmem [shape: f32[4,128,128], index: 2, kind: output, shape index: {0}]   ;;  %s1269_s3 = inlined_call_operand.vmem [shape: f32[4,1,128], index: 3, kind: output, shape index: {1}]   ;;  %s1270_s4 = inlined_call_operand.vmem [shape: f32[4,1,128], index: 4, kind: output, shape index: {2}]  }
   0x1   :  { %s1108_s17 = smov 0  }
   0x2 LB: > { %s27_s18 = sadd.s32 1, %s1072_s16  ;;  %p841_p0 = scmp.ge.s32.totalorder %s1076_s17, 1  ;;  %s1076_s17 = sphi %s1108_s17, %s15_s17   ;;  %s1072_s16 = sphi %s1106_s16, %s1272_s16   ;;  %s1068_s15 = sphi %s1104_s15, %s1271_s15  }
   0x3   : > { %p29_p1 = scmp.ge.s32.totalorder %s27_s18, 4  ;;  %p199_p2 = scmp.lt.s32.totalorder %s1076_s17, 5 }
   0x5   : > { %s1274_s18 = smov (%p29_p1, %s27_s18), 0  ;;  %p200_p3 = pnand %p841_p0, %p199_p2 }
   0x6   : > { %p246_p4 = scmp.lt.s32.totalorder (!%p200_p3), %s1068_s15, 3 }
   0x7   : > { %203 = sbr.rel (%p200_p3) target bundleno = 267 (0x10b), region = 28 }
   0xc   : > { %s1276_s15 = smov (!%p246_p4, %s1068_s15), 3 }
   0xd   : > { %s1125_s19 = sshll.u32 %s1276_s15, 7  ;;  %s1220_s5 = scalar_lea.vmem %s1269_s3, %s1276_s15 }
   0xe   : > { %s1131_s22 = scalar_lea.vmem %s1267_s1, %s1125_s19  ;;  %s1151_s25 = scalar_lea.vmem %s1266_s0, %s1125_s19 }
   0xf   : > { %v1004_v0 = vld [vmem:[%s1131_s22 + $0x38] sm:$0xff]  ;;  %v1003_v2 = vld [vmem:[%s1131_s22 + $0x30] sm:$0xff]  ;;  %v1002_v4 = vld [vmem:[%s1131_s22 + $0x28] sm:$0xff]  ;;  %s1191_s28 = scalar_lea.vmem %s1268_s2, %s1125_s19  ;;  %s1228_s8 = scalar_lea.vmem %s1270_s4, %s1276_s15 }
  0x10   : > { %v1012_v1 = vld [vmem:[%s1131_s22 + $0x78] sm:$0xff]  ;;  %507 = vmatpush.bf16.msra.mxu0 %v1004_v0  ;;  %v1011_v3 = vld [vmem:[%s1131_s22 + $0x70] sm:$0xff]  ;;  %1013 = vmatpush.bf16.msra.mxu2 %v1004_v0  ;;  %v1010_v5 = vld [vmem:[%s1131_s22 + $0x68] sm:$0xff] }
  0x11   : > { %556 = vmatpush.bf16.msra.mxu1 %v1012_v1  ;;  %1021 = vmatpush.bf16.msra.mxu3 %v1012_v1  ;;  %v1001_v6 = vld [vmem:[%s1131_s22 + $0x20] sm:$0xff]  ;;  %v1000_v8 = vld [vmem:[%s1131_s22 + $0x18] sm:$0xff]  ;;  %v999_v10 = vld [vmem:[%s1131_s22 + $0x10] sm:$0xff] }
  0x12   : > { %v1009_v7 = vld [vmem:[%s1131_s22 + $0x60] sm:$0xff]  ;;  %v1008_v9 = vld [vmem:[%s1131_s22 + $0x58] sm:$0xff]  ;;  %v1007_v11 = vld [vmem:[%s1131_s22 + $0x50] sm:$0xff] }
  0x13   : > { %v998_v12 = vld [vmem:[%s1131_s22 + $0x8] sm:$0xff]  ;;  %v997_v14 = vld [vmem:[%s1131_s22] sm:$0xff]  ;;  %v858_v28 = vld [vmem:[%s1151_s25 + $0x10] sm:$0xf] }
  0x14   : > { %508 = vmatpush.bf16.msra.mxu0 %v1003_v2  ;;  %1014 = vmatpush.bf16.msra.mxu2 %v1003_v2  ;;  %v1006_v13 = vld [vmem:[%s1131_s22 + $0x48] sm:$0xff]  ;;  %v1005_v15 = vld [vmem:[%s1131_s22 + $0x40] sm:$0xff]  ;;  %v984_v29 = vld [vmem:[%s1151_s25 + $0x14] sm:$0xf0] }
  0x15   : > { %557 = vmatpush.bf16.msra.mxu1 %v1011_v3  ;;  %1022 = vmatpush.bf16.msra.mxu3 %v1011_v3  ;;  %v850_v16 = vld [vmem:[%s1151_s25] sm:$0xf]  ;;  %v982_v17 = vld [vmem:[%s1151_s25 + $0x4] sm:$0xf0]  ;;  %v981_v18 = vld [vmem:[%s1151_s25 + $0x4] sm:$0xf]  ;;  %v859_v36 = vor.u32 %v984_v29, %v858_v28 }
  0x16   : > { %v852_v19 = vld [vmem:[%s1151_s25 + $0x8] sm:$0xf0]  ;;  %v882_v20 = vld [vmem:[%s1151_s25 + $0x40] sm:$0xf]  ;;  %v990_v21 = vld [vmem:[%s1151_s25 + $0x44] sm:$0xf0]  ;;  %v851_v24 = vor.u32 %v982_v17, %v850_v16 }
  0x17   : > { %v989_v22 = vld [vmem:[%s1151_s25 + $0x44] sm:$0xf]  ;;  %v884_v23 = vld [vmem:[%s1151_s25 + $0x48] sm:$0xf0]  ;;  %v855_v25 = vor.u32 %v981_v18, %v852_v19  ;;  %v883_v26 = vor.u32 %v990_v21, %v882_v20  ;;  %v983_v30 = vld [vmem:[%s1151_s25 + $0x14] sm:$0xf] }
  0x18   : > { %509 = vmatpush.bf16.msra.mxu0 %v1002_v4  ;;  %1015 = vmatpush.bf16.msra.mxu2 %v1002_v4  ;;  %v887_v27 = vor.u32 %v989_v22, %v884_v23  ;;  %v860_v31 = vld [vmem:[%s1151_s25 + $0x18] sm:$0xf0]  ;;  %v890_v32 = vld [vmem:[%s1151_s25 + $0x50] sm:$0xf]  ;;  %v992_v33 = vld [vmem:[%s1151_s25 + $0x54] sm:$0xf0] }
  0x19   : > { %558 = vmatpush.bf16.msra.mxu1 %v1010_v5  ;;  %1023 = vmatpush.bf16.msra.mxu3 %v1010_v5  ;;  %v991_v34 = vld [vmem:[%s1151_s25 + $0x54] sm:$0xf]  ;;  %v892_v35 = vld [vmem:[%s1151_s25 + $0x58] sm:$0xf0]  ;;  %v863_v37 = vor.u32 %v983_v30, %v860_v31  ;;  %v891_v38 = vor.u32 %v992_v33, %v890_v32  ;;  %v866_v40 = vld [vmem:[%s1151_s25 + $0x20] sm:$0xf] }
  0x1a   : > { %v895_v39 = vor.u32 %v991_v34, %v892_v35  ;;  %v986_v41 = vld [vmem:[%s1151_s25 + $0x24] sm:$0xf0]  ;;  %v985_v42 = vld [vmem:[%s1151_s25 + $0x24] sm:$0xf]  ;;  %v868_v43 = vld [vmem:[%s1151_s25 + $0x28] sm:$0xf0] }
  0x1b   : > { %v898_v44 = vld [vmem:[%s1151_s25 + $0x60] sm:$0xf]  ;;  %v994_v45 = vld [vmem:[%s1151_s25 + $0x64] sm:$0xf0]  ;;  %v993_v46 = vld [vmem:[%s1151_s25 + $0x64] sm:$0xf]  ;;  %v867_v48 = vor.u32 %v986_v41, %v866_v40  ;;  %v871_v49 = vor.u32 %v985_v42, %v868_v43 }
  0x1c   : > { %510 = vmatpush.bf16.msra.mxu0 %v1001_v6  ;;  %1016 = vmatpush.bf16.msra.mxu2 %v1001_v6  ;;  %v900_v47 = vld [vmem:[%s1151_s25 + $0x68] sm:$0xf0]  ;;  %v899_v50 = vor.u32 %v994_v45, %v898_v44  ;;  %v874_v52 = vld [vmem:[%s1151_s25 + $0x30] sm:$0xf]  ;;  %v988_v53 = vld [vmem:[%s1151_s25 + $0x34] sm:$0xf0] }
  0x1d   : > { %559 = vmatpush.bf16.msra.mxu1 %v1009_v7  ;;  %1024 = vmatpush.bf16.msra.mxu3 %v1009_v7  ;;  %v903_v51 = vor.u32 %v993_v46, %v900_v47  ;;  %v987_v54 = vld [vmem:[%s1151_s25 + $0x34] sm:$0xf]  ;;  %v876_v55 = vld [vmem:[%s1151_s25 + $0x38] sm:$0xf0]  ;;  %v906_v56 = vld [vmem:[%s1151_s25 + $0x70] sm:$0xf]  ;;  %v875_v60 = vor.u32 %v988_v53, %v874_v52 }
  0x1e   : > { %v996_v57 = vld [vmem:[%s1151_s25 + $0x74] sm:$0xf0]  ;;  %v995_v58 = vld [vmem:[%s1151_s25 + $0x74] sm:$0xf]  ;;  %v908_v59 = vld [vmem:[%s1151_s25 + $0x78] sm:$0xf0]  ;;  %v879_v61 = vor.u32 %v987_v54, %v876_v55 }
  0x1f   : > { %v907_v62 = vor.u32 %v996_v57, %v906_v56  ;;  %v911_v63 = vor.u32 %v995_v58, %v908_v59  ;;  %v1078_v33 = vmov 0.0  }
  0x20   : > { %511 = vmatpush.bf16.msra.mxu0 %v1000_v8  ;;  %1017 = vmatpush.bf16.msra.mxu2 %v1000_v8  ;;  %281 = vst [vmem:[%s1220_s5] sm:$0x1] %v1078_v33 }
  0x21   : > { %560 = vmatpush.bf16.msra.mxu1 %v1008_v9  ;;  %1025 = vmatpush.bf16.msra.mxu3 %v1008_v9  ;;  %282 = vst [vmem:[%s1228_s8] sm:$0x1] %v1078_v33 }
  0x24   : > { %512 = vmatpush.bf16.msra.mxu0 %v999_v10  ;;  %1018 = vmatpush.bf16.msra.mxu2 %v999_v10 }
  0x25   : > { %561 = vmatpush.bf16.msra.mxu1 %v1007_v11  ;;  %1026 = vmatpush.bf16.msra.mxu3 %v1007_v11 }
  0x28   : > { %513 = vmatpush.bf16.msra.mxu0 %v998_v12  ;;  %1019 = vmatpush.bf16.msra.mxu2 %v998_v12 }
  0x29   : > { %562 = vmatpush.bf16.msra.mxu1 %v1006_v13  ;;  %1027 = vmatpush.bf16.msra.mxu3 %v1006_v13 }
  0x2c   : > { %514 = vmatpush.bf16.msra.mxu0 %v997_v14  ;;  %1020 = vmatpush.bf16.msra.mxu2 %v997_v14 }
  0x2d   : > { %563 = vmatpush.bf16.msra.mxu1 %v1005_v15  ;;  %1028 = vmatpush.bf16.msra.mxu3 %v1005_v15 }
  0x2f   : > { %515 = vmatmul.bf16.vlgmr.msra.gmra.mxu0 %v851_v24  ;;  %535 = vmatmul.bf16.vlgmr.msra.gmra.mxu2 %v883_v26 }
  0x30   : > { %564 = vmatmul.bf16.vlgmr.msra.gmra.mxu1 %v855_v25  ;;  %584 = vmatmul.bf16.vlgmr.msra.gmra.mxu3 %v887_v27 }
  0x3f   : > { %520 = vmatmul.bf16.gmra.mxu0 %v859_v36  ;;  %540 = vmatmul.bf16.gmra.mxu2 %v891_v38 }
  0x40   : > { %569 = vmatmul.bf16.gmra.mxu1 %v863_v37  ;;  %589 = vmatmul.bf16.gmra.mxu3 %v895_v39 }
  0x4f   : > { %525 = vmatmul.bf16.gmra.mxu0 %v867_v48  ;;  %545 = vmatmul.bf16.gmra.mxu2 %v899_v50 }
  0x50   : > { %574 = vmatmul.bf16.gmra.mxu1 %v871_v49  ;;  %594 = vmatmul.bf16.gmra.mxu3 %v903_v51 }
  0x5f   : > { %530 = vmatmul.bf16.gmra.mxu0 %v875_v60  ;;  %550 = vmatmul.bf16.gmra.mxu2 %v907_v62 }
  0x60   : > { %579 = vmatmul.bf16.gmra.mxu1 %v879_v61  ;;  %599 = vmatmul.bf16.gmra.mxu3 %v911_v63 }
  0xac   : > { %v516_v0 = vpop.f32.mrf.mxu0 }
  0xad   : > { %v565_v1 = vpop.f32.mrf.mxu1 }
  0xae   : > { %v566_v2 = vadd.f32 %v565_v1, %v516_v0 }
  0xb0   : > { %669 = vst [vmem:[%s1191_s28] sm:$0xff] %v566_v2  ;;  %v630_v35 = vmul.f32 %v566_v2, %v566_v2 }
  0xb2   : > { %v536_v3 = vpop.f32.mrf.mxu2 }
  0xb3   : > { %v585_v4 = vpop.f32.mrf.mxu3 }
  0xb4   : > { %v518_v5 = vpop.f32.mrf.mxu0  ;;  %v1194_v7 = vadd.f32 %v585_v4, %v536_v3 }
  0xb5   : > { %v567_v6 = vpop.f32.mrf.mxu1 }
  0xb6   : > { %v568_v8 = vadd.f32 %v567_v6, %v518_v5  ;;  %677 = vst [vmem:[%s1191_s28 + $0x40] sm:$0xff] %v1194_v7  ;;  %v638_v3 = vmul.f32 %v1194_v7, %v1194_v7 }
  0xb8   : > { %670 = vst [vmem:[%s1191_s28 + $0x8] sm:$0xff] %v568_v8  ;;  %v631_v34 = vmul.f32 %v568_v8, %v568_v8  ;;  %v606_v36 = vadd.f32 %v568_v8, %v566_v2 }
  0xba   : > { %v538_v9 = vpop.f32.mrf.mxu2  ;;  %v646_v43 = vadd.f32 %v631_v34, %v630_v35 }
  0xbb   : > { %v587_v10 = vpop.f32.mrf.mxu3 }
  0xbc   : > { %v521_v11 = vpop.f32.mrf.mxu0  ;;  %v1199_v13 = vadd.f32 %v587_v10, %v538_v9 }
  0xbd   : > { %v570_v12 = vpop.f32.mrf.mxu1 }
  0xbe   : > { %v571_v14 = vadd.f32 %v570_v12, %v521_v11  ;;  %678 = vst [vmem:[%s1191_s28 + $0x48] sm:$0xff] %v1199_v13  ;;  %v639_v6 = vmul.f32 %v1199_v13, %v1199_v13 }
  0xc0   : > { %671 = vst [vmem:[%s1191_s28 + $0x10] sm:$0xff] %v571_v14  ;;  %v632_v37 = vmul.f32 %v571_v14, %v571_v14  ;;  %v607_v44 = vadd.f32 %v606_v36, %v571_v14 }
  0xc2   : > { %v541_v15 = vpop.f32.mrf.mxu2  ;;  %v647_v47 = vadd.f32 %v646_v43, %v632_v37  ;;  %v629_v43 = vld [vmem:[%s1228_s8] sm:$0x1] }
  0xc3   : > { %v590_v16 = vpop.f32.mrf.mxu3 }
  0xc4   : > { %v523_v17 = vpop.f32.mrf.mxu0  ;;  %v1204_v19 = vadd.f32 %v590_v16, %v541_v15 }
  0xc5   : > { %v572_v18 = vpop.f32.mrf.mxu1 }
  0xc6   : > { %v573_v20 = vadd.f32 %v572_v18, %v523_v17  ;;  %679 = vst [vmem:[%s1191_s28 + $0x50] sm:$0xff] %v1204_v19  ;;  %v640_v14 = vmul.f32 %v1204_v19, %v1204_v19 }
  0xc8   : > { %672 = vst [vmem:[%s1191_s28 + $0x18] sm:$0xff] %v573_v20  ;;  %v633_v45 = vmul.f32 %v573_v20, %v573_v20  ;;  %v608_v48 = vadd.f32 %v607_v44, %v573_v20 }
  0xca   : > { %v543_v21 = vpop.f32.mrf.mxu2  ;;  %v648_v50 = vadd.f32 %v647_v47, %v633_v45 }
  0xcb   : > { %v592_v22 = vpop.f32.mrf.mxu3 }
  0xcc   : > { %v526_v23 = vpop.f32.mrf.mxu0  ;;  %v1209_v25 = vadd.f32 %v592_v22, %v543_v21 }
  0xcd   : > { %v575_v24 = vpop.f32.mrf.mxu1 }
  0xce   : > { %v576_v26 = vadd.f32 %v575_v24, %v526_v23  ;;  %680 = vst [vmem:[%s1191_s28 + $0x58] sm:$0xff] %v1209_v25 }
  0xd0   : > { %673 = vst [vmem:[%s1191_s28 + $0x20] sm:$0xff] %v576_v26  ;;  %v634_v49 = vmul.f32 %v576_v26, %v576_v26  ;;  %v609_v51 = vadd.f32 %v608_v48, %v576_v26 }
  0xd2   : > { %v546_v27 = vpop.f32.mrf.mxu2  ;;  %v649_v53 = vadd.f32 %v648_v50, %v634_v49 }
  0xd3   : > { %v595_v28 = vpop.f32.mrf.mxu3 }
  0xd4   : > { %v528_v29 = vpop.f32.mrf.mxu0  ;;  %v1214_v31 = vadd.f32 %v595_v28, %v546_v27 }
  0xd5   : > { %v577_v30 = vpop.f32.mrf.mxu1 }
  0xd6   : > { %v578_v32 = vadd.f32 %v577_v30, %v528_v29  ;;  %681 = vst [vmem:[%s1191_s28 + $0x60] sm:$0xff] %v1214_v31 }
  0xd8   : > { %674 = vst [vmem:[%s1191_s28 + $0x28] sm:$0xff] %v578_v32  ;;  %v635_v52 = vmul.f32 %v578_v32, %v578_v32  ;;  %v610_v54 = vadd.f32 %v609_v51, %v578_v32 }
  0xda   : > { %v548_v38 = vpop.f32.mrf.mxu2  ;;  %v650_v61 = vadd.f32 %v649_v53, %v635_v52 }
  0xdb   : > { %v597_v39 = vpop.f32.mrf.mxu3 }
  0xdc   : > { %v531_v40 = vpop.f32.mrf.mxu0  ;;  %v598_v42 = vadd.f32 %v597_v39, %v548_v38 }
  0xdd   : > { %v580_v41 = vpop.f32.mrf.mxu1 }
  0xde   : > { %v581_v46 = vadd.f32 %v580_v41, %v531_v40  ;;  %682 = vst [vmem:[%s1191_s28 + $0x68] sm:$0xff] %v598_v42  ;;  %v643_v22 = vmul.f32 %v598_v42, %v598_v42  ;;  %v605_v40 = vld [vmem:[%s1220_s5] sm:$0x1] }
  0xe0   : > { %675 = vst [vmem:[%s1191_s28 + $0x30] sm:$0xff] %v581_v46  ;;  %v636_v55 = vmul.f32 %v581_v46, %v581_v46  ;;  %v611_v62 = vadd.f32 %v610_v54, %v581_v46 }
  0xe2   : > { %v551_v56 = vpop.f32.mrf.mxu2  ;;  %v651_v0 = vadd.f32 %v650_v61, %v636_v55 }
  0xe3   : > { %v600_v57 = vpop.f32.mrf.mxu3 }
  0xe4   : > { %v533_v58 = vpop.f32.mrf.mxu0  ;;  %v601_v60 = vadd.f32 %v600_v57, %v551_v56 }
  0xe5   : > { %v582_v59 = vpop.f32.mrf.mxu1 }
  0xe6   : > { %v583_v63 = vadd.f32 %v582_v59, %v533_v58  ;;  %683 = vst [vmem:[%s1191_s28 + $0x70] sm:$0xff] %v601_v60 }
  0xe8   : > { %v612_v1 = vadd.f32 %v611_v62, %v583_v63  ;;  %v637_v2 = vmul.f32 %v583_v63, %v583_v63  ;;  %676 = vst [vmem:[%s1191_s28 + $0x38] sm:$0xff] %v583_v63 }
  0xea   : > { %v613_v4 = vadd.f32 %v612_v1, %v1194_v7  ;;  %v652_v5 = vadd.f32 %v651_v0, %v637_v2  ;;  %v553_v10 = vpop.f32.mrf.mxu2  ;;  %v641_v7 = vmul.f32 %v1209_v25, %v1209_v25 }
  0xeb   : > { %v602_v11 = vpop.f32.mrf.mxu3 }
  0xec   : > { %v614_v8 = vadd.f32 %v613_v4, %v1199_v13  ;;  %v653_v9 = vadd.f32 %v652_v5, %v638_v3  ;;  %v603_v12 = vadd.f32 %v602_v11, %v553_v10  ;;  %v642_v13 = vmul.f32 %v1214_v31, %v1214_v31 }
  0xee   : > { %v615_v15 = vadd.f32 %v614_v8, %v1204_v19  ;;  %v654_v16 = vadd.f32 %v653_v9, %v639_v6  ;;  %684 = vst [vmem:[%s1191_s28 + $0x78] sm:$0xff] %v603_v12  ;;  %v644_v19 = vmul.f32 %v601_v60, %v601_v60  ;;  %v645_v30 = vmul.f32 %v603_v12, %v603_v12 }
  0xf0   : > { %v655_v17 = vadd.f32 %v654_v16, %v640_v14  ;;  %v616_v18 = vadd.f32 %v615_v15, %v1209_v25 }
  0xf2   : > { %v617_v20 = vadd.f32 %v616_v18, %v1214_v31  ;;  %v656_v21 = vadd.f32 %v655_v17, %v641_v7 }
  0xf4   : > { %v618_v23 = vadd.f32 %v617_v20, %v598_v42  ;;  %v657_v24 = vadd.f32 %v656_v21, %v642_v13 }
  0xf6   : > { %v619_v26 = vadd.f32 %v618_v23, %v601_v60  ;;  %v658_v27 = vadd.f32 %v657_v24, %v643_v22 }
  0xf8   : > { %v659_v28 = vadd.f32 %v658_v27, %v644_v19  ;;  %v620_v29 = vadd.f32 %v619_v26, %v603_v12 }
  0xfa   : > { %v621_v32 = vrot.slane %v620_v29, 4  ;;  %v660_v25 = vadd.f32 %v659_v28, %v645_v30 }
  0xfc   : > { %v622_v33 = vadd.f32 %v621_v32, %v620_v29  ;;  %v661_v34 = vrot.slane %v660_v25, 4 }
  0xfe   : > { %v623_v35 = vrot.slane %v622_v33, 2  ;;  %v662_v31 = vadd.f32 %v661_v34, %v660_v25 }
 0x100   : > { %v624_v36 = vadd.f32 %v623_v35, %v622_v33  ;;  %v663_v37 = vrot.slane %v662_v31, 2 }
 0x102   : > { %v625_v38 = vrot.slane %v624_v36, 1  ;;  %v664_v39 = vadd.f32 %v663_v37, %v662_v31 }
 0x104   : > { %v626_v41 = vadd.f32 %v625_v38, %v624_v36  ;;  %v665_v42 = vrot.slane %v664_v39, 1 }
 0x106   : > { %v627_v44 = vadd.f32 %v626_v41, %v605_v40  ;;  %v666_v45 = vadd.f32 %v665_v42, %v664_v39 }
 0x108   : > { %628 = vst [vmem:[%s1220_s5] sm:$0x1] %v627_v44  ;;  %v667_v46 = vadd.f32 %v666_v45, %v629_v43 }
 0x10a   : > { %668 = vst [vmem:[%s1228_s8] sm:$0x1] %v667_v46 }
 0x10b PF: > { %s15_s17 = sadd.s32 1, %s1076_s17   ;;  %s1271_s15 = smov %s1072_s16 }
 0x10c   : > { %p12_p5 = scmp.ge.s32.totalorder %s15_s17, 6   ;;  %s1272_s16 = smov %s1274_s18 }
 0x10e   :  { %14 = sbr.rel (!%p12_p5) target bundleno = 2 (0x2), region = 89 }

// kernel: generator_forward.14
= control target key start
LH: loop header
LB: loop body
LE: loop exit
PB: predicated region body
PF: predicated region fallthrough
CT: control target
= control target key end

     0   :  { %s468_s12 = smov 0   ;;  %s470_s13 = smov 0   ;;  %s561_s0 = inlined_call_operand.vmem [shape: f32[4,128,128], index: 0, kind: input, shape index: {}]   ;;  %s562_s1 = inlined_call_operand.vmem [shape: f32[1,128], index: 1, kind: input, shape index: {}]   ;;  %s563_s2 = inlined_call_operand.vmem [shape: f32[1,128], index: 2, kind: input, shape index: {}]   ;;  %s564_s3 = inlined_call_operand.vmem [shape: f32[4,128,128], index: 3, kind: output, shape index: {}]  }
   0x1   :  { %s472_s14 = smov 0  }
   0x2 LB: > { %s25_s15 = sadd.s32 1, %s442_s13  ;;  %p389_p0 = scmp.ge.s32.totalorder %s446_s14, 1  ;;  %s446_s14 = sphi %s472_s14, %s13_s14   ;;  %s442_s13 = sphi %s470_s13, %s566_s13   ;;  %s438_s12 = sphi %s468_s12, %s565_s12  }
   0x3   : > { %p27_p1 = scmp.ge.s32.totalorder %s25_s15, 4  ;;  %p158_p2 = scmp.lt.s32.totalorder %s446_s14, 5 }
   0x5   : > { %s568_s15 = smov (%p27_p1, %s25_s15), 0  ;;  %p159_p3 = pnand %p389_p0, %p158_p2 }
   0x6   : > { %p191_p4 = scmp.lt.s32.totalorder (!%p159_p3), %s438_s12, 3 }
   0x7   : > { %162 = sbr.rel (%p159_p3) target bundleno = 38 (0x26), region = 32 }
   0xc   : > { %s570_s12 = smov (!%p191_p4, %s438_s12), 3  ;;  %v422_v0 = vld [vmem:[%s562_s1] ss:$0 sm:$0xff] }
   0xd   : > { %s396_s18 = sshll.u32 %s570_s12, 7  ;;  %v497_v1 = vld [vmem:[%s563_s2] ss:$0 sm:$0xff] }
   0xe   : > { %s492_s21 = scalar_lea.vmem %s561_s0, %s396_s18  ;;  %s513_s26 = scalar_lea.vmem %s564_s3, %s396_s18 }
   0xf   : > { %v210_v2 = vld [vmem:[%s492_s21] sm:$0xff]  ;;  %v211_v3 = vld [vmem:[%s492_s21 + $0x8] sm:$0xff]  ;;  %v212_v4 = vld [vmem:[%s492_s21 + $0x10] sm:$0xff] }
  0x10   : > { %v230_v5 = vmul.f32 %v422_v0, %v210_v2  ;;  %v231_v6 = vmul.f32 %v422_v0, %v211_v3  ;;  %v232_v7 = vmul.f32 %v422_v0, %v212_v4  ;;  %v213_v8 = vld [vmem:[%s492_s21 + $0x18] sm:$0xff]  ;;  %v214_v9 = vld [vmem:[%s492_s21 + $0x20] sm:$0xff]  ;;  %v215_v10 = vld [vmem:[%s492_s21 + $0x28] sm:$0xff] }
  0x11   : > { %v233_v11 = vmul.f32 %v422_v0, %v213_v8  ;;  %v234_v12 = vmul.f32 %v422_v0, %v214_v9  ;;  %v235_v13 = vmul.f32 %v422_v0, %v215_v10  ;;  %v216_v14 = vld [vmem:[%s492_s21 + $0x30] sm:$0xff]  ;;  %v217_v15 = vld [vmem:[%s492_s21 + $0x38] sm:$0xff]  ;;  %v218_v24 = vld [vmem:[%s492_s21 + $0x40] sm:$0xff] }
  0x12   : > { %v250_v16 = vadd.f32 %v497_v1, %v230_v5  ;;  %v251_v17 = vadd.f32 %v497_v1, %v231_v6  ;;  %v252_v18 = vadd.f32 %v497_v1, %v232_v7  ;;  %v236_v19 = vmul.f32 %v422_v0, %v216_v14  ;;  %v219_v25 = vld [vmem:[%s492_s21 + $0x48] sm:$0xff]  ;;  %v220_v26 = vld [vmem:[%s492_s21 + $0x50] sm:$0xff]  ;;  %v221_v31 = vld [vmem:[%s492_s21 + $0x58] sm:$0xff] }
  0x13   : > { %v253_v20 = vadd.f32 %v497_v1, %v233_v11  ;;  %v254_v21 = vadd.f32 %v497_v1, %v234_v12  ;;  %v255_v22 = vadd.f32 %v497_v1, %v235_v13  ;;  %v237_v23 = vmul.f32 %v422_v0, %v217_v15  ;;  %v222_v32 = vld [vmem:[%s492_s21 + $0x60] sm:$0xff]  ;;  %v223_v33 = vld [vmem:[%s492_s21 + $0x68] sm:$0xff]  ;;  %v224_v37 = vld [vmem:[%s492_s21 + $0x70] sm:$0xff] }
  0x14   : > { %v266_v27 = vmax.f32 %v250_v16, 0.0  ;;  %v267_v28 = vmax.f32 %v251_v17, 0.0  ;;  %v268_v29 = vmax.f32 %v252_v18, 0.0  ;;  %v256_v30 = vadd.f32 %v497_v1, %v236_v19  ;;  %v225_v42 = vld [vmem:[%s492_s21 + $0x78] sm:$0xff] }
  0x15   : > { %v269_v34 = vmax.f32 %v253_v20, 0.0  ;;  %v270_v35 = vmax.f32 %v254_v21, 0.0  ;;  %v257_v36 = vadd.f32 %v497_v1, %v237_v23  ;;  %v271_v38 = vmax.f32 %v255_v22, 0.0 }
  0x16   : > { %282 = vst [vmem:[%s513_s26] sm:$0xff] %v266_v27  ;;  %v238_v39 = vmul.f32 %v422_v0, %v218_v24  ;;  %v239_v40 = vmul.f32 %v422_v0, %v219_v25  ;;  %v240_v41 = vmul.f32 %v422_v0, %v220_v26  ;;  %v272_v43 = vmax.f32 %v256_v30, 0.0 }
  0x17   : > { %283 = vst [vmem:[%s513_s26 + $0x8] sm:$0xff] %v267_v28  ;;  %v241_v44 = vmul.f32 %v422_v0, %v221_v31  ;;  %v242_v45 = vmul.f32 %v422_v0, %v222_v32  ;;  %v243_v46 = vmul.f32 %v422_v0, %v223_v33  ;;  %v244_v50 = vmul.f32 %v422_v0, %v224_v37 }
  0x18   : > { %284 = vst [vmem:[%s513_s26 + $0x10] sm:$0xff] %v268_v29  ;;  %v258_v47 = vadd.f32 %v497_v1, %v238_v39  ;;  %v259_v48 = vadd.f32 %v497_v1, %v239_v40  ;;  %v260_v49 = vadd.f32 %v497_v1, %v240_v41  ;;  %v273_v51 = vmax.f32 %v257_v36, 0.0 }
  0x19   : > { %285 = vst [vmem:[%s513_s26 + $0x18] sm:$0xff] %v269_v34  ;;  %v261_v52 = vadd.f32 %v497_v1, %v241_v44  ;;  %v245_v53 = vmul.f32 %v422_v0, %v225_v42  ;;  %v262_v55 = vadd.f32 %v497_v1, %v242_v45  ;;  %v263_v57 = vadd.f32 %v497_v1, %v243_v46 }
  0x1a   : > { %286 = vst [vmem:[%s513_s26 + $0x20] sm:$0xff] %v270_v35  ;;  %v274_v54 = vmax.f32 %v258_v47, 0.0  ;;  %v275_v56 = vmax.f32 %v259_v48, 0.0  ;;  %v276_v58 = vmax.f32 %v260_v49, 0.0  ;;  %v264_v59 = vadd.f32 %v497_v1, %v244_v50 }
  0x1b   : > { %287 = vst [vmem:[%s513_s26 + $0x28] sm:$0xff] %v271_v38  ;;  %v277_v60 = vmax.f32 %v261_v52, 0.0  ;;  %v265_v61 = vadd.f32 %v497_v1, %v245_v53  ;;  %v278_v62 = vmax.f32 %v262_v55, 0.0  ;;  %v279_v63 = vmax.f32 %v263_v57, 0.0 }
  0x1c   : > { %288 = vst [vmem:[%s513_s26 + $0x30] sm:$0xff] %v272_v43  ;;  %v280_v0 = vmax.f32 %v264_v59, 0.0 }
  0x1d   : > { %289 = vst [vmem:[%s513_s26 + $0x38] sm:$0xff] %v273_v51  ;;  %v281_v2 = vmax.f32 %v265_v61, 0.0 }
  0x1e   : > { %290 = vst [vmem:[%s513_s26 + $0x40] sm:$0xff] %v274_v54 }
  0x1f   : > { %291 = vst [vmem:[%s513_s26 + $0x48] sm:$0xff] %v275_v56 }
  0x20   : > { %292 = vst [vmem:[%s513_s26 + $0x50] sm:$0xff] %v276_v58 }
  0x21   : > { %293 = vst [vmem:[%s513_s26 + $0x58] sm:$0xff] %v277_v60 }
  0x22   : > { %294 = vst [vmem:[%s513_s26 + $0x60] sm:$0xff] %v278_v62 }
  0x23   : > { %295 = vst [vmem:[%s513_s26 + $0x68] sm:$0xff] %v279_v63 }
  0x24   : > { %296 = vst [vmem:[%s513_s26 + $0x70] sm:$0xff] %v280_v0 }
  0x25   : > { %297 = vst [vmem:[%s513_s26 + $0x78] sm:$0xff] %v281_v2 }
  0x26 PF: > { %s13_s14 = sadd.s32 1, %s446_s14   ;;  %s565_s12 = smov %s442_s13 }
  0x27   : > { %p10_p5 = scmp.ge.s32.totalorder %s13_s14, 6   ;;  %s566_s13 = smov %s568_s15 }
  0x29   :  { %12 = sbr.rel (!%p10_p5) target bundleno = 2 (0x2), region = 62 }

// kernel: generator_forward.15
= control target key start
LH: loop header
LB: loop body
LE: loop exit
PB: predicated region body
PF: predicated region fallthrough
CT: control target
= control target key end

     0   :  { %s1505_s15 = smov 0   ;;  %s1507_s16 = smov 0   ;;  %s1968_s0 = inlined_call_operand.vmem [shape: bf16[4,512,128], index: 0, kind: input, shape index: {}]   ;;  %s1969_s1 = inlined_call_operand.vmem [shape: bf16[4,128,128], index: 1, kind: input, shape index: {}]   ;;  %s1970_s2 = inlined_call_operand.vmem [shape: f32[4,512,128], index: 2, kind: output, shape index: {0}]   ;;  %s1971_s3 = inlined_call_operand.vmem [shape: f32[4,1,128], index: 3, kind: output, shape index: {1}]   ;;  %s1972_s4 = inlined_call_operand.vmem [shape: f32[4,1,128], index: 4, kind: output, shape index: {2}]  }
   0x1   :  { %s1509_s17 = smov 0  }
   0x2 LB: > { %s27_s18 = sadd.s32 1, %s1473_s16  ;;  %p1194_p0 = scmp.ge.s32.totalorder %s1477_s17, 1  ;;  %s1477_s17 = sphi %s1509_s17, %s15_s17   ;;  %s1473_s16 = sphi %s1507_s16, %s1974_s16   ;;  %s1469_s15 = sphi %s1505_s15, %s1973_s15  }
   0x3   : > { %p29_p1 = scmp.ge.s32.totalorder %s27_s18, 4  ;;  %p198_p2 = scmp.lt.s32.totalorder %s1477_s17, 5 }
   0x5   : > { %s1976_s18 = smov (%p29_p1, %s27_s18), 0  ;;  %p199_p3 = pnand %p1194_p0, %p198_p2 }
   0x6   : > { %p244_p4 = scmp.lt.s32.totalorder (!%p199_p3), %s1469_s15, 3 }
   0x7   : > { %202 = sbr.rel (%p199_p3) target bundleno = 408 (0x198), region = 28 }
   0xc   : > { %s1978_s15 = smov (!%p244_p4, %s1469_s15), 3 }
   0xd   : > { %s1364_s19 = sshll.u32 %s1978_s15, 6  ;;  %s1363_s23 = sshll.u32 %s1978_s15, 8 }
   0xe   : > { %s1529_s22 = scalar_lea.vmem %s1969_s1, %s1364_s19  ;;  %s1542_s26 = scalar_lea.vmem %s1968_s0, %s1363_s23 }
   0xf   : > { %v1405_v0 = vld [vmem:[%s1529_s22 + $0x38] sm:$0xff]  ;;  %v1404_v1 = vld [vmem:[%s1529_s22 + $0x30] sm:$0xff]  ;;  %v1403_v2 = vld [vmem:[%s1529_s22 + $0x28] sm:$0xff]  ;;  %s1365_s27 = sshll.u32 %s1978_s15, 9  ;;  %s1894_s7 = scalar_lea.vmem %s1971_s3, %s1978_s15 }
  0x10   : > { %600 = vmatpush.bf16.msra.mxu0 %v1405_v0  ;;  %1406 = vmatpush.bf16.msra.mxu1 %v1405_v0  ;;  %v1402_v3 = vld [vmem:[%s1529_s22 + $0x20] sm:$0xff]  ;;  %v1401_v4 = vld [vmem:[%s1529_s22 + $0x18] sm:$0xff]  ;;  %v1400_v5 = vld [vmem:[%s1529_s22 + $0x10] sm:$0xff]  ;;  %s1577_s30 = scalar_lea.vmem %s1970_s2, %s1365_s27  ;;  %s1900_s10 = scalar_lea.vmem %s1972_s4, %s1978_s15 }
  0x11   : > { %1407 = vmatpush.bf16.msra.mxu2 %v1405_v0  ;;  %1408 = vmatpush.bf16.msra.mxu3 %v1405_v0  ;;  %v1399_v6 = vld [vmem:[%s1529_s22 + $0x8] sm:$0xff]  ;;  %v1398_v7 = vld [vmem:[%s1529_s22] sm:$0xff]  ;;  %v1368_v13 = vld [vmem:[%s1542_s26 + $0x10] sm:$0xff] }
  0x12   : > { %v1366_v8 = vld [vmem:[%s1542_s26] sm:$0xff]  ;;  %v1367_v10 = vld [vmem:[%s1542_s26 + $0x8] sm:$0xff]  ;;  %v1376_v14 = vld [vmem:[%s1542_s26 + $0x50] sm:$0xff] }
  0x13   : > { %v1374_v9 = vld [vmem:[%s1542_s26 + $0x40] sm:$0xff]  ;;  %v1375_v11 = vld [vmem:[%s1542_s26 + $0x48] sm:$0xff]  ;;  %v1369_v16 = vld [vmem:[%s1542_s26 + $0x18] sm:$0xff] }
  0x14   : > { %601 = vmatpush.bf16.msra.mxu0 %v1404_v1  ;;  %1409 = vmatpush.bf16.msra.mxu1 %v1404_v1  ;;  %v1382_v12 = vld [vmem:[%s1542_s26 + $0x80] sm:$0xff]  ;;  %v1383_v15 = vld [vmem:[%s1542_s26 + $0x88] sm:$0xff]  ;;  %v1377_v17 = vld [vmem:[%s1542_s26 + $0x58] sm:$0xff] }
  0x15   : > { %1410 = vmatpush.bf16.msra.mxu2 %v1404_v1  ;;  %1411 = vmatpush.bf16.msra.mxu3 %v1404_v1  ;;  %v1384_v18 = vld [vmem:[%s1542_s26 + $0x90] sm:$0xff]  ;;  %v1390_v19 = vld [vmem:[%s1542_s26 + $0xc0] sm:$0xff]  ;;  %v1385_v22 = vld [vmem:[%s1542_s26 + $0x98] sm:$0xff] }
  0x16   : > { %v1370_v20 = vld [vmem:[%s1542_s26 + $0x20] sm:$0xff]  ;;  %v1391_v23 = vld [vmem:[%s1542_s26 + $0xc8] sm:$0xff]  ;;  %v1392_v27 = vld [vmem:[%s1542_s26 + $0xd0] sm:$0xff] }
  0x17   : > { %v1378_v21 = vld [vmem:[%s1542_s26 + $0x60] sm:$0xff]  ;;  %v1371_v24 = vld [vmem:[%s1542_s26 + $0x28] sm:$0xff]  ;;  %v1372_v28 = vld [vmem:[%s1542_s26 + $0x30] sm:$0xff] }
  0x18   : > { %602 = vmatpush.bf16.msra.mxu0 %v1403_v2  ;;  %1412 = vmatpush.bf16.msra.mxu1 %v1403_v2  ;;  %v1379_v25 = vld [vmem:[%s1542_s26 + $0x68] sm:$0xff]  ;;  %v1386_v26 = vld [vmem:[%s1542_s26 + $0xa0] sm:$0xff]  ;;  %v1380_v29 = vld [vmem:[%s1542_s26 + $0x70] sm:$0xff] }
  0x19   : > { %1413 = vmatpush.bf16.msra.mxu2 %v1403_v2  ;;  %1414 = vmatpush.bf16.msra.mxu3 %v1403_v2  ;;  %v1387_v30 = vld [vmem:[%s1542_s26 + $0xa8] sm:$0xff]  ;;  %v1393_v31 = vld [vmem:[%s1542_s26 + $0xd8] sm:$0xff]  ;;  %v1388_v34 = vld [vmem:[%s1542_s26 + $0xb0] sm:$0xff] }
  0x1a   : > { %v1373_v32 = vld [vmem:[%s1542_s26 + $0x38] sm:$0xff]  ;;  %v1394_v35 = vld [vmem:[%s1542_s26 + $0xe0] sm:$0xff]  ;;  %v1395_v39 = vld [vmem:[%s1542_s26 + $0xe8] sm:$0xff] }
  0x1b   : > { %v1381_v33 = vld [vmem:[%s1542_s26 + $0x78] sm:$0xff]  ;;  %v1396_v51 = vld [vmem:[%s1542_s26 + $0xf0] sm:$0xff] }
  0x1c   : > { %603 = vmatpush.bf16.msra.mxu0 %v1402_v3  ;;  %1415 = vmatpush.bf16.msra.mxu1 %v1402_v3  ;;  %v1389_v38 = vld [vmem:[%s1542_s26 + $0xb8] sm:$0xff] }
  0x1d   : > { %1416 = vmatpush.bf16.msra.mxu2 %v1402_v3  ;;  %1417 = vmatpush.bf16.msra.mxu3 %v1402_v3  ;;  %v1397_v0 = vld [vmem:[%s1542_s26 + $0xf8] sm:$0xff] }
  0x20   : > { %604 = vmatpush.bf16.msra.mxu0 %v1401_v4  ;;  %1418 = vmatpush.bf16.msra.mxu1 %v1401_v4 }
  0x21   : > { %1419 = vmatpush.bf16.msra.mxu2 %v1401_v4  ;;  %1420 = vmatpush.bf16.msra.mxu3 %v1401_v4 }
  0x24   : > { %605 = vmatpush.bf16.msra.mxu0 %v1400_v5  ;;  %1421 = vmatpush.bf16.msra.mxu1 %v1400_v5 }
  0x25   : > { %1422 = vmatpush.bf16.msra.mxu2 %v1400_v5  ;;  %1423 = vmatpush.bf16.msra.mxu3 %v1400_v5 }
  0x28   : > { %606 = vmatpush.bf16.msra.mxu0 %v1399_v6  ;;  %1424 = vmatpush.bf16.msra.mxu1 %v1399_v6 }
  0x29   : > { %1425 = vmatpush.bf16.msra.mxu2 %v1399_v6  ;;  %1426 = vmatpush.bf16.msra.mxu3 %v1399_v6 }
  0x2c   : > { %607 = vmatpush.bf16.msra.mxu0 %v1398_v7  ;;  %1427 = vmatpush.bf16.msra.mxu1 %v1398_v7 }
  0x2d   : > { %1428 = vmatpush.bf16.msra.mxu2 %v1398_v7  ;;  %1429 = vmatpush.bf16.msra.mxu3 %v1398_v7 }
  0x2f   : > { %608 = vmatmul.bf16.vlgmr.msra.gmra.mxu0 %v1366_v8  ;;  %648 = vmatmul.bf16.vlgmr.msra.gmra.mxu1 %v1374_v9 }
  0x30   : > { %688 = vmatmul.bf16.vlgmr.msra.gmra.mxu2 %v1382_v12  ;;  %728 = vmatmul.bf16.vlgmr.msra.gmra.mxu3 %v1390_v19 }
  0x3f   : > { %613 = vmatmul.bf16.gmra.mxu0 %v1367_v10  ;;  %653 = vmatmul.bf16.gmra.mxu1 %v1375_v11 }
  0x40   : > { %693 = vmatmul.bf16.gmra.mxu2 %v1383_v15  ;;  %733 = vmatmul.bf16.gmra.mxu3 %v1391_v23 }
  0x4f   : > { %618 = vmatmul.bf16.gmra.mxu0 %v1368_v13  ;;  %658 = vmatmul.bf16.gmra.mxu1 %v1376_v14 }
  0x50   : > { %698 = vmatmul.bf16.gmra.mxu2 %v1384_v18  ;;  %738 = vmatmul.bf16.gmra.mxu3 %v1392_v27 }
  0x5f   : > { %623 = vmatmul.bf16.gmra.mxu0 %v1369_v16  ;;  %663 = vmatmul.bf16.gmra.mxu1 %v1377_v17 }
  0x60   : > { %703 = vmatmul.bf16.gmra.mxu2 %v1385_v22  ;;  %743 = vmatmul.bf16.gmra.mxu3 %v1393_v31 }
  0x6f   : > { %628 = vmatmul.bf16.gmra.mxu0 %v1370_v20  ;;  %668 = vmatmul.bf16.gmra.mxu1 %v1378_v21 }
  0x70   : > { %708 = vmatmul.bf16.gmra.mxu2 %v1386_v26  ;;  %748 = vmatmul.bf16.gmra.mxu3 %v1394_v35 }
  0x7f   : > { %633 = vmatmul.bf16.gmra.mxu0 %v1371_v24  ;;  %673 = vmatmul.bf16.gmra.mxu1 %v1379_v25 }
  0x80   : > { %713 = vmatmul.bf16.gmra.mxu2 %v1387_v30  ;;  %753 = vmatmul.bf16.gmra.mxu3 %v1395_v39 }
  0x8f   : > { %638 = vmatmul.bf16.gmra.mxu0 %v1372_v28  ;;  %678 = vmatmul.bf16.gmra.mxu1 %v1380_v29 }
  0x90   : > { %718 = vmatmul.bf16.gmra.mxu2 %v1388_v34  ;;  %758 = vmatmul.bf16.gmra.mxu3 %v1396_v51 }
  0x9f   : > { %643 = vmatmul.bf16.gmra.mxu0 %v1373_v32  ;;  %683 = vmatmul.bf16.gmra.mxu1 %v1381_v33 }
  0xa0   : > { %723 = vmatmul.bf16.gmra.mxu2 %v1389_v38  ;;  %763 = vmatmul.bf16.gmra.mxu3 %v1397_v0 }
  0xac   : > { %v609_v36 = vpop.f32.mrf.mxu0  ;;  %v1579_v37 = vpop.f32.mrf.mxu1 }
  0xad   : > { %977 = vst [vmem:[%s1577_s30] sm:$0xff] %v609_v36  ;;  %v842_v42 = vmul.f32 %v609_v36, %v609_v36 }
  0xae   : > { %993 = vst [vmem:[%s1577_s30 + $0x80] sm:$0xff] %v1579_v37 }
  0xb3   : > { %v1600_v56 = vpop.f32.mrf.mxu2  ;;  %v1643_v10 = vpop.f32.mrf.mxu3 }
  0xb4   : > { %v611_v40 = vpop.f32.mrf.mxu0  ;;  %v1586_v41 = vpop.f32.mrf.mxu1  ;;  %1009 = vst [vmem:[%s1577_s30 + $0x100] sm:$0xff] %v1600_v56 }
  0xb5   : > { %v770_v43 = vadd.f32 %v611_v40, %v609_v36  ;;  %v843_v44 = vmul.f32 %v611_v40, %v611_v40  ;;  %978 = vst [vmem:[%s1577_s30 + $0x8] sm:$0xff] %v611_v40 }
  0xb6   : > { %994 = vst [vmem:[%s1577_s30 + $0x88] sm:$0xff] %v1586_v41 }
  0xb7   : > { %v906_v45 = vadd.f32 %v843_v44, %v842_v42  ;;  %1025 = vst [vmem:[%s1577_s30 + $0x180] sm:$0xff] %v1643_v10 }
  0xbb   : > { %v1611_v62 = vpop.f32.mrf.mxu2  ;;  %v1656_v14 = vpop.f32.mrf.mxu3 }
  0xbc   : > { %v614_v46 = vpop.f32.mrf.mxu0  ;;  %v1591_v47 = vpop.f32.mrf.mxu1  ;;  %1010 = vst [vmem:[%s1577_s30 + $0x108] sm:$0xff] %v1611_v62 }
  0xbd   : > { %v771_v48 = vadd.f32 %v770_v43, %v614_v46  ;;  %v844_v49 = vmul.f32 %v614_v46, %v614_v46  ;;  %979 = vst [vmem:[%s1577_s30 + $0x10] sm:$0xff] %v614_v46 }
  0xbe   : > { %995 = vst [vmem:[%s1577_s30 + $0x90] sm:$0xff] %v1591_v47 }
  0xbf   : > { %v907_v50 = vadd.f32 %v906_v45, %v844_v49  ;;  %1026 = vst [vmem:[%s1577_s30 + $0x188] sm:$0xff] %v1656_v14 }
  0xc3   : > { %v1623_v3 = vpop.f32.mrf.mxu2  ;;  %v1669_v18 = vpop.f32.mrf.mxu3 }
  0xc4   : > { %v616_v52 = vpop.f32.mrf.mxu0  ;;  %v1597_v53 = vpop.f32.mrf.mxu1  ;;  %1011 = vst [vmem:[%s1577_s30 + $0x110] sm:$0xff] %v1623_v3 }
  0xc5   : > { %v772_v54 = vadd.f32 %v771_v48, %v616_v52  ;;  %v845_v55 = vmul.f32 %v616_v52, %v616_v52  ;;  %980 = vst [vmem:[%s1577_s30 + $0x18] sm:$0xff] %v616_v52 }
  0xc6   : > { %996 = vst [vmem:[%s1577_s30 + $0x98] sm:$0xff] %v1597_v53 }
  0xc7   : > { %v908_v57 = vadd.f32 %v907_v50, %v845_v55  ;;  %1027 = vst [vmem:[%s1577_s30 + $0x190] sm:$0xff] %v1669_v18 }
  0xcb   : > { %v1632_v6 = vpop.f32.mrf.mxu2  ;;  %v1682_v22 = vpop.f32.mrf.mxu3 }
  0xcc   : > { %v619_v58 = vpop.f32.mrf.mxu0  ;;  %v1606_v59 = vpop.f32.mrf.mxu1  ;;  %1012 = vst [vmem:[%s1577_s30 + $0x118] sm:$0xff] %v1632_v6 }
  0xcd   : > { %v1608_v60 = vadd.f32 %v772_v54, %v619_v58  ;;  %v846_v61 = vmul.f32 %v619_v58, %v619_v58  ;;  %981 = vst [vmem:[%s1577_s30 + $0x20] sm:$0xff] %v619_v58 }
  0xce   : > { %997 = vst [vmem:[%s1577_s30 + $0xa0] sm:$0xff] %v1606_v59 }
  0xcf   : > { %v1615_v63 = vadd.f32 %v908_v57, %v846_v61  ;;  %1028 = vst [vmem:[%s1577_s30 + $0x198] sm:$0xff] %v1682_v22 }
  0xd3   : > { %v1641_v9 = vpop.f32.mrf.mxu2  ;;  %v1695_v26 = vpop.f32.mrf.mxu3 }
  0xd4   : > { %v621_v1 = vpop.f32.mrf.mxu0  ;;  %v1620_v2 = vpop.f32.mrf.mxu1  ;;  %1013 = vst [vmem:[%s1577_s30 + $0x120] sm:$0xff] %v1641_v9 }
  0xd5   : > { %982 = vst [vmem:[%s1577_s30 + $0x28] sm:$0xff] %v621_v1  ;;  %v847_v31 = vmul.f32 %v621_v1, %v621_v1  ;;  %v774_v32 = vadd.f32 %v1608_v60, %v621_v1 }
  0xd6   : > { %998 = vst [vmem:[%s1577_s30 + $0xa8] sm:$0xff] %v1620_v2 }
  0xd7   : > { %1029 = vst [vmem:[%s1577_s30 + $0x1a0] sm:$0xff] %v1695_v26  ;;  %v910_v34 = vadd.f32 %v1615_v63, %v847_v31 }
  0xdb   : > { %v1654_v13 = vpop.f32.mrf.mxu2  ;;  %v1708_v30 = vpop.f32.mrf.mxu3 }
  0xdc   : > { %v624_v4 = vpop.f32.mrf.mxu0  ;;  %v1629_v5 = vpop.f32.mrf.mxu1  ;;  %1014 = vst [vmem:[%s1577_s30 + $0x128] sm:$0xff] %v1654_v13 }
  0xdd   : > { %983 = vst [vmem:[%s1577_s30 + $0x30] sm:$0xff] %v624_v4  ;;  %v848_v33 = vmul.f32 %v624_v4, %v624_v4  ;;  %v775_v35 = vadd.f32 %v774_v32, %v624_v4 }
  0xde   : > { %999 = vst [vmem:[%s1577_s30 + $0xb0] sm:$0xff] %v1629_v5 }
  0xdf   : > { %1030 = vst [vmem:[%s1577_s30 + $0x1a8] sm:$0xff] %v1708_v30  ;;  %v911_v40 = vadd.f32 %v910_v34, %v848_v33 }
  0xe3   : > { %v1667_v17 = vpop.f32.mrf.mxu2  ;;  %v1723_v45 = vpop.f32.mrf.mxu3 }
  0xe4   : > { %v626_v7 = vpop.f32.mrf.mxu0  ;;  %v1638_v8 = vpop.f32.mrf.mxu1  ;;  %1015 = vst [vmem:[%s1577_s30 + $0x130] sm:$0xff] %v1667_v17 }
  0xe5   : > { %984 = vst [vmem:[%s1577_s30 + $0x38] sm:$0xff] %v626_v7  ;;  %v849_v36 = vmul.f32 %v626_v7, %v626_v7  ;;  %v776_v42 = vadd.f32 %v775_v35, %v626_v7 }
  0xe6   : > { %1000 = vst [vmem:[%s1577_s30 + $0xb8] sm:$0xff] %v1638_v8 }
  0xe7   : > { %v912_v46 = vadd.f32 %v911_v40, %v849_v36  ;;  %1031 = vst [vmem:[%s1577_s30 + $0x1b0] sm:$0xff] %v1723_v45 }
  0xeb   : > { %v1680_v21 = vpop.f32.mrf.mxu2  ;;  %v1736_v4 = vpop.f32.mrf.mxu3 }
  0xec   : > { %v629_v11 = vpop.f32.mrf.mxu0  ;;  %v1651_v12 = vpop.f32.mrf.mxu1  ;;  %1016 = vst [vmem:[%s1577_s30 + $0x138] sm:$0xff] %v1680_v21 }
  0xed   : > { %985 = vst [vmem:[%s1577_s30 + $0x40] sm:$0xff] %v629_v11  ;;  %v850_v43 = vmul.f32 %v629_v11, %v629_v11  ;;  %v777_v48 = vadd.f32 %v776_v42, %v629_v11 }
  0xee   : > { %1001 = vst [vmem:[%s1577_s30 + $0xc0] sm:$0xff] %v1651_v12 }
  0xef   : > { %v913_v50 = vadd.f32 %v912_v46, %v850_v43  ;;  %1032 = vst [vmem:[%s1577_s30 + $0x1b8] sm:$0xff] %v1736_v4 }
  0xf3   : > { %v1693_v25 = vpop.f32.mrf.mxu2  ;;  %v1749_v43 = vpop.f32.mrf.mxu3 }
  0xf4   : > { %v631_v15 = vpop.f32.mrf.mxu0  ;;  %v1664_v16 = vpop.f32.mrf.mxu1  ;;  %1017 = vst [vmem:[%s1577_s30 + $0x140] sm:$0xff] %v1693_v25 }
  0xf5   : > { %986 = vst [vmem:[%s1577_s30 + $0x48] sm:$0xff] %v631_v15  ;;  %v851_v49 = vmul.f32 %v631_v15, %v631_v15  ;;  %v778_v51 = vadd.f32 %v777_v48, %v631_v15 }
  0xf6   : > { %1002 = vst [vmem:[%s1577_s30 + $0xc8] sm:$0xff] %v1664_v16 }
  0xf7   : > { %v914_v54 = vadd.f32 %v913_v50, %v851_v49  ;;  %1033 = vst [vmem:[%s1577_s30 + $0x1c0] sm:$0xff] %v1749_v43  ;;  %v859_v49 = vmul.f32 %v1586_v41, %v1586_v41 }
  0xfb   : > { %v1706_v29 = vpop.f32.mrf.mxu2 }
  0xfc   : > { %v634_v19 = vpop.f32.mrf.mxu0  ;;  %v1677_v20 = vpop.f32.mrf.mxu1  ;;  %1018 = vst [vmem:[%s1577_s30 + $0x148] sm:$0xff] %v1706_v29 }
  0xfd   : > { %987 = vst [vmem:[%s1577_s30 + $0x50] sm:$0xff] %v634_v19  ;;  %v852_v52 = vmul.f32 %v634_v19, %v634_v19  ;;  %v779_v55 = vadd.f32 %v778_v51, %v634_v19 }
  0xfe   : > { %1003 = vst [vmem:[%s1577_s30 + $0xd0] sm:$0xff] %v1677_v20 }
  0xff   : > { %v915_v61 = vadd.f32 %v914_v54, %v852_v52  ;;  %v860_v52 = vmul.f32 %v1591_v47, %v1591_v47 }
 0x103   : > { %v1721_v44 = vpop.f32.mrf.mxu2 }
 0x104   : > { %v636_v23 = vpop.f32.mrf.mxu0  ;;  %v1690_v24 = vpop.f32.mrf.mxu1  ;;  %1019 = vst [vmem:[%s1577_s30 + $0x150] sm:$0xff] %v1721_v44 }
 0x105   : > { %988 = vst [vmem:[%s1577_s30 + $0x58] sm:$0xff] %v636_v23  ;;  %v853_v57 = vmul.f32 %v636_v23, %v636_v23  ;;  %v780_v63 = vadd.f32 %v779_v55, %v636_v23 }
 0x106   : > { %1004 = vst [vmem:[%s1577_s30 + $0xd8] sm:$0xff] %v1690_v24 }
 0x107   : > { %v916_v7 = vadd.f32 %v915_v61, %v853_v57 }
 0x10b   : > { %v1734_v1 = vpop.f32.mrf.mxu2 }
 0x10c   : > { %v639_v27 = vpop.f32.mrf.mxu0  ;;  %v1703_v28 = vpop.f32.mrf.mxu1  ;;  %1020 = vst [vmem:[%s1577_s30 + $0x158] sm:$0xff] %v1734_v1 }
 0x10d   : > { %989 = vst [vmem:[%s1577_s30 + $0x60] sm:$0xff] %v639_v27  ;;  %v854_v0 = vmul.f32 %v639_v27, %v639_v27  ;;  %v781_v11 = vadd.f32 %v780_v63, %v639_v27  ;;  %v1771_v63 = vpop.f32.mrf.mxu3 }
 0x10e   : > { %1005 = vst [vmem:[%s1577_s30 + $0xe0] sm:$0xff] %v1703_v28 }
 0x10f   : > { %v917_v19 = vadd.f32 %v916_v7, %v854_v0  ;;  %1034 = vst [vmem:[%s1577_s30 + $0x1c8] sm:$0xff] %v1771_v63 }
 0x113   : > { %v1747_v27 = vpop.f32.mrf.mxu2 }
 0x114   : > { %v641_v38 = vpop.f32.mrf.mxu0  ;;  %v1718_v39 = vpop.f32.mrf.mxu1  ;;  %1021 = vst [vmem:[%s1577_s30 + $0x160] sm:$0xff] %v1747_v27 }
 0x115   : > { %990 = vst [vmem:[%s1577_s30 + $0x68] sm:$0xff] %v641_v38  ;;  %v855_v15 = vmul.f32 %v641_v38, %v641_v38  ;;  %v782_v31 = vadd.f32 %v781_v11, %v641_v38  ;;  %v858_v38 = vmul.f32 %v1579_v37, %v1579_v37 }
 0x116   : > { %1006 = vst [vmem:[%s1577_s30 + $0xe8] sm:$0xff] %v1718_v39 }
 0x117   : > { %v918_v32 = vadd.f32 %v917_v19, %v855_v15  ;;  %v864_v15 = vmul.f32 %v1629_v5, %v1629_v5 }
 0x11b   : > { %v1769_v61 = vpop.f32.mrf.mxu2 }
 0x11c   : > { %v644_v58 = vpop.f32.mrf.mxu0  ;;  %v1731_v60 = vpop.f32.mrf.mxu1  ;;  %1022 = vst [vmem:[%s1577_s30 + $0x168] sm:$0xff] %v1769_v61 }
 0x11d   : > { %991 = vst [vmem:[%s1577_s30 + $0x70] sm:$0xff] %v644_v58  ;;  %v856_v23 = vmul.f32 %v644_v58, %v644_v58  ;;  %v783_v33 = vadd.f32 %v782_v31, %v644_v58 }
 0x11e   : > { %1007 = vst [vmem:[%s1577_s30 + $0xf0] sm:$0xff] %v1731_v60 }
 0x11f   : > { %v919_v36 = vadd.f32 %v918_v32, %v856_v23  ;;  %v865_v23 = vmul.f32 %v1638_v8, %v1638_v8 }
 0x124   : > { %v646_v34 = vpop.f32.mrf.mxu0  ;;  %v1744_v35 = vpop.f32.mrf.mxu1 }
 0x125   : > { %v784_v40 = vadd.f32 %v783_v33, %v646_v34  ;;  %v857_v42 = vmul.f32 %v646_v34, %v646_v34  ;;  %992 = vst [vmem:[%s1577_s30 + $0x78] sm:$0xff] %v646_v34  ;;  %v1789_v33 = vpop.f32.mrf.mxu2  ;;  %v1791_v34 = vpop.f32.mrf.mxu3 }
 0x126   : > { %1008 = vst [vmem:[%s1577_s30 + $0xf8] sm:$0xff] %v1744_v35 }
 0x127   : > { %v785_v46 = vadd.f32 %v784_v40, %v1579_v37  ;;  %v920_v48 = vadd.f32 %v919_v36, %v857_v42  ;;  %v861_v37 = vmul.f32 %v1597_v53, %v1597_v53  ;;  %1023 = vst [vmem:[%s1577_s30 + $0x170] sm:$0xff] %v1789_v33 }
 0x128   : > { %1035 = vst [vmem:[%s1577_s30 + $0x1d0] sm:$0xff] %v1791_v34 }
 0x129   : > { %v786_v50 = vadd.f32 %v785_v46, %v1586_v41  ;;  %v921_v51 = vadd.f32 %v920_v48, %v858_v38  ;;  %v862_v41 = vmul.f32 %v1606_v59, %v1606_v59  ;;  %v868_v38 = vmul.f32 %v1677_v20, %v1677_v20 }
 0x12b   : > { %v787_v54 = vadd.f32 %v786_v50, %v1591_v47  ;;  %v922_v55 = vadd.f32 %v921_v51, %v859_v49  ;;  %v869_v49 = vmul.f32 %v1690_v24, %v1690_v24 }
 0x12d   : > { %v788_v57 = vadd.f32 %v787_v54, %v1597_v53  ;;  %v923_v58 = vadd.f32 %v922_v55, %v860_v52  ;;  %v863_v53 = vmul.f32 %v1620_v2, %v1620_v2  ;;  %v1809_v51 = vpop.f32.mrf.mxu2  ;;  %v1811_v52 = vpop.f32.mrf.mxu3  ;;  %v870_v54 = vmul.f32 %v1703_v28, %v1703_v28 }
 0x12e   : > { %1024 = vst [vmem:[%s1577_s30 + $0x178] sm:$0xff] %v1809_v51 }
 0x12f   : > { %v789_v0 = vadd.f32 %v788_v57, %v1606_v59  ;;  %v924_v47 = vadd.f32 %v923_v58, %v861_v37  ;;  %1036 = vst [vmem:[%s1577_s30 + $0x1d8] sm:$0xff] %v1811_v52 }
 0x131   : > { %v790_v7 = vadd.f32 %v789_v0, %v1620_v2  ;;  %v925_v11 = vadd.f32 %v924_v47, %v862_v41  ;;  %v866_v2 = vmul.f32 %v1651_v12, %v1651_v12  ;;  %v872_v41 = vmul.f32 %v1731_v60, %v1731_v60 }
 0x133   : > { %v926_v19 = vadd.f32 %v925_v11, %v863_v53  ;;  %v791_v31 = vadd.f32 %v790_v7, %v1629_v5  ;;  %v867_v5 = vmul.f32 %v1664_v16, %v1664_v16 }
 0x135   : > { %v792_v59 = vadd.f32 %v791_v31, %v1638_v8  ;;  %v927_v32 = vadd.f32 %v926_v19, %v864_v15  ;;  %v1829_v53 = vpop.f32.mrf.mxu3 }
 0x136   : > { %1037 = vst [vmem:[%s1577_s30 + $0x1e0] sm:$0xff] %v1829_v53 }
 0x137   : > { %v793_v36 = vadd.f32 %v792_v59, %v1651_v12  ;;  %v928_v40 = vadd.f32 %v927_v32, %v865_v23  ;;  %v877_v59 = vmul.f32 %v1632_v6, %v1632_v6 }
 0x139   : > { %v794_v8 = vadd.f32 %v793_v36, %v1664_v16  ;;  %v929_v42 = vadd.f32 %v928_v40, %v866_v2 }
 0x13b   : > { %v795_v46 = vadd.f32 %v794_v8, %v1677_v20  ;;  %v930_v48 = vadd.f32 %v929_v42, %v867_v5 }
 0x13d   : > { %v796_v12 = vadd.f32 %v795_v46, %v1690_v24  ;;  %v931_v50 = vadd.f32 %v930_v48, %v868_v38  ;;  %v871_v24 = vmul.f32 %v1718_v39, %v1718_v39  ;;  %v881_v46 = vmul.f32 %v1680_v21, %v1680_v21 }
 0x13f   : > { %v797_v16 = vadd.f32 %v796_v12, %v1703_v28  ;;  %v932_v20 = vadd.f32 %v931_v50, %v869_v49  ;;  %v873_v28 = vmul.f32 %v1744_v35, %v1744_v35 }
 0x141   : > { %v933_v55 = vadd.f32 %v932_v20, %v870_v54  ;;  %v798_v37 = vadd.f32 %v797_v16, %v1718_v39  ;;  %v874_v39 = vmul.f32 %v1600_v56, %v1600_v56 }
 0x143   : > { %v934_v57 = vadd.f32 %v933_v55, %v871_v24  ;;  %v799_v58 = vadd.f32 %v798_v37, %v1731_v60  ;;  %v875_v60 = vmul.f32 %v1611_v62, %v1611_v62 }
 0x145   : > { %v935_v0 = vadd.f32 %v934_v57, %v872_v41  ;;  %v800_v47 = vadd.f32 %v799_v58, %v1744_v35  ;;  %v876_v35 = vmul.f32 %v1623_v3, %v1623_v3  ;;  %v886_v41 = vmul.f32 %v1747_v27, %v1747_v27 }
 0x147   : > { %v801_v7 = vadd.f32 %v800_v47, %v1600_v56  ;;  %v936_v11 = vadd.f32 %v935_v0, %v873_v28  ;;  %v1845_v56 = vpop.f32.mrf.mxu3  ;;  %v887_v47 = vmul.f32 %v1769_v61, %v1769_v61 }
 0x148   : > { %1038 = vst [vmem:[%s1577_s30 + $0x1e8] sm:$0xff] %v1845_v56 }
 0x149   : > { %v802_v15 = vadd.f32 %v801_v7, %v1611_v62  ;;  %v937_v19 = vadd.f32 %v936_v11, %v874_v39  ;;  %v878_v62 = vmul.f32 %v1641_v9, %v1641_v9  ;;  %v888_v39 = vmul.f32 %v1789_v33, %v1789_v33 }
 0x14a   : > { %v889_v7 = vmul.f32 %v1809_v51, %v1809_v51  ;;  %v1479_v11 = vmov 0.0  }
 0x14b   : > { %v803_v31 = vadd.f32 %v802_v15, %v1623_v3  ;;  %v938_v23 = vadd.f32 %v937_v19, %v875_v60  ;;  %v879_v3 = vmul.f32 %v1654_v13, %v1654_v13  ;;  %278 = vst [vmem:[%s1894_s7] sm:$0x1] %v1479_v11  ;;  %v891_v19 = vmul.f32 %v1656_v14, %v1656_v14 }
 0x14c   : > { %279 = vst [vmem:[%s1900_s10] sm:$0x1] %v1479_v11 }
 0x14d   : > { %v804_v32 = vadd.f32 %v803_v31, %v1632_v6  ;;  %v939_v2 = vadd.f32 %v938_v23, %v876_v35  ;;  %v880_v6 = vmul.f32 %v1667_v17, %v1667_v17  ;;  %v892_v23 = vmul.f32 %v1669_v18, %v1669_v18 }
 0x14f   : > { %v805_v36 = vadd.f32 %v804_v32, %v1641_v9  ;;  %v940_v40 = vadd.f32 %v939_v2, %v877_v59  ;;  %v1861_v9 = vpop.f32.mrf.mxu3  ;;  %v893_v32 = vmul.f32 %v1682_v22, %v1682_v22 }
 0x150   : > { %1039 = vst [vmem:[%s1577_s30 + $0x1f0] sm:$0xff] %v1861_v9 }
 0x151   : > { %v806_v5 = vadd.f32 %v805_v36, %v1654_v13  ;;  %v941_v8 = vadd.f32 %v940_v40, %v878_v62  ;;  %v882_v13 = vmul.f32 %v1693_v25, %v1693_v25  ;;  %v894_v62 = vmul.f32 %v1695_v26, %v1695_v26 }
 0x153   : > { %v942_v42 = vadd.f32 %v941_v8, %v879_v3  ;;  %v807_v38 = vadd.f32 %v806_v5, %v1667_v17  ;;  %v883_v17 = vmul.f32 %v1706_v29, %v1706_v29 }
 0x155   : > { %v808_v48 = vadd.f32 %v807_v38, %v1680_v21  ;;  %v943_v49 = vadd.f32 %v942_v42, %v880_v6  ;;  %v884_v21 = vmul.f32 %v1721_v44, %v1721_v44 }
 0x157   : > { %v809_v12 = vadd.f32 %v808_v48, %v1693_v25  ;;  %v944_v50 = vadd.f32 %v943_v49, %v881_v46  ;;  %v885_v25 = vmul.f32 %v1734_v1, %v1734_v1  ;;  %v1877_v57 = vpop.f32.mrf.mxu3 }
 0x158   : > { %1040 = vst [vmem:[%s1577_s30 + $0x1f8] sm:$0xff] %v1877_v57 }
 0x159   : > { %v810_v16 = vadd.f32 %v809_v12, %v1706_v29  ;;  %v945_v54 = vadd.f32 %v944_v50, %v882_v13 }
 0x15b   : > { %v811_v20 = vadd.f32 %v810_v16, %v1721_v44  ;;  %v946_v55 = vadd.f32 %v945_v54, %v883_v17  ;;  %v901_v17 = vmul.f32 %v1811_v52, %v1811_v52 }
 0x15d   : > { %v812_v37 = vadd.f32 %v811_v20, %v1734_v1  ;;  %v947_v24 = vadd.f32 %v946_v55, %v884_v21  ;;  %v902_v21 = vmul.f32 %v1829_v53, %v1829_v53  ;;  %v903_v55 = vmul.f32 %v1845_v56, %v1845_v56 }
 0x15f   : > { %v948_v29 = vadd.f32 %v947_v24, %v885_v25  ;;  %v813_v58 = vadd.f32 %v812_v37, %v1747_v27 }
 0x161   : > { %v949_v44 = vadd.f32 %v948_v29, %v886_v41  ;;  %v814_v0 = vadd.f32 %v813_v58, %v1769_v61 }
 0x163   : > { %v950_v28 = vadd.f32 %v949_v44, %v887_v47  ;;  %v815_v1 = vadd.f32 %v814_v0, %v1789_v33  ;;  %v890_v33 = vmul.f32 %v1643_v10, %v1643_v10 }
 0x165   : > { %v951_v27 = vadd.f32 %v950_v28, %v888_v39  ;;  %v816_v61 = vadd.f32 %v815_v1, %v1809_v51 }
 0x167   : > { %v817_v60 = vadd.f32 %v816_v61, %v1643_v10  ;;  %v952_v15 = vadd.f32 %v951_v27, %v889_v7  ;;  %v841_v7 = vld [vmem:[%s1900_s10] sm:$0x1] }
 0x169   : > { %v818_v35 = vadd.f32 %v817_v60, %v1656_v14  ;;  %v953_v31 = vadd.f32 %v952_v15, %v890_v33  ;;  %v895_v14 = vmul.f32 %v1708_v30, %v1708_v30 }
 0x16b   : > { %v819_v51 = vadd.f32 %v818_v35, %v1669_v18  ;;  %v954_v59 = vadd.f32 %v953_v31, %v891_v19  ;;  %v896_v18 = vmul.f32 %v1723_v45, %v1723_v45 }
 0x16d   : > { %v820_v2 = vadd.f32 %v819_v51, %v1682_v22  ;;  %v955_v10 = vadd.f32 %v954_v59, %v892_v23  ;;  %v897_v22 = vmul.f32 %v1736_v4, %v1736_v4 }
 0x16f   : > { %v821_v36 = vadd.f32 %v820_v2, %v1695_v26  ;;  %v956_v40 = vadd.f32 %v955_v10, %v893_v32  ;;  %v898_v26 = vmul.f32 %v1749_v43, %v1749_v43 }
 0x171   : > { %v822_v3 = vadd.f32 %v821_v36, %v1708_v30  ;;  %v957_v5 = vadd.f32 %v956_v40, %v894_v62  ;;  %v899_v30 = vmul.f32 %v1771_v63, %v1771_v63 }
 0x173   : > { %v958_v8 = vadd.f32 %v957_v5, %v895_v14  ;;  %v823_v6 = vadd.f32 %v822_v3, %v1723_v45  ;;  %v900_v45 = vmul.f32 %v1791_v34, %v1791_v34 }
 0x175   : > { %v824_v42 = vadd.f32 %v823_v6, %v1736_v4  ;;  %v959_v38 = vadd.f32 %v958_v8, %v896_v18 }
 0x177   : > { %v825_v46 = vadd.f32 %v824_v42, %v1749_v43  ;;  %v960_v48 = vadd.f32 %v959_v38, %v897_v22 }
 0x179   : > { %v826_v49 = vadd.f32 %v825_v46, %v1771_v63  ;;  %v961_v13 = vadd.f32 %v960_v48, %v898_v26 }
 0x17b   : > { %v827_v12 = vadd.f32 %v826_v49, %v1791_v34  ;;  %v962_v50 = vadd.f32 %v961_v13, %v899_v30 }
 0x17d   : > { %v828_v4 = vadd.f32 %v827_v12, %v1811_v52  ;;  %v963_v16 = vadd.f32 %v962_v50, %v900_v45  ;;  %v904_v52 = vmul.f32 %v1861_v9, %v1861_v9 }
 0x17f   : > { %v964_v43 = vadd.f32 %v963_v16, %v901_v17  ;;  %v829_v54 = vadd.f32 %v828_v4, %v1829_v53  ;;  %v905_v53 = vmul.f32 %v1877_v57, %v1877_v57 }
 0x181   : > { %v965_v63 = vadd.f32 %v964_v43, %v902_v21  ;;  %v830_v20 = vadd.f32 %v829_v54, %v1845_v56 }
 0x183   : > { %v966_v34 = vadd.f32 %v965_v63, %v903_v55  ;;  %v831_v37 = vadd.f32 %v830_v20, %v1861_v9  ;;  %v769_v9 = vld [vmem:[%s1894_s7] sm:$0x1] }
 0x185   : > { %v967_v25 = vadd.f32 %v966_v34, %v904_v52  ;;  %v832_v24 = vadd.f32 %v831_v37, %v1877_v57 }
 0x187   : > { %v833_v29 = vrot.slane %v832_v24, 4  ;;  %v968_v58 = vadd.f32 %v967_v25, %v905_v53 }
 0x189   : > { %v834_v41 = vadd.f32 %v833_v29, %v832_v24  ;;  %v969_v56 = vrot.slane %v968_v58, 4 }
 0x18b   : > { %v835_v44 = vrot.slane %v834_v41, 2  ;;  %v970_v0 = vadd.f32 %v969_v56, %v968_v58 }
 0x18d   : > { %v836_v47 = vadd.f32 %v835_v44, %v834_v41  ;;  %v971_v28 = vrot.slane %v970_v0, 2 }
 0x18f   : > { %v837_v1 = vrot.slane %v836_v47, 1  ;;  %v972_v39 = vadd.f32 %v971_v28, %v970_v0 }
 0x191   : > { %v838_v27 = vadd.f32 %v837_v1, %v836_v47  ;;  %v973_v61 = vrot.slane %v972_v39, 1 }
 0x193   : > { %v839_v11 = vadd.f32 %v838_v27, %v769_v9  ;;  %v974_v33 = vadd.f32 %v973_v61, %v972_v39 }
 0x195   : > { %840 = vst [vmem:[%s1894_s7] sm:$0x1] %v839_v11  ;;  %v975_v57 = vadd.f32 %v974_v33, %v841_v7 }
 0x197   : > { %976 = vst [vmem:[%s1900_s10] sm:$0x1] %v975_v57 }
 0x198 PF: > { %s15_s17 = sadd.s32 1, %s1477_s17   ;;  %s1973_s15 = smov %s1473_s16 }
 0x199   : > { %p12_p5 = scmp.ge.s32.totalorder %s15_s17, 6   ;;  %s1974_s16 = smov %s1976_s18 }
 0x19b   :  { %14 = sbr.rel (!%p12_p5) target bundleno = 2 (0x2), region = 89 }

// kernel: generator_forward.16
= control target key start
LH: loop header
LB: loop body
LE: loop exit
PB: predicated region body
PF: predicated region fallthrough
CT: control target
= control target key end

     0   :  { %s708_s12 = smov 0   ;;  %s710_s13 = smov 0   ;;  %s1014_s0 = inlined_call_operand.vmem [shape: f32[4,512,128], index: 0, kind: input, shape index: {}]   ;;  %s1015_s1 = inlined_call_operand.vmem [shape: f32[1,128], index: 1, kind: input, shape index: {}]   ;;  %s1016_s2 = inlined_call_operand.vmem [shape: f32[1,128], index: 2, kind: input, shape index: {}]   ;;  %s1017_s3 = inlined_call_operand.vmem [shape: f32[4,512,128], index: 3, kind: output, shape index: {}]  }
   0x1   :  { %s712_s14 = smov 0  }
   0x2 LB: > { %s25_s15 = sadd.s32 1, %s682_s13  ;;  %p629_p0 = scmp.ge.s32.totalorder %s686_s14, 1  ;;  %s686_s14 = sphi %s712_s14, %s13_s14   ;;  %s682_s13 = sphi %s710_s13, %s1019_s13   ;;  %s678_s12 = sphi %s708_s12, %s1018_s12  }
   0x3   : > { %p27_p1 = scmp.ge.s32.totalorder %s25_s15, 4  ;;  %p158_p2 = scmp.lt.s32.totalorder %s686_s14, 5 }
   0x5   : > { %s1021_s15 = smov (%p27_p1, %s25_s15), 0  ;;  %p159_p3 = pnand %p629_p0, %p158_p2 }
   0x6   : > { %p191_p4 = scmp.lt.s32.totalorder (!%p159_p3), %s678_s12, 3 }
   0x7   : > { %162 = sbr.rel (%p159_p3) target bundleno = 86 (0x56), region = 32 }
   0xc   : > { %s1023_s12 = smov (!%p191_p4, %s678_s12), 3  ;;  %v729_v0 = vld [vmem:[%s1015_s1] ss:$0 sm:$0xff] }
   0xd   : > { %s636_s18 = sshll.u32 %s1023_s12, 9  ;;  %v739_v1 = vld [vmem:[%s1016_s2] ss:$0 sm:$0xff] }
   0xe   : > { %s734_s21 = scalar_lea.vmem %s1014_s0, %s636_s18  ;;  %s762_s26 = scalar_lea.vmem %s1017_s3, %s636_s18 }
   0xf   : > { %v210_v2 = vld [vmem:[%s734_s21] sm:$0xff]  ;;  %v211_v3 = vld [vmem:[%s734_s21 + $0x8] sm:$0xff]  ;;  %v212_v4 = vld [vmem:[%s734_s21 + $0x10] sm:$0xff] }
  0x10   : > { %v278_v5 = vmul.f32 %v729_v0, %v210_v2  ;;  %v279_v6 = vmul.f32 %v729_v0, %v211_v3  ;;  %v280_v7 = vmul.f32 %v729_v0, %v212_v4  ;;  %v213_v8 = vld [vmem:[%s734_s21 + $0x18] sm:$0xff]  ;;  %v214_v9 = vld [vmem:[%s734_s21 + $0x20] sm:$0xff]  ;;  %v215_v10 = vld [vmem:[%s734_s21 + $0x28] sm:$0xff] }
  0x11   : > { %v281_v11 = vmul.f32 %v729_v0, %v213_v8  ;;  %v282_v12 = vmul.f32 %v729_v0, %v214_v9  ;;  %v283_v13 = vmul.f32 %v729_v0, %v215_v10  ;;  %v216_v14 = vld [vmem:[%s734_s21 + $0x30] sm:$0xff]  ;;  %v217_v15 = vld [vmem:[%s734_s21 + $0x38] sm:$0xff]  ;;  %v218_v24 = vld [vmem:[%s734_s21 + $0x40] sm:$0xff] }
  0x12   : > { %v346_v16 = vadd.f32 %v739_v1, %v278_v5  ;;  %v347_v17 = vadd.f32 %v739_v1, %v279_v6  ;;  %v348_v18 = vadd.f32 %v739_v1, %v280_v7  ;;  %v284_v19 = vmul.f32 %v729_v0, %v216_v14  ;;  %v219_v25 = vld [vmem:[%s734_s21 + $0x48] sm:$0xff]  ;;  %v220_v26 = vld [vmem:[%s734_s21 + $0x50] sm:$0xff]  ;;  %v221_v31 = vld [vmem:[%s734_s21 + $0x58] sm:$0xff] }
  0x13   : > { %v349_v20 = vadd.f32 %v739_v1, %v281_v11  ;;  %v350_v21 = vadd.f32 %v739_v1, %v282_v12  ;;  %v351_v22 = vadd.f32 %v739_v1, %v283_v13  ;;  %v285_v23 = vmul.f32 %v729_v0, %v217_v15  ;;  %v222_v32 = vld [vmem:[%s734_s21 + $0x60] sm:$0xff]  ;;  %v223_v33 = vld [vmem:[%s734_s21 + $0x68] sm:$0xff]  ;;  %v224_v37 = vld [vmem:[%s734_s21 + $0x70] sm:$0xff] }
  0x14   : > { %v410_v27 = vmax.f32 %v346_v16, 0.0  ;;  %v411_v28 = vmax.f32 %v347_v17, 0.0  ;;  %v412_v29 = vmax.f32 %v348_v18, 0.0  ;;  %v352_v30 = vadd.f32 %v739_v1, %v284_v19  ;;  %v225_v42 = vld [vmem:[%s734_s21 + $0x78] sm:$0xff]  ;;  %v226_v54 = vld [vmem:[%s734_s21 + $0x80] sm:$0xff]  ;;  %v227_v55 = vld [vmem:[%s734_s21 + $0x88] sm:$0xff] }
  0x15   : > { %v413_v34 = vmax.f32 %v349_v20, 0.0  ;;  %v414_v35 = vmax.f32 %v350_v21, 0.0  ;;  %v353_v36 = vadd.f32 %v739_v1, %v285_v23  ;;  %v415_v38 = vmax.f32 %v351_v22, 0.0  ;;  %v228_v56 = vld [vmem:[%s734_s21 + $0x90] sm:$0xff]  ;;  %v229_v59 = vld [vmem:[%s734_s21 + $0x98] sm:$0xff]  ;;  %v230_v63 = vld [vmem:[%s734_s21 + $0xa0] sm:$0xff] }
  0x16   : > { %474 = vst [vmem:[%s762_s26] sm:$0xff] %v410_v27  ;;  %v286_v39 = vmul.f32 %v729_v0, %v218_v24  ;;  %v287_v40 = vmul.f32 %v729_v0, %v219_v25  ;;  %v288_v41 = vmul.f32 %v729_v0, %v220_v26  ;;  %v416_v43 = vmax.f32 %v352_v30, 0.0  ;;  %v231_v6 = vld [vmem:[%s734_s21 + $0xa8] sm:$0xff]  ;;  %v232_v10 = vld [vmem:[%s734_s21 + $0xb0] sm:$0xff]  ;;  %v233_v14 = vld [vmem:[%s734_s21 + $0xb8] sm:$0xff] }
  0x17   : > { %475 = vst [vmem:[%s762_s26 + $0x8] sm:$0xff] %v411_v28  ;;  %v289_v44 = vmul.f32 %v729_v0, %v221_v31  ;;  %v290_v45 = vmul.f32 %v729_v0, %v222_v32  ;;  %v291_v46 = vmul.f32 %v729_v0, %v223_v33  ;;  %v292_v50 = vmul.f32 %v729_v0, %v224_v37  ;;  %v234_v18 = vld [vmem:[%s734_s21 + $0xc0] sm:$0xff]  ;;  %v235_v22 = vld [vmem:[%s734_s21 + $0xc8] sm:$0xff]  ;;  %v236_v26 = vld [vmem:[%s734_s21 + $0xd0] sm:$0xff] }
  0x18   : > { %476 = vst [vmem:[%s762_s26 + $0x10] sm:$0xff] %v412_v29  ;;  %v354_v47 = vadd.f32 %v739_v1, %v286_v39  ;;  %v355_v48 = vadd.f32 %v739_v1, %v287_v40  ;;  %v356_v49 = vadd.f32 %v739_v1, %v288_v41  ;;  %v417_v51 = vmax.f32 %v353_v36, 0.0  ;;  %v237_v30 = vld [vmem:[%s734_s21 + $0xd8] sm:$0xff] }
  0x19   : > { %477 = vst [vmem:[%s762_s26 + $0x18] sm:$0xff] %v413_v34  ;;  %v357_v52 = vadd.f32 %v739_v1, %v289_v44  ;;  %v293_v53 = vmul.f32 %v729_v0, %v225_v42  ;;  %v358_v58 = vadd.f32 %v739_v1, %v290_v45  ;;  %v359_v62 = vadd.f32 %v739_v1, %v291_v46  ;;  %v238_v34 = vld [vmem:[%s734_s21 + $0xe0] sm:$0xff]  ;;  %v240_v42 = vld [vmem:[%s734_s21 + $0xf0] sm:$0xff]  ;;  %v241_v46 = vld [vmem:[%s734_s21 + $0xf8] sm:$0xff] }
  0x1a   : > { %478 = vst [vmem:[%s762_s26 + $0x20] sm:$0xff] %v414_v35  ;;  %v418_v57 = vmax.f32 %v354_v47, 0.0  ;;  %v419_v60 = vmax.f32 %v355_v48, 0.0  ;;  %v420_v61 = vmax.f32 %v356_v49, 0.0  ;;  %v360_v2 = vadd.f32 %v739_v1, %v292_v50  ;;  %v242_v50 = vld [vmem:[%s734_s21 + $0x100] sm:$0xff] }
  0x1b   : > { %479 = vst [vmem:[%s762_s26 + $0x28] sm:$0xff] %v415_v38  ;;  %v294_v3 = vmul.f32 %v729_v0, %v226_v54  ;;  %v295_v4 = vmul.f32 %v729_v0, %v227_v55  ;;  %v296_v5 = vmul.f32 %v729_v0, %v228_v56  ;;  %v421_v7 = vmax.f32 %v357_v52, 0.0  ;;  %v239_v38 = vld [vmem:[%s734_s21 + $0xe8] sm:$0xff] }
  0x1c   : > { %480 = vst [vmem:[%s762_s26 + $0x30] sm:$0xff] %v416_v43  ;;  %v361_v8 = vadd.f32 %v739_v1, %v293_v53  ;;  %v297_v9 = vmul.f32 %v729_v0, %v229_v59  ;;  %v422_v11 = vmax.f32 %v358_v58, 0.0  ;;  %v298_v13 = vmul.f32 %v729_v0, %v230_v63  ;;  %v243_v54 = vld [vmem:[%s734_s21 + $0x108] sm:$0xff]  ;;  %v244_v58 = vld [vmem:[%s734_s21 + $0x110] sm:$0xff] }
  0x1d   : > { %481 = vst [vmem:[%s762_s26 + $0x38] sm:$0xff] %v417_v51  ;;  %v362_v12 = vadd.f32 %v739_v1, %v294_v3  ;;  %v423_v15 = vmax.f32 %v359_v62, 0.0  ;;  %v363_v16 = vadd.f32 %v739_v1, %v295_v4  ;;  %v299_v17 = vmul.f32 %v729_v0, %v231_v6  ;;  %v245_v62 = vld [vmem:[%s734_s21 + $0x118] sm:$0xff]  ;;  %v246_v4 = vld [vmem:[%s734_s21 + $0x120] sm:$0xff] }
  0x1e   : > { %482 = vst [vmem:[%s762_s26 + $0x40] sm:$0xff] %v418_v57  ;;  %v424_v19 = vmax.f32 %v360_v2, 0.0  ;;  %v364_v20 = vadd.f32 %v739_v1, %v296_v5  ;;  %v300_v21 = vmul.f32 %v729_v0, %v232_v10  ;;  %v425_v23 = vmax.f32 %v361_v8, 0.0  ;;  %v247_v8 = vld [vmem:[%s734_s21 + $0x128] sm:$0xff] }
  0x1f   : > { %483 = vst [vmem:[%s762_s26 + $0x48] sm:$0xff] %v419_v60  ;;  %v365_v24 = vadd.f32 %v739_v1, %v297_v9  ;;  %v301_v25 = vmul.f32 %v729_v0, %v233_v14  ;;  %v426_v27 = vmax.f32 %v362_v12, 0.0  ;;  %v366_v28 = vadd.f32 %v739_v1, %v298_v13  ;;  %v248_v12 = vld [vmem:[%s734_s21 + $0x130] sm:$0xff] }
  0x20   : > { %484 = vst [vmem:[%s762_s26 + $0x50] sm:$0xff] %v420_v61  ;;  %v302_v29 = vmul.f32 %v729_v0, %v234_v18  ;;  %v427_v31 = vmax.f32 %v363_v16, 0.0  ;;  %v367_v32 = vadd.f32 %v739_v1, %v299_v17  ;;  %v303_v33 = vmul.f32 %v729_v0, %v235_v22  ;;  %v249_v16 = vld [vmem:[%s734_s21 + $0x138] sm:$0xff] }
  0x21   : > { %485 = vst [vmem:[%s762_s26 + $0x58] sm:$0xff] %v421_v7  ;;  %v428_v35 = vmax.f32 %v364_v20, 0.0  ;;  %v368_v36 = vadd.f32 %v739_v1, %v300_v21  ;;  %v304_v37 = vmul.f32 %v729_v0, %v236_v26  ;;  %v429_v39 = vmax.f32 %v365_v24, 0.0  ;;  %v250_v20 = vld [vmem:[%s734_s21 + $0x140] sm:$0xff]  ;;  %v251_v24 = vld [vmem:[%s734_s21 + $0x148] sm:$0xff] }
  0x22   : > { %486 = vst [vmem:[%s762_s26 + $0x60] sm:$0xff] %v422_v11  ;;  %v369_v40 = vadd.f32 %v739_v1, %v301_v25  ;;  %v305_v41 = vmul.f32 %v729_v0, %v237_v30  ;;  %v430_v43 = vmax.f32 %v366_v28, 0.0  ;;  %v370_v44 = vadd.f32 %v739_v1, %v302_v29  ;;  %v252_v28 = vld [vmem:[%s734_s21 + $0x150] sm:$0xff] }
  0x23   : > { %487 = vst [vmem:[%s762_s26 + $0x68] sm:$0xff] %v423_v15  ;;  %v306_v45 = vmul.f32 %v729_v0, %v238_v34  ;;  %v431_v47 = vmax.f32 %v367_v32, 0.0  ;;  %v371_v48 = vadd.f32 %v739_v1, %v303_v33  ;;  %v307_v49 = vmul.f32 %v729_v0, %v239_v38  ;;  %v253_v32 = vld [vmem:[%s734_s21 + $0x158] sm:$0xff] }
  0x24   : > { %488 = vst [vmem:[%s762_s26 + $0x70] sm:$0xff] %v424_v19  ;;  %v432_v51 = vmax.f32 %v368_v36, 0.0  ;;  %v372_v52 = vadd.f32 %v739_v1, %v304_v37  ;;  %v308_v53 = vmul.f32 %v729_v0, %v240_v42  ;;  %v433_v55 = vmax.f32 %v369_v40, 0.0  ;;  %v254_v36 = vld [vmem:[%s734_s21 + $0x160] sm:$0xff]  ;;  %v255_v40 = vld [vmem:[%s734_s21 + $0x168] sm:$0xff] }
  0x25   : > { %489 = vst [vmem:[%s762_s26 + $0x78] sm:$0xff] %v425_v23  ;;  %v373_v56 = vadd.f32 %v739_v1, %v305_v41  ;;  %v309_v57 = vmul.f32 %v729_v0, %v241_v46  ;;  %v434_v59 = vmax.f32 %v370_v44, 0.0  ;;  %v374_v60 = vadd.f32 %v739_v1, %v306_v45  ;;  %v256_v44 = vld [vmem:[%s734_s21 + $0x170] sm:$0xff] }
  0x26   : > { %490 = vst [vmem:[%s762_s26 + $0x80] sm:$0xff] %v426_v27  ;;  %v310_v61 = vmul.f32 %v729_v0, %v242_v50  ;;  %v435_v63 = vmax.f32 %v371_v48, 0.0  ;;  %v375_v2 = vadd.f32 %v739_v1, %v307_v49  ;;  %v311_v3 = vmul.f32 %v729_v0, %v243_v54  ;;  %v257_v48 = vld [vmem:[%s734_s21 + $0x178] sm:$0xff] }
  0x27   : > { %491 = vst [vmem:[%s762_s26 + $0x88] sm:$0xff] %v427_v31  ;;  %v436_v5 = vmax.f32 %v372_v52, 0.0  ;;  %v376_v6 = vadd.f32 %v739_v1, %v308_v53  ;;  %v312_v7 = vmul.f32 %v729_v0, %v244_v58  ;;  %v437_v9 = vmax.f32 %v373_v56, 0.0  ;;  %v258_v52 = vld [vmem:[%s734_s21 + $0x180] sm:$0xff]  ;;  %v259_v56 = vld [vmem:[%s734_s21 + $0x188] sm:$0xff] }
  0x28   : > { %492 = vst [vmem:[%s762_s26 + $0x90] sm:$0xff] %v428_v35  ;;  %v377_v10 = vadd.f32 %v739_v1, %v309_v57  ;;  %v313_v11 = vmul.f32 %v729_v0, %v245_v62  ;;  %v438_v13 = vmax.f32 %v374_v60, 0.0  ;;  %v378_v14 = vadd.f32 %v739_v1, %v310_v61  ;;  %v260_v60 = vld [vmem:[%s734_s21 + $0x190] sm:$0xff] }
  0x29   : > { %493 = vst [vmem:[%s762_s26 + $0x98] sm:$0xff] %v429_v39  ;;  %v314_v15 = vmul.f32 %v729_v0, %v246_v4  ;;  %v439_v17 = vmax.f32 %v375_v2, 0.0  ;;  %v379_v18 = vadd.f32 %v739_v1, %v311_v3  ;;  %v315_v19 = vmul.f32 %v729_v0, %v247_v8  ;;  %v261_v2 = vld [vmem:[%s734_s21 + $0x198] sm:$0xff] }
  0x2a   : > { %494 = vst [vmem:[%s762_s26 + $0xa0] sm:$0xff] %v430_v43  ;;  %v440_v21 = vmax.f32 %v376_v6, 0.0  ;;  %v380_v22 = vadd.f32 %v739_v1, %v312_v7  ;;  %v316_v23 = vmul.f32 %v729_v0, %v248_v12  ;;  %v441_v25 = vmax.f32 %v377_v10, 0.0  ;;  %v273_v3 = vld [vmem:[%s734_s21 + $0x1f8] sm:$0xff]  ;;  %v262_v7 = vld [vmem:[%s734_s21 + $0x1a0] sm:$0xff] }
  0x2b   : > { %495 = vst [vmem:[%s762_s26 + $0xa8] sm:$0xff] %v431_v47  ;;  %v381_v26 = vadd.f32 %v739_v1, %v313_v11  ;;  %v317_v27 = vmul.f32 %v729_v0, %v249_v16  ;;  %v442_v29 = vmax.f32 %v378_v14, 0.0  ;;  %v382_v30 = vadd.f32 %v739_v1, %v314_v15  ;;  %v263_v11 = vld [vmem:[%s734_s21 + $0x1a8] sm:$0xff]  ;;  %v264_v15 = vld [vmem:[%s734_s21 + $0x1b0] sm:$0xff] }
  0x2c   : > { %496 = vst [vmem:[%s762_s26 + $0xb0] sm:$0xff] %v432_v51  ;;  %v318_v31 = vmul.f32 %v729_v0, %v250_v20  ;;  %v443_v33 = vmax.f32 %v379_v18, 0.0  ;;  %v383_v34 = vadd.f32 %v739_v1, %v315_v19  ;;  %v319_v35 = vmul.f32 %v729_v0, %v251_v24  ;;  %v265_v20 = vld [vmem:[%s734_s21 + $0x1b8] sm:$0xff]  ;;  %v266_v24 = vld [vmem:[%s734_s21 + $0x1c0] sm:$0xff] }
  0x2d   : > { %497 = vst [vmem:[%s762_s26 + $0xb8] sm:$0xff] %v433_v55  ;;  %v444_v37 = vmax.f32 %v380_v22, 0.0  ;;  %v384_v38 = vadd.f32 %v739_v1, %v316_v23  ;;  %v320_v39 = vmul.f32 %v729_v0, %v252_v28  ;;  %v445_v41 = vmax.f32 %v381_v26, 0.0 }
  0x2e   : > { %498 = vst [vmem:[%s762_s26 + $0xc0] sm:$0xff] %v434_v59  ;;  %v385_v42 = vadd.f32 %v739_v1, %v317_v27  ;;  %v321_v43 = vmul.f32 %v729_v0, %v253_v32  ;;  %v446_v45 = vmax.f32 %v382_v30, 0.0  ;;  %v386_v46 = vadd.f32 %v739_v1, %v318_v31 }
  0x2f   : > { %499 = vst [vmem:[%s762_s26 + $0xc8] sm:$0xff] %v435_v63  ;;  %v322_v47 = vmul.f32 %v729_v0, %v254_v36  ;;  %v447_v49 = vmax.f32 %v383_v34, 0.0  ;;  %v387_v50 = vadd.f32 %v739_v1, %v319_v35  ;;  %v323_v51 = vmul.f32 %v729_v0, %v255_v40 }
  0x30   : > { %500 = vst [vmem:[%s762_s26 + $0xd0] sm:$0xff] %v436_v5  ;;  %v448_v53 = vmax.f32 %v384_v38, 0.0  ;;  %v388_v54 = vadd.f32 %v739_v1, %v320_v39  ;;  %v324_v55 = vmul.f32 %v729_v0, %v256_v44  ;;  %v449_v57 = vmax.f32 %v385_v42, 0.0 }
  0x31   : > { %501 = vst [vmem:[%s762_s26 + $0xd8] sm:$0xff] %v437_v9  ;;  %v389_v58 = vadd.f32 %v739_v1, %v321_v43  ;;  %v325_v59 = vmul.f32 %v729_v0, %v257_v48  ;;  %v450_v61 = vmax.f32 %v386_v46, 0.0  ;;  %v390_v62 = vadd.f32 %v739_v1, %v322_v47 }
  0x32   : > { %502 = vst [vmem:[%s762_s26 + $0xe0] sm:$0xff] %v438_v13  ;;  %v326_v63 = vmul.f32 %v729_v0, %v258_v52  ;;  %v451_v4 = vmax.f32 %v387_v50, 0.0  ;;  %v391_v5 = vadd.f32 %v739_v1, %v323_v51  ;;  %v327_v6 = vmul.f32 %v729_v0, %v259_v56 }
  0x33   : > { %503 = vst [vmem:[%s762_s26 + $0xe8] sm:$0xff] %v439_v17  ;;  %v452_v8 = vmax.f32 %v388_v54, 0.0  ;;  %v392_v9 = vadd.f32 %v739_v1, %v324_v55  ;;  %v328_v10 = vmul.f32 %v729_v0, %v260_v60  ;;  %v453_v12 = vmax.f32 %v389_v58, 0.0 }
  0x34   : > { %504 = vst [vmem:[%s762_s26 + $0xf0] sm:$0xff] %v440_v21  ;;  %v393_v13 = vadd.f32 %v739_v1, %v325_v59  ;;  %v329_v14 = vmul.f32 %v729_v0, %v261_v2  ;;  %v341_v16 = vmul.f32 %v729_v0, %v273_v3  ;;  %v454_v17 = vmax.f32 %v390_v62, 0.0 }
  0x35   : > { %505 = vst [vmem:[%s762_s26 + $0xf8] sm:$0xff] %v441_v25  ;;  %v394_v18 = vadd.f32 %v739_v1, %v326_v63  ;;  %v330_v19 = vmul.f32 %v729_v0, %v262_v7  ;;  %v455_v21 = vmax.f32 %v391_v5, 0.0  ;;  %v395_v22 = vadd.f32 %v739_v1, %v327_v6 }
  0x36   : > { %506 = vst [vmem:[%s762_s26 + $0x100] sm:$0xff] %v442_v29  ;;  %v331_v23 = vmul.f32 %v729_v0, %v263_v11  ;;  %v952_v25 = vadd.f32 %v739_v1, %v341_v16  ;;  %v456_v26 = vmax.f32 %v392_v9, 0.0  ;;  %v396_v27 = vadd.f32 %v739_v1, %v328_v10  ;;  %v267_v29 = vld [vmem:[%s734_s21 + $0x1c8] sm:$0xff] }
  0x37   : > { %507 = vst [vmem:[%s762_s26 + $0x108] sm:$0xff] %v443_v33  ;;  %v332_v28 = vmul.f32 %v729_v0, %v264_v15  ;;  %v457_v30 = vmax.f32 %v393_v13, 0.0  ;;  %v397_v31 = vadd.f32 %v739_v1, %v329_v14  ;;  %v333_v32 = vmul.f32 %v729_v0, %v265_v20  ;;  %v268_v33 = vld [vmem:[%s734_s21 + $0x1d0] sm:$0xff] }
  0x38   : > { %508 = vst [vmem:[%s762_s26 + $0x110] sm:$0xff] %v444_v37  ;;  %v458_v34 = vmax.f32 %v394_v18, 0.0  ;;  %v398_v35 = vadd.f32 %v739_v1, %v330_v19  ;;  %v334_v36 = vmul.f32 %v729_v0, %v266_v24  ;;  %v269_v37 = vld [vmem:[%s734_s21 + $0x1d8] sm:$0xff]  ;;  %v459_v38 = vmax.f32 %v395_v22, 0.0 }
  0x39   : > { %509 = vst [vmem:[%s762_s26 + $0x118] sm:$0xff] %v445_v41  ;;  %v399_v39 = vadd.f32 %v739_v1, %v331_v23  ;;  %v335_v40 = vmul.f32 %v729_v0, %v267_v29  ;;  %v270_v41 = vld [vmem:[%s734_s21 + $0x1e0] sm:$0xff]  ;;  %v460_v42 = vmax.f32 %v396_v27, 0.0  ;;  %v400_v43 = vadd.f32 %v739_v1, %v332_v28 }
  0x3a   : > { %510 = vst [vmem:[%s762_s26 + $0x120] sm:$0xff] %v446_v45  ;;  %v336_v44 = vmul.f32 %v729_v0, %v268_v33  ;;  %v271_v45 = vld [vmem:[%s734_s21 + $0x1e8] sm:$0xff]  ;;  %v461_v46 = vmax.f32 %v397_v31, 0.0  ;;  %v401_v47 = vadd.f32 %v739_v1, %v333_v32  ;;  %v337_v48 = vmul.f32 %v729_v0, %v269_v37 }
  0x3b   : > { %511 = vst [vmem:[%s762_s26 + $0x128] sm:$0xff] %v447_v49  ;;  %v272_v49 = vld [vmem:[%s734_s21 + $0x1f0] sm:$0xff]  ;;  %v462_v50 = vmax.f32 %v398_v35, 0.0  ;;  %v402_v51 = vadd.f32 %v739_v1, %v334_v36  ;;  %v338_v52 = vmul.f32 %v729_v0, %v270_v41  ;;  %v403_v54 = vadd.f32 %v739_v1, %v335_v40 }
  0x3c   : > { %512 = vst [vmem:[%s762_s26 + $0x130] sm:$0xff] %v448_v53  ;;  %v463_v53 = vmax.f32 %v399_v39, 0.0  ;;  %v339_v55 = vmul.f32 %v729_v0, %v271_v45  ;;  %v464_v56 = vmax.f32 %v400_v43, 0.0  ;;  %v340_v58 = vmul.f32 %v729_v0, %v272_v49 }
  0x3d   : > { %513 = vst [vmem:[%s762_s26 + $0x138] sm:$0xff] %v449_v57  ;;  %v404_v57 = vadd.f32 %v739_v1, %v336_v44  ;;  %v465_v59 = vmax.f32 %v401_v47, 0.0  ;;  %v405_v60 = vadd.f32 %v739_v1, %v337_v48  ;;  %v406_v62 = vadd.f32 %v739_v1, %v338_v52 }
  0x3e   : > { %514 = vst [vmem:[%s762_s26 + $0x140] sm:$0xff] %v450_v61  ;;  %v466_v61 = vmax.f32 %v402_v51, 0.0  ;;  %v467_v63 = vmax.f32 %v403_v54, 0.0  ;;  %v407_v2 = vadd.f32 %v739_v1, %v339_v55  ;;  %v408_v3 = vadd.f32 %v739_v1, %v340_v58 }
  0x3f   : > { %515 = vst [vmem:[%s762_s26 + $0x148] sm:$0xff] %v451_v4  ;;  %v468_v0 = vmax.f32 %v404_v57, 0.0  ;;  %v469_v4 = vmax.f32 %v405_v60, 0.0  ;;  %v470_v5 = vmax.f32 %v406_v62, 0.0 }
  0x40   : > { %516 = vst [vmem:[%s762_s26 + $0x150] sm:$0xff] %v452_v8  ;;  %v471_v6 = vmax.f32 %v407_v2, 0.0  ;;  %v472_v7 = vmax.f32 %v408_v3, 0.0  ;;  %v473_v8 = vmax.f32 %v952_v25, 0.0 }
  0x41   : > { %517 = vst [vmem:[%s762_s26 + $0x158] sm:$0xff] %v453_v12 }
  0x42   : > { %518 = vst [vmem:[%s762_s26 + $0x160] sm:$0xff] %v454_v17 }
  0x43   : > { %519 = vst [vmem:[%s762_s26 + $0x168] sm:$0xff] %v455_v21 }
  0x44   : > { %520 = vst [vmem:[%s762_s26 + $0x170] sm:$0xff] %v456_v26 }
  0x45   : > { %521 = vst [vmem:[%s762_s26 + $0x178] sm:$0xff] %v457_v30 }
  0x46   : > { %522 = vst [vmem:[%s762_s26 + $0x180] sm:$0xff] %v458_v34 }
  0x47   : > { %523 = vst [vmem:[%s762_s26 + $0x188] sm:$0xff] %v459_v38 }
  0x48   : > { %524 = vst [vmem:[%s762_s26 + $0x190] sm:$0xff] %v460_v42 }
  0x49   : > { %525 = vst [vmem:[%s762_s26 + $0x198] sm:$0xff] %v461_v46 }
  0x4a   : > { %526 = vst [vmem:[%s762_s26 + $0x1a0] sm:$0xff] %v462_v50 }
  0x4b   : > { %527 = vst [vmem:[%s762_s26 + $0x1a8] sm:$0xff] %v463_v53 }
  0x4c   : > { %528 = vst [vmem:[%s762_s26 + $0x1b0] sm:$0xff] %v464_v56 }
  0x4d   : > { %529 = vst [vmem:[%s762_s26 + $0x1b8] sm:$0xff] %v465_v59 }
  0x4e   : > { %530 = vst [vmem:[%s762_s26 + $0x1c0] sm:$0xff] %v466_v61 }
  0x4f   : > { %531 = vst [vmem:[%s762_s26 + $0x1c8] sm:$0xff] %v467_v63 }
  0x50   : > { %532 = vst [vmem:[%s762_s26 + $0x1d0] sm:$0xff] %v468_v0 }
  0x51   : > { %533 = vst [vmem:[%s762_s26 + $0x1d8] sm:$0xff] %v469_v4 }
  0x52   : > { %534 = vst [vmem:[%s762_s26 + $0x1e0] sm:$0xff] %v470_v5 }
  0x53   : > { %535 = vst [vmem:[%s762_s26 + $0x1e8] sm:$0xff] %v471_v6 }
  0x54   : > { %536 = vst [vmem:[%s762_s26 + $0x1f0] sm:$0xff] %v472_v7 }
  0x55   : > { %537 = vst [vmem:[%s762_s26 + $0x1f8] sm:$0xff] %v473_v8 }
  0x56 PF: > { %s13_s14 = sadd.s32 1, %s686_s14   ;;  %s1018_s12 = smov %s682_s13 }
  0x57   : > { %p10_p5 = scmp.ge.s32.totalorder %s13_s14, 6   ;;  %s1019_s13 = smov %s1021_s15 }
  0x59   :  { %12 = sbr.rel (!%p10_p5) target bundleno = 2 (0x2), region = 62 }

// kernel: generator_forward.17
= control target key start
LH: loop header
LB: loop body
LE: loop exit
PB: predicated region body
PF: predicated region fallthrough
CT: control target
= control target key end

     0   :  { %s1385_s9 = smov 0   ;;  %s1387_s10 = smov 0   ;;  %s1560_s0 = inlined_call_operand.vmem [shape: bf16[4,2048,128], index: 0, kind: input, shape index: {}]   ;;  %s1561_s1 = inlined_call_operand.vmem [shape: bf16[4,128,128], index: 1, kind: input, shape index: {}]   ;;  %s1562_s2 = inlined_call_operand.vmem [shape: f32[4,2048,128], index: 2, kind: output, shape index: {}]  }
   0x1   :  { %s1389_s11 = smov 0   ;;  %s1391_s12 = smov 0  }
   0x2   :  { %s1393_s13 = smov 0  }
   0x3 LB: > { %s21_s14 = sadd.s32 1, %s1360_s11  ;;  %s24_s15 = sadd.s32 1, %s1364_s12  ;;  %s1368_s13 = sphi %s1393_s13, %s12_s13   ;;  %s1364_s12 = sphi %s1391_s12, %s1566_s12   ;;  %s1360_s11 = sphi %s1389_s11, %s1565_s11   ;;  %s1356_s10 = sphi %s1387_s10, %s1564_s10   ;;  %s1352_s9 = sphi %s1385_s9, %s1563_s9  }
   0x4   : > { %p22_p0 = scmp.ge.s32.totalorder %s21_s14, 4  ;;  %p926_p1 = scmp.ge.s32.totalorder %s1368_s13, 1 }
   0x5   : > { %p143_p2 = scmp.lt.s32.totalorder %s1368_s13, 17 }
   0x6   : > { %s1568_s14 = smov (%p22_p0, %s21_s14), 0  ;;  %s1570_s15 = smov (!%p22_p0, %s24_s15), %s1364_s12 }
   0x7   : > { %p144_p3 = pnand %p926_p1, %p143_p2  ;;  %p26_p4 = scmp.ge.s32.totalorder %s1570_s15, 4 }
   0x8   : > { %p179_p5 = scmp.lt.s32.totalorder (!%p144_p3), %s1356_s10, 3  ;;  %s927_s20 = sshll.u32 (!%p144_p3), %s1352_s9, 6 }
   0x9   : > { %s1572_s15 = smov (%p26_p4, %s1570_s15), 0  ;;  %147 = sbr.rel (%p144_p3) target bundleno = 311 (0x137), region = 28 }
   0xa   : > { %p181_p6 = scmp.lt.s32.totalorder (!%p144_p3), %s927_s20, 255 }
   0xe   : > { %s1574_s10 = smov (!%p179_p5, %s1356_s10), 3  ;;  %s1576_s20 = smov (!%p181_p6, %s927_s20), 255 }
   0xf   : > { %s1097_s16 = sshll.u32 %s1574_s10, 6  ;;  %s928_s21 = sshll.u32 %s1574_s10, 8 }
  0x10   : > { %s1423_s19 = scalar_lea.vmem %s1561_s1, %s1097_s16  ;;  %s1433_s22 = sadd.s32 %s928_s21, %s1576_s20 }
  0x11   : > { %v1137_v0 = vld [vmem:[%s1423_s19 + $0x38] sm:$0xff]  ;;  %v1136_v1 = vld [vmem:[%s1423_s19 + $0x30] sm:$0xff]  ;;  %v1135_v2 = vld [vmem:[%s1423_s19 + $0x28] sm:$0xff]  ;;  %s929_s23 = sshll.u32 %s1433_s22, 2  ;;  %s934_s27 = sshll.u32 %s1433_s22, 3 }
  0x12   : > { %523 = vmatpush.bf16.msra.mxu0 %v1137_v0  ;;  %1138 = vmatpush.bf16.msra.mxu1 %v1137_v0  ;;  %v1134_v3 = vld [vmem:[%s1423_s19 + $0x20] sm:$0xff]  ;;  %v1133_v4 = vld [vmem:[%s1423_s19 + $0x18] sm:$0xff]  ;;  %v1132_v5 = vld [vmem:[%s1423_s19 + $0x10] sm:$0xff]  ;;  %s1440_s26 = scalar_lea.vmem %s1560_s0, %s929_s23  ;;  %s1479_s30 = scalar_lea.vmem %s1562_s2, %s934_s27 }
  0x13   : > { %1139 = vmatpush.bf16.msra.mxu2 %v1137_v0  ;;  %1140 = vmatpush.bf16.msra.mxu3 %v1137_v0  ;;  %v1131_v6 = vld [vmem:[%s1423_s19 + $0x8] sm:$0xff]  ;;  %v1130_v7 = vld [vmem:[%s1423_s19] sm:$0xff]  ;;  %v1100_v16 = vld [vmem:[%s1440_s26 + $0x10] sm:$0xff] }
  0x14   : > { %v1098_v8 = vld [vmem:[%s1440_s26] sm:$0xff]  ;;  %v1099_v12 = vld [vmem:[%s1440_s26 + $0x8] sm:$0xff]  ;;  %v1108_v17 = vld [vmem:[%s1440_s26 + $0x50] sm:$0xff] }
  0x15   : > { %v1106_v9 = vld [vmem:[%s1440_s26 + $0x40] sm:$0xff]  ;;  %v1107_v13 = vld [vmem:[%s1440_s26 + $0x48] sm:$0xff]  ;;  %v1116_v18 = vld [vmem:[%s1440_s26 + $0x90] sm:$0xff] }
  0x16   : > { %524 = vmatpush.bf16.msra.mxu0 %v1136_v1  ;;  %1141 = vmatpush.bf16.msra.mxu1 %v1136_v1  ;;  %v1114_v10 = vld [vmem:[%s1440_s26 + $0x80] sm:$0xff]  ;;  %v1115_v14 = vld [vmem:[%s1440_s26 + $0x88] sm:$0xff]  ;;  %v1124_v19 = vld [vmem:[%s1440_s26 + $0xd0] sm:$0xff] }
  0x17   : > { %1142 = vmatpush.bf16.msra.mxu2 %v1136_v1  ;;  %1143 = vmatpush.bf16.msra.mxu3 %v1136_v1  ;;  %v1122_v11 = vld [vmem:[%s1440_s26 + $0xc0] sm:$0xff]  ;;  %v1123_v15 = vld [vmem:[%s1440_s26 + $0xc8] sm:$0xff]  ;;  %v1101_v20 = vld [vmem:[%s1440_s26 + $0x18] sm:$0xff] }
  0x18   : > { %v1109_v21 = vld [vmem:[%s1440_s26 + $0x58] sm:$0xff]  ;;  %v1102_v24 = vld [vmem:[%s1440_s26 + $0x20] sm:$0xff]  ;;  %v1103_v28 = vld [vmem:[%s1440_s26 + $0x28] sm:$0xff] }
  0x19   : > { %v1117_v22 = vld [vmem:[%s1440_s26 + $0x98] sm:$0xff]  ;;  %v1110_v25 = vld [vmem:[%s1440_s26 + $0x60] sm:$0xff]  ;;  %v1111_v29 = vld [vmem:[%s1440_s26 + $0x68] sm:$0xff] }
  0x1a   : > { %525 = vmatpush.bf16.msra.mxu0 %v1135_v2  ;;  %1144 = vmatpush.bf16.msra.mxu1 %v1135_v2  ;;  %v1125_v23 = vld [vmem:[%s1440_s26 + $0xd8] sm:$0xff]  ;;  %v1118_v26 = vld [vmem:[%s1440_s26 + $0xa0] sm:$0xff]  ;;  %v1119_v30 = vld [vmem:[%s1440_s26 + $0xa8] sm:$0xff] }
  0x1b   : > { %1145 = vmatpush.bf16.msra.mxu2 %v1135_v2  ;;  %1146 = vmatpush.bf16.msra.mxu3 %v1135_v2  ;;  %v1126_v27 = vld [vmem:[%s1440_s26 + $0xe0] sm:$0xff]  ;;  %v1127_v31 = vld [vmem:[%s1440_s26 + $0xe8] sm:$0xff]  ;;  %v1104_v32 = vld [vmem:[%s1440_s26 + $0x30] sm:$0xff] }
  0x1c   : > { %v1112_v33 = vld [vmem:[%s1440_s26 + $0x70] sm:$0xff]  ;;  %v1105_v36 = vld [vmem:[%s1440_s26 + $0x38] sm:$0xff] }
  0x1d   : > { %v1120_v34 = vld [vmem:[%s1440_s26 + $0xb0] sm:$0xff]  ;;  %v1113_v37 = vld [vmem:[%s1440_s26 + $0x78] sm:$0xff] }
  0x1e   : > { %526 = vmatpush.bf16.msra.mxu0 %v1134_v3  ;;  %1147 = vmatpush.bf16.msra.mxu1 %v1134_v3  ;;  %v1128_v35 = vld [vmem:[%s1440_s26 + $0xf0] sm:$0xff]  ;;  %v1121_v38 = vld [vmem:[%s1440_s26 + $0xb8] sm:$0xff] }
  0x1f   : > { %1148 = vmatpush.bf16.msra.mxu2 %v1134_v3  ;;  %1149 = vmatpush.bf16.msra.mxu3 %v1134_v3  ;;  %v1129_v39 = vld [vmem:[%s1440_s26 + $0xf8] sm:$0xff] }
  0x22   : > { %527 = vmatpush.bf16.msra.mxu0 %v1133_v4  ;;  %1150 = vmatpush.bf16.msra.mxu1 %v1133_v4 }
  0x23   : > { %1151 = vmatpush.bf16.msra.mxu2 %v1133_v4  ;;  %1152 = vmatpush.bf16.msra.mxu3 %v1133_v4 }
  0x26   : > { %528 = vmatpush.bf16.msra.mxu0 %v1132_v5  ;;  %1153 = vmatpush.bf16.msra.mxu1 %v1132_v5 }
  0x27   : > { %1154 = vmatpush.bf16.msra.mxu2 %v1132_v5  ;;  %1155 = vmatpush.bf16.msra.mxu3 %v1132_v5 }
  0x2a   : > { %529 = vmatpush.bf16.msra.mxu0 %v1131_v6  ;;  %1156 = vmatpush.bf16.msra.mxu1 %v1131_v6 }
  0x2b   : > { %1157 = vmatpush.bf16.msra.mxu2 %v1131_v6  ;;  %1158 = vmatpush.bf16.msra.mxu3 %v1131_v6 }
  0x2e   : > { %530 = vmatpush.bf16.msra.mxu0 %v1130_v7  ;;  %1159 = vmatpush.bf16.msra.mxu1 %v1130_v7 }
  0x2f   : > { %1160 = vmatpush.bf16.msra.mxu2 %v1130_v7  ;;  %1161 = vmatpush.bf16.msra.mxu3 %v1130_v7 }
  0x31   : > { %531 = vmatmul.bf16.vlgmr.msra.gmra.mxu0 %v1098_v8  ;;  %571 = vmatmul.bf16.vlgmr.msra.gmra.mxu1 %v1106_v9 }
  0x32   : > { %611 = vmatmul.bf16.vlgmr.msra.gmra.mxu2 %v1114_v10  ;;  %651 = vmatmul.bf16.vlgmr.msra.gmra.mxu3 %v1122_v11 }
  0x41   : > { %536 = vmatmul.bf16.gmra.mxu0 %v1099_v12  ;;  %576 = vmatmul.bf16.gmra.mxu1 %v1107_v13 }
  0x42   : > { %616 = vmatmul.bf16.gmra.mxu2 %v1115_v14  ;;  %656 = vmatmul.bf16.gmra.mxu3 %v1123_v15 }
  0x51   : > { %541 = vmatmul.bf16.gmra.mxu0 %v1100_v16  ;;  %581 = vmatmul.bf16.gmra.mxu1 %v1108_v17 }
  0x52   : > { %621 = vmatmul.bf16.gmra.mxu2 %v1116_v18  ;;  %661 = vmatmul.bf16.gmra.mxu3 %v1124_v19 }
  0x61   : > { %546 = vmatmul.bf16.gmra.mxu0 %v1101_v20  ;;  %586 = vmatmul.bf16.gmra.mxu1 %v1109_v21 }
  0x62   : > { %626 = vmatmul.bf16.gmra.mxu2 %v1117_v22  ;;  %666 = vmatmul.bf16.gmra.mxu3 %v1125_v23 }
  0x71   : > { %551 = vmatmul.bf16.gmra.mxu0 %v1102_v24  ;;  %591 = vmatmul.bf16.gmra.mxu1 %v1110_v25 }
  0x72   : > { %631 = vmatmul.bf16.gmra.mxu2 %v1118_v26  ;;  %671 = vmatmul.bf16.gmra.mxu3 %v1126_v27 }
  0x81   : > { %556 = vmatmul.bf16.gmra.mxu0 %v1103_v28  ;;  %596 = vmatmul.bf16.gmra.mxu1 %v1111_v29 }
  0x82   : > { %636 = vmatmul.bf16.gmra.mxu2 %v1119_v30  ;;  %676 = vmatmul.bf16.gmra.mxu3 %v1127_v31 }
  0x91   : > { %561 = vmatmul.bf16.gmra.mxu0 %v1104_v32  ;;  %601 = vmatmul.bf16.gmra.mxu1 %v1112_v33 }
  0x92   : > { %641 = vmatmul.bf16.gmra.mxu2 %v1120_v34  ;;  %681 = vmatmul.bf16.gmra.mxu3 %v1128_v35 }
  0xa1   : > { %566 = vmatmul.bf16.gmra.mxu0 %v1105_v36  ;;  %606 = vmatmul.bf16.gmra.mxu1 %v1113_v37 }
  0xa2   : > { %646 = vmatmul.bf16.gmra.mxu2 %v1121_v38  ;;  %686 = vmatmul.bf16.gmra.mxu3 %v1129_v39 }
  0xae   : > { %v532_v40 = vpop.f32.mrf.mxu0  ;;  %v572_v41 = vpop.f32.mrf.mxu1 }
  0xaf   : > { %1202 = vtanh.f32 %v532_v40 }
  0xb0   : > { %1204 = vtanh.f32 %v572_v41 }
  0xb5   : > { %v1203_v42 = vpop.eup %1202  ;;  %v612_v43 = vpop.f32.mrf.mxu2 }
  0xb6   : > { %v652_v44 = vpop.f32.mrf.mxu3  ;;  %v1205_v45 = vpop.eup %1204  ;;  %756 = vst [vmem:[%s1479_s30] sm:$0xff] %v1203_v42  ;;  %1206 = vtanh.f32 %v612_v43 }
  0xb7   : > { %v534_v46 = vpop.f32.mrf.mxu0  ;;  %v574_v47 = vpop.f32.mrf.mxu1  ;;  %772 = vst [vmem:[%s1479_s30 + $0x80] sm:$0xff] %v1205_v45  ;;  %1208 = vtanh.f32 %v652_v44 }
  0xb8   : > { %1210 = vtanh.f32 %v534_v46 }
  0xb9   : > { %1212 = vtanh.f32 %v574_v47 }
  0xbc   : > { %v1207_v48 = vpop.eup %1206 }
  0xbd   : > { %v1209_v49 = vpop.eup %1208  ;;  %788 = vst [vmem:[%s1479_s30 + $0x100] sm:$0xff] %v1207_v48  ;;  %v614_v50 = vpop.f32.mrf.mxu2 }
  0xbe   : > { %v654_v51 = vpop.f32.mrf.mxu3  ;;  %v1211_v52 = vpop.eup %1210  ;;  %804 = vst [vmem:[%s1479_s30 + $0x180] sm:$0xff] %v1209_v49  ;;  %1214 = vtanh.f32 %v614_v50 }
  0xbf   : > { %v537_v53 = vpop.f32.mrf.mxu0  ;;  %v577_v54 = vpop.f32.mrf.mxu1  ;;  %757 = vst [vmem:[%s1479_s30 + $0x8] sm:$0xff] %v1211_v52  ;;  %1216 = vtanh.f32 %v654_v51 }
  0xc0   : > { %v1213_v55 = vpop.eup %1212  ;;  %1218 = vtanh.f32 %v537_v53 }
  0xc1   : > { %773 = vst [vmem:[%s1479_s30 + $0x88] sm:$0xff] %v1213_v55  ;;  %1220 = vtanh.f32 %v577_v54 }
  0xc4   : > { %v1215_v56 = vpop.eup %1214 }
  0xc5   : > { %v1217_v57 = vpop.eup %1216  ;;  %789 = vst [vmem:[%s1479_s30 + $0x108] sm:$0xff] %v1215_v56  ;;  %v617_v58 = vpop.f32.mrf.mxu2 }
  0xc6   : > { %v657_v59 = vpop.f32.mrf.mxu3  ;;  %v1219_v60 = vpop.eup %1218  ;;  %805 = vst [vmem:[%s1479_s30 + $0x188] sm:$0xff] %v1217_v57  ;;  %1222 = vtanh.f32 %v617_v58 }
  0xc7   : > { %v539_v61 = vpop.f32.mrf.mxu0  ;;  %v579_v62 = vpop.f32.mrf.mxu1  ;;  %758 = vst [vmem:[%s1479_s30 + $0x10] sm:$0xff] %v1219_v60  ;;  %1224 = vtanh.f32 %v657_v59 }
  0xc8   : > { %v1221_v63 = vpop.eup %1220  ;;  %1226 = vtanh.f32 %v539_v61 }
  0xc9   : > { %774 = vst [vmem:[%s1479_s30 + $0x90] sm:$0xff] %v1221_v63  ;;  %1228 = vtanh.f32 %v579_v62 }
  0xcc   : > { %v1223_v0 = vpop.eup %1222 }
  0xcd   : > { %v1225_v1 = vpop.eup %1224  ;;  %790 = vst [vmem:[%s1479_s30 + $0x110] sm:$0xff] %v1223_v0  ;;  %v619_v2 = vpop.f32.mrf.mxu2 }
  0xce   : > { %v659_v3 = vpop.f32.mrf.mxu3  ;;  %v1227_v4 = vpop.eup %1226  ;;  %806 = vst [vmem:[%s1479_s30 + $0x190] sm:$0xff] %v1225_v1  ;;  %1230 = vtanh.f32 %v619_v2 }
  0xcf   : > { %v542_v5 = vpop.f32.mrf.mxu0  ;;  %v582_v6 = vpop.f32.mrf.mxu1  ;;  %759 = vst [vmem:[%s1479_s30 + $0x18] sm:$0xff] %v1227_v4  ;;  %1232 = vtanh.f32 %v659_v3 }
  0xd0   : > { %v1229_v7 = vpop.eup %1228  ;;  %1234 = vtanh.f32 %v542_v5 }
  0xd1   : > { %775 = vst [vmem:[%s1479_s30 + $0x98] sm:$0xff] %v1229_v7  ;;  %1236 = vtanh.f32 %v582_v6 }
  0xd4   : > { %v1231_v8 = vpop.eup %1230 }
  0xd5   : > { %v1233_v9 = vpop.eup %1232  ;;  %791 = vst [vmem:[%s1479_s30 + $0x118] sm:$0xff] %v1231_v8  ;;  %v622_v10 = vpop.f32.mrf.mxu2 }
  0xd6   : > { %v662_v11 = vpop.f32.mrf.mxu3  ;;  %v1235_v12 = vpop.eup %1234  ;;  %807 = vst [vmem:[%s1479_s30 + $0x198] sm:$0xff] %v1233_v9  ;;  %1238 = vtanh.f32 %v622_v10 }
  0xd7   : > { %v544_v13 = vpop.f32.mrf.mxu0  ;;  %v584_v14 = vpop.f32.mrf.mxu1  ;;  %760 = vst [vmem:[%s1479_s30 + $0x20] sm:$0xff] %v1235_v12  ;;  %1240 = vtanh.f32 %v662_v11 }
  0xd8   : > { %v1237_v15 = vpop.eup %1236  ;;  %1242 = vtanh.f32 %v544_v13 }
  0xd9   : > { %776 = vst [vmem:[%s1479_s30 + $0xa0] sm:$0xff] %v1237_v15  ;;  %1244 = vtanh.f32 %v584_v14 }
  0xdc   : > { %v1239_v16 = vpop.eup %1238 }
  0xdd   : > { %v1241_v17 = vpop.eup %1240  ;;  %792 = vst [vmem:[%s1479_s30 + $0x120] sm:$0xff] %v1239_v16  ;;  %v624_v18 = vpop.f32.mrf.mxu2 }
  0xde   : > { %v664_v19 = vpop.f32.mrf.mxu3  ;;  %v1243_v20 = vpop.eup %1242  ;;  %808 = vst [vmem:[%s1479_s30 + $0x1a0] sm:$0xff] %v1241_v17  ;;  %1246 = vtanh.f32 %v624_v18 }
  0xdf   : > { %v547_v21 = vpop.f32.mrf.mxu0  ;;  %v587_v22 = vpop.f32.mrf.mxu1  ;;  %761 = vst [vmem:[%s1479_s30 + $0x28] sm:$0xff] %v1243_v20  ;;  %1248 = vtanh.f32 %v664_v19 }
  0xe0   : > { %v1245_v23 = vpop.eup %1244  ;;  %1250 = vtanh.f32 %v547_v21 }
  0xe1   : > { %777 = vst [vmem:[%s1479_s30 + $0xa8] sm:$0xff] %v1245_v23  ;;  %1252 = vtanh.f32 %v587_v22 }
  0xe4   : > { %v1247_v24 = vpop.eup %1246 }
  0xe5   : > { %v1249_v25 = vpop.eup %1248  ;;  %793 = vst [vmem:[%s1479_s30 + $0x128] sm:$0xff] %v1247_v24  ;;  %v627_v26 = vpop.f32.mrf.mxu2 }
  0xe6   : > { %v667_v27 = vpop.f32.mrf.mxu3  ;;  %v1251_v28 = vpop.eup %1250  ;;  %809 = vst [vmem:[%s1479_s30 + $0x1a8] sm:$0xff] %v1249_v25  ;;  %1254 = vtanh.f32 %v627_v26 }
  0xe7   : > { %v549_v29 = vpop.f32.mrf.mxu0  ;;  %v589_v30 = vpop.f32.mrf.mxu1  ;;  %762 = vst [vmem:[%s1479_s30 + $0x30] sm:$0xff] %v1251_v28  ;;  %1256 = vtanh.f32 %v667_v27 }
  0xe8   : > { %v1253_v31 = vpop.eup %1252  ;;  %1258 = vtanh.f32 %v549_v29 }
  0xe9   : > { %778 = vst [vmem:[%s1479_s30 + $0xb0] sm:$0xff] %v1253_v31  ;;  %1260 = vtanh.f32 %v589_v30 }
  0xec   : > { %v1255_v32 = vpop.eup %1254 }
  0xed   : > { %v1257_v33 = vpop.eup %1256  ;;  %794 = vst [vmem:[%s1479_s30 + $0x130] sm:$0xff] %v1255_v32  ;;  %v629_v34 = vpop.f32.mrf.mxu2 }
  0xee   : > { %v669_v35 = vpop.f32.mrf.mxu3  ;;  %v1259_v36 = vpop.eup %1258  ;;  %810 = vst [vmem:[%s1479_s30 + $0x1b0] sm:$0xff] %v1257_v33  ;;  %1262 = vtanh.f32 %v629_v34 }
  0xef   : > { %v552_v37 = vpop.f32.mrf.mxu0  ;;  %v592_v38 = vpop.f32.mrf.mxu1  ;;  %763 = vst [vmem:[%s1479_s30 + $0x38] sm:$0xff] %v1259_v36  ;;  %1264 = vtanh.f32 %v669_v35 }
  0xf0   : > { %v1261_v39 = vpop.eup %1260  ;;  %1266 = vtanh.f32 %v552_v37 }
  0xf1   : > { %779 = vst [vmem:[%s1479_s30 + $0xb8] sm:$0xff] %v1261_v39  ;;  %1268 = vtanh.f32 %v592_v38 }
  0xf4   : > { %v1263_v40 = vpop.eup %1262 }
  0xf5   : > { %v1265_v41 = vpop.eup %1264  ;;  %795 = vst [vmem:[%s1479_s30 + $0x138] sm:$0xff] %v1263_v40  ;;  %v632_v42 = vpop.f32.mrf.mxu2 }
  0xf6   : > { %v672_v43 = vpop.f32.mrf.mxu3  ;;  %v1267_v44 = vpop.eup %1266  ;;  %811 = vst [vmem:[%s1479_s30 + $0x1b8] sm:$0xff] %v1265_v41  ;;  %1270 = vtanh.f32 %v632_v42 }
  0xf7   : > { %v554_v45 = vpop.f32.mrf.mxu0  ;;  %v594_v46 = vpop.f32.mrf.mxu1  ;;  %764 = vst [vmem:[%s1479_s30 + $0x40] sm:$0xff] %v1267_v44  ;;  %1272 = vtanh.f32 %v672_v43 }
  0xf8   : > { %v1269_v47 = vpop.eup %1268  ;;  %1274 = vtanh.f32 %v554_v45 }
  0xf9   : > { %780 = vst [vmem:[%s1479_s30 + $0xc0] sm:$0xff] %v1269_v47  ;;  %1276 = vtanh.f32 %v594_v46 }
  0xfc   : > { %v1271_v48 = vpop.eup %1270 }
  0xfd   : > { %v1273_v49 = vpop.eup %1272  ;;  %796 = vst [vmem:[%s1479_s30 + $0x140] sm:$0xff] %v1271_v48  ;;  %v634_v50 = vpop.f32.mrf.mxu2 }
  0xfe   : > { %v674_v51 = vpop.f32.mrf.mxu3  ;;  %v1275_v52 = vpop.eup %1274  ;;  %812 = vst [vmem:[%s1479_s30 + $0x1c0] sm:$0xff] %v1273_v49  ;;  %1278 = vtanh.f32 %v634_v50 }
  0xff   : > { %v557_v53 = vpop.f32.mrf.mxu0  ;;  %v597_v54 = vpop.f32.mrf.mxu1  ;;  %765 = vst [vmem:[%s1479_s30 + $0x48] sm:$0xff] %v1275_v52  ;;  %1280 = vtanh.f32 %v674_v51 }
 0x100   : > { %v1277_v55 = vpop.eup %1276  ;;  %1282 = vtanh.f32 %v557_v53 }
 0x101   : > { %781 = vst [vmem:[%s1479_s30 + $0xc8] sm:$0xff] %v1277_v55  ;;  %1284 = vtanh.f32 %v597_v54 }
 0x104   : > { %v1279_v56 = vpop.eup %1278 }
 0x105   : > { %v1281_v57 = vpop.eup %1280  ;;  %797 = vst [vmem:[%s1479_s30 + $0x148] sm:$0xff] %v1279_v56  ;;  %v637_v58 = vpop.f32.mrf.mxu2 }
 0x106   : > { %v677_v59 = vpop.f32.mrf.mxu3  ;;  %v1283_v60 = vpop.eup %1282  ;;  %813 = vst [vmem:[%s1479_s30 + $0x1c8] sm:$0xff] %v1281_v57  ;;  %1286 = vtanh.f32 %v637_v58 }
 0x107   : > { %v559_v61 = vpop.f32.mrf.mxu0  ;;  %v599_v62 = vpop.f32.mrf.mxu1  ;;  %766 = vst [vmem:[%s1479_s30 + $0x50] sm:$0xff] %v1283_v60  ;;  %1288 = vtanh.f32 %v677_v59 }
 0x108   : > { %v1285_v63 = vpop.eup %1284  ;;  %1290 = vtanh.f32 %v559_v61 }
 0x109   : > { %782 = vst [vmem:[%s1479_s30 + $0xd0] sm:$0xff] %v1285_v63  ;;  %1292 = vtanh.f32 %v599_v62 }
 0x10c   : > { %v1287_v0 = vpop.eup %1286 }
 0x10d   : > { %v1289_v1 = vpop.eup %1288  ;;  %798 = vst [vmem:[%s1479_s30 + $0x150] sm:$0xff] %v1287_v0  ;;  %v639_v2 = vpop.f32.mrf.mxu2 }
 0x10e   : > { %v679_v3 = vpop.f32.mrf.mxu3  ;;  %v1291_v4 = vpop.eup %1290  ;;  %814 = vst [vmem:[%s1479_s30 + $0x1d0] sm:$0xff] %v1289_v1  ;;  %1294 = vtanh.f32 %v639_v2 }
 0x10f   : > { %v562_v5 = vpop.f32.mrf.mxu0  ;;  %v602_v6 = vpop.f32.mrf.mxu1  ;;  %767 = vst [vmem:[%s1479_s30 + $0x58] sm:$0xff] %v1291_v4  ;;  %1296 = vtanh.f32 %v679_v3 }
 0x110   : > { %v1293_v7 = vpop.eup %1292  ;;  %1298 = vtanh.f32 %v562_v5 }
 0x111   : > { %783 = vst [vmem:[%s1479_s30 + $0xd8] sm:$0xff] %v1293_v7  ;;  %1300 = vtanh.f32 %v602_v6 }
 0x114   : > { %v1295_v8 = vpop.eup %1294 }
 0x115   : > { %v1297_v9 = vpop.eup %1296  ;;  %799 = vst [vmem:[%s1479_s30 + $0x158] sm:$0xff] %v1295_v8  ;;  %v642_v10 = vpop.f32.mrf.mxu2 }
 0x116   : > { %v682_v11 = vpop.f32.mrf.mxu3  ;;  %v1299_v12 = vpop.eup %1298  ;;  %815 = vst [vmem:[%s1479_s30 + $0x1d8] sm:$0xff] %v1297_v9  ;;  %1302 = vtanh.f32 %v642_v10 }
 0x117   : > { %v564_v13 = vpop.f32.mrf.mxu0  ;;  %v604_v14 = vpop.f32.mrf.mxu1  ;;  %768 = vst [vmem:[%s1479_s30 + $0x60] sm:$0xff] %v1299_v12  ;;  %1304 = vtanh.f32 %v682_v11 }
 0x118   : > { %v1301_v15 = vpop.eup %1300  ;;  %1306 = vtanh.f32 %v564_v13 }
 0x119   : > { %784 = vst [vmem:[%s1479_s30 + $0xe0] sm:$0xff] %v1301_v15  ;;  %1308 = vtanh.f32 %v604_v14 }
 0x11c   : > { %v1303_v16 = vpop.eup %1302 }
 0x11d   : > { %v1305_v17 = vpop.eup %1304  ;;  %800 = vst [vmem:[%s1479_s30 + $0x160] sm:$0xff] %v1303_v16  ;;  %v644_v18 = vpop.f32.mrf.mxu2 }
 0x11e   : > { %v684_v19 = vpop.f32.mrf.mxu3  ;;  %v1307_v20 = vpop.eup %1306  ;;  %816 = vst [vmem:[%s1479_s30 + $0x1e0] sm:$0xff] %v1305_v17  ;;  %1310 = vtanh.f32 %v644_v18 }
 0x11f   : > { %v567_v21 = vpop.f32.mrf.mxu0  ;;  %v607_v22 = vpop.f32.mrf.mxu1  ;;  %769 = vst [vmem:[%s1479_s30 + $0x68] sm:$0xff] %v1307_v20  ;;  %1312 = vtanh.f32 %v684_v19 }
 0x120   : > { %v1309_v23 = vpop.eup %1308  ;;  %1314 = vtanh.f32 %v567_v21 }
 0x121   : > { %785 = vst [vmem:[%s1479_s30 + $0xe8] sm:$0xff] %v1309_v23  ;;  %1316 = vtanh.f32 %v607_v22 }
 0x124   : > { %v1311_v24 = vpop.eup %1310 }
 0x125   : > { %v1313_v25 = vpop.eup %1312  ;;  %801 = vst [vmem:[%s1479_s30 + $0x168] sm:$0xff] %v1311_v24  ;;  %v647_v26 = vpop.f32.mrf.mxu2 }
 0x126   : > { %v687_v27 = vpop.f32.mrf.mxu3  ;;  %v1315_v28 = vpop.eup %1314  ;;  %817 = vst [vmem:[%s1479_s30 + $0x1e8] sm:$0xff] %v1313_v25  ;;  %1318 = vtanh.f32 %v647_v26 }
 0x127   : > { %v569_v29 = vpop.f32.mrf.mxu0  ;;  %v609_v30 = vpop.f32.mrf.mxu1  ;;  %770 = vst [vmem:[%s1479_s30 + $0x70] sm:$0xff] %v1315_v28  ;;  %1320 = vtanh.f32 %v687_v27 }
 0x128   : > { %v1317_v31 = vpop.eup %1316  ;;  %1322 = vtanh.f32 %v569_v29 }
 0x129   : > { %786 = vst [vmem:[%s1479_s30 + $0xf0] sm:$0xff] %v1317_v31  ;;  %1324 = vtanh.f32 %v609_v30 }
 0x12c   : > { %v1319_v32 = vpop.eup %1318 }
 0x12d   : > { %v1321_v33 = vpop.eup %1320  ;;  %802 = vst [vmem:[%s1479_s30 + $0x170] sm:$0xff] %v1319_v32  ;;  %v649_v34 = vpop.f32.mrf.mxu2 }
 0x12e   : > { %v689_v35 = vpop.f32.mrf.mxu3  ;;  %v1323_v36 = vpop.eup %1322  ;;  %818 = vst [vmem:[%s1479_s30 + $0x1f0] sm:$0xff] %v1321_v33  ;;  %1326 = vtanh.f32 %v649_v34 }
 0x12f   : > { %v1325_v37 = vpop.eup %1324  ;;  %771 = vst [vmem:[%s1479_s30 + $0x78] sm:$0xff] %v1323_v36  ;;  %1328 = vtanh.f32 %v689_v35 }
 0x130   : > { %787 = vst [vmem:[%s1479_s30 + $0xf8] sm:$0xff] %v1325_v37 }
 0x134   : > { %v1327_v38 = vpop.eup %1326 }
 0x135   : > { %v1329_v39 = vpop.eup %1328  ;;  %803 = vst [vmem:[%s1479_s30 + $0x178] sm:$0xff] %v1327_v38 }
 0x136   : > { %819 = vst [vmem:[%s1479_s30 + $0x1f8] sm:$0xff] %v1329_v39 }
 0x137 PF: > { %s12_s13 = sadd.s32 1, %s1368_s13   ;;  %s1563_s9 = smov %s1360_s11 }
 0x138   : > { %p9_p7 = scmp.ge.s32.totalorder %s12_s13, 18   ;;  %s1564_s10 = smov %s1364_s12 }
 0x139   : > { %s1565_s11 = smov %s1568_s14  ;;  %s1566_s12 = smov %s1572_s15 }
 0x13a   :  { %11 = sbr.rel (!%p9_p7) target bundleno = 3 (0x3), region = 61 }

</bundles_post_ra>
